<compile_context>
chip_gen: v7x
topology: tpu7x:2x2x1
jax: 0.10.0
libtpu: 0.0.40
codegen_flags: <defaults>
</compile_context>

<pallas_src>
import math

import jax
import jax.numpy as jnp
from jax.experimental import pallas as pl
from jax.experimental.pallas import tpu as pltpu

# ----------------------------- hyper-params (small, synthetic) -----------------------------
B = 2              # batch
T = 16             # speech frames
IDIM = 8           # input feature dim
HID = 32           # hidden_dim
HEADS = 4          # attention_heads
DH = HID // HEADS
FF = 64            # linear_units
EBLOCKS = 2
DBLOCKS = 2
ODIM = 16          # vocab size
IGNORE_ID = -1     # text_pad
SOS = ODIM - 1
EOS = ODIM - 1
SMOOTHING = 0.1
YMAX = 7           # max target length (padded) -> decoder length LDEC = 8 (sublane aligned)
LDEC = YMAX + 1

SCALE = 1.0 / math.sqrt(DH)
SQRT_HID = math.sqrt(HID)
NEG_INF = -1e9
CONFIDENCE = 1.0 - SMOOTHING
SMOOTH_VAL = SMOOTHING / (ODIM - 1)
VW = 3 * HID       # packed small-param row width (>= 3*HID, 2*HID, FF, HID)


# ----------------------------- in-kernel helpers (values, not refs) -----------------------------
def _ln(x, g, b):
    mu = jnp.mean(x, axis=-1, keepdims=True)
    var = jnp.mean((x - mu) ** 2, axis=-1, keepdims=True)
    return (x - mu) * jax.lax.rsqrt(var + 1e-12) * g + b


def _ffn(x, w1, b1, w2, b2):
    h = jnp.maximum(jnp.dot(x, w1, preferred_element_type=jnp.float32) + b1, 0.0)
    return jnp.dot(h, w2, preferred_element_type=jnp.float32) + b2


def _pad_mask(klen, lq, lk):
    col = jax.lax.broadcasted_iota(jnp.int32, (lq, lk), 1)
    return jnp.where(col < klen, 0.0, NEG_INF).astype(jnp.float32)


def _causal_pad_mask(klen, ll):
    row = jax.lax.broadcasted_iota(jnp.int32, (ll, ll), 0)
    col = jax.lax.broadcasted_iota(jnp.int32, (ll, ll), 1)
    return jnp.where((col <= row) & (col < klen), 0.0, NEG_INF).astype(jnp.float32)


def _mha(ctx_ref, q, k, v, addmask):
    """Per-head attention; heads written into lane slices of ctx_ref (Lq, HID) so a single
    K=HID output-projection matmul can be used by the caller."""
    # TODO(synk): replace the static HEADS loop with fori_loop(unroll=True) / lane-dense DH
    #             at realistic sizes.
    for h in range(HEADS):
        sl = slice(h * DH, (h + 1) * DH)
        s = jax.lax.dot_general(q[:, sl], k[:, sl], (((1,), (1,)), ((), ())),
                                preferred_element_type=jnp.float32) * SCALE + addmask
        s = s - jnp.max(s, axis=-1, keepdims=True)
        p = jnp.exp(s)
        # approx reciprocal on the EUP; use exact divide if bit-tight parity is required.
        p = p * pl.reciprocal(jnp.sum(p, axis=-1, keepdims=True), approx=True)
        ctx_ref[:, sl] = jnp.dot(p, v[:, sl], preferred_element_type=jnp.float32)


# ----------------------------- fused encoder kernel (grid over layers) -----------------------------
def _encoder_kernel(xlens_ref,                                   # scalar prefetch (SMEM, (B,))
                    x_ref, pe_ref, embw_ref, fix_ref,            # fixed inputs
                    wqkv_ref, wo_ref, w1_ref, w2_ref, vec_ref,   # per-layer (leading layer axis)
                    o_ref,                                       # (B*T, HID) output
                    xres, ctx):                                  # VMEM scratch
    l = pl.program_id(0)

    @pl.when(l == 0)
    def _():
        # input embedding: Linear -> LayerNorm -> ReLU -> x*sqrt(d) + PE
        y = jnp.dot(x_ref[...], embw_ref[...],
                    preferred_element_type=jnp.float32) + fix_ref[0:1, :]
        y = _ln(y, fix_ref[1:2, :], fix_ref[2:3, :])
        y = jnp.maximum(y, 0.0)
        xres[...] = y * SQRT_HID + pe_ref[...]

    vec = vec_ref[0]                                             # (8, VW) packed small params
    ln1_g, ln1_b = vec[0:1, 0:HID], vec[1:2, 0:HID]
    ln2_g, ln2_b = vec[2:3, 0:HID], vec[3:4, 0:HID]
    bqkv = vec[4:5, :]
    bo = vec[5:6, 0:HID]
    b1 = vec[6:7, 0:FF]
    b2 = vec[7:8, 0:HID]

    # --- pre-LN self-attention, residual written per batch into tile-aligned row slices ---
    x = xres[...]
    xn = _ln(x, ln1_g, ln1_b)
    qkv = jnp.dot(xn, wqkv_ref[0], preferred_element_type=jnp.float32) + bqkv
    for b in range(B):
        r = b * T
        mask = _pad_mask(xlens_ref[b], T, T)
        _mha(ctx, qkv[r:r + T, 0:HID], qkv[r:r + T, HID:2 * HID],
             qkv[r:r + T, 2 * HID:3 * HID], mask)
        att = jnp.dot(ctx[...], wo_ref[0], preferred_element_type=jnp.float32)
        xres[r:r + T, :] = x[r:r + T, :] + att + bo

    # --- feed-forward with residual ---
    x = xres[...]
    xn = _ln(x, ln2_g, ln2_b)
    xres[...] = x + _ffn(xn, w1_ref[0], b1, w2_ref[0], b2)

    @pl.when(l == EBLOCKS - 1)
    def _():
        o_ref[...] = _ln(xres[...], fix_ref[3:4, :], fix_ref[4:5, :])


# ----------------------------- fused decoder + loss kernel (grid over layers) -----------------------------
def _decoder_kernel(ylens_ref, elens_ref,                        # scalar prefetch (SMEM, (B,))
                    x_ref, enc_ref, tgt_ref, fix_ref, outw_ref,  # fixed inputs
                    wqkv_s_ref, wo_s_ref, wq_c_ref, wkv_c_ref, wo_c_ref,
                    w1_ref, w2_ref, vec_ref,                     # per-layer
                    o_ref,                                       # (1,1) SMEM loss
                    xres, ctx):                                  # VMEM scratch
    l = pl.program_id(0)

    @pl.when(l == 0)
    def _():
        xres[...] = x_ref[...]

    vec = vec_ref[0]                                             # (13, VW) packed small params
    ln1_g, ln1_b = vec[0:1, 0:HID], vec[1:2, 0:HID]
    ln2_g, ln2_b = vec[2:3, 0:HID], vec[3:4, 0:HID]
    ln3_g, ln3_b = vec[4:5, 0:HID], vec[5:6, 0:HID]
    bqkv_s = vec[6:7, :]
    bo_s = vec[7:8, 0:HID]
    bq_c = vec[8:9, 0:HID]
    bkv_c = vec[9:10, 0:2 * HID]
    bo_c = vec[10:11, 0:HID]
    b1 = vec[11:12, 0:FF]
    b2 = vec[12:13, 0:HID]

    # --- masked causal self-attention ---
    x = xres[...]
    xn = _ln(x, ln1_g, ln1_b)
    qkv = jnp.dot(xn, wqkv_s_ref[0], preferred_element_type=jnp.float32) + bqkv_s
    for b in range(B):
        r = b * LDEC
        mask = _causal_pad_mask(ylens_ref[b], LDEC)
        _mha(ctx, qkv[r:r + LDEC, 0:HID], qkv[r:r + LDEC, HID:2 * HID],
             qkv[r:r + LDEC, 2 * HID:3 * HID], mask)
        att = jnp.dot(ctx[...], wo_s_ref[0], preferred_element_type=jnp.float32)
        xres[r:r + LDEC, :] = x[r:r + LDEC, :] + att + bo_s

    # --- cross-attention over encoder output (packed K|V projection) ---
    x = xres[...]
    xn = _ln(x, ln2_g, ln2_b)
    q_all = jnp.dot(xn, wq_c_ref[0], preferred_element_type=jnp.float32) + bq_c
    kv_all = jnp.dot(enc_ref[...], wkv_c_ref[0], preferred_element_type=jnp.float32) + bkv_c
    for b in range(B):
        r = b * LDEC
        e = b * T
        mask = _pad_mask(elens_ref[b], LDEC, T)
        _mha(ctx, q_all[r:r + LDEC, :], kv_all[e:e + T, 0:HID],
             kv_all[e:e + T, HID:2 * HID], mask)
        att = jnp.dot(ctx[...], wo_c_ref[0], preferred_element_type=jnp.float32)
        xres[r:r + LDEC, :] = x[r:r + LDEC, :] + att + bo_c

    # --- feed-forward with residual ---
    x = xres[...]
    xn = _ln(x, ln3_g, ln3_b)
    xres[...] = x + _ffn(xn, w1_ref[0], b1, w2_ref[0], b2)

    # --- final LN -> output projection -> log-softmax -> label-smoothing KL -> scalar ---
    @pl.when(l == DBLOCKS - 1)
    def _():
        xn2 = _ln(xres[...], fix_ref[0:1, :], fix_ref[1:2, :])
        logits = jnp.dot(xn2, outw_ref[...],
                         preferred_element_type=jnp.float32) + fix_ref[2:3, 0:ODIM]
        m = jnp.max(logits, axis=-1, keepdims=True)
        lse = m + jnp.log(jnp.sum(jnp.exp(logits - m), axis=-1, keepdims=True))
        logp = logits - lse
        tgt = tgt_ref[...]                                        # (B*LDEC, 1) int32
        colv = jax.lax.broadcasted_iota(jnp.int32, (B * LDEC, ODIM), 1)
        oh = (colv == tgt).astype(jnp.float32)                    # one-hot built in-kernel
        true_dist = oh * CONFIDENCE + (1.0 - oh) * SMOOTH_VAL
        kl = true_dist * (jnp.log(true_dist) - logp)              # KLDivLoss(log_softmax, true_dist)
        valid = (tgt != IGNORE_ID).astype(jnp.float32)
        total = jnp.sum(jnp.sum(kl, axis=-1, keepdims=True) * valid)
        denom = jnp.maximum(jnp.sum(valid), 1.0)                  # normalize_length=True
        o_ref[0, 0] = total / denom


# ----------------------------- pallas_call wrappers -----------------------------
def encoder_forward(p, xs, xlens):
    grid_spec = pltpu.PrefetchScalarGridSpec(
        num_scalar_prefetch=1,
        grid=(EBLOCKS,),
        in_specs=[
            pl.BlockSpec((B * T, IDIM), lambda l, xl: (0, 0)),            # x
            pl.BlockSpec((B * T, HID), lambda l, xl: (0, 0)),             # pe
            pl.BlockSpec((IDIM, HID), lambda l, xl: (0, 0)),              # embed w
            pl.BlockSpec((5, HID), lambda l, xl: (0, 0)),                 # fixed vecs
            pl.BlockSpec((1, HID, 3 * HID), lambda l, xl: (l, 0, 0)),     # wqkv (stacked)
            pl.BlockSpec((1, HID, HID), lambda l, xl: (l, 0, 0)),         # wo
            pl.BlockSpec((1, HID, FF), lambda l, xl: (l, 0, 0)),          # w1
            pl.BlockSpec((1, FF, HID), lambda l, xl: (l, 0, 0)),          # w2
            pl.BlockSpec((1, 8, VW), lambda l, xl: (l, 0, 0)),            # packed small params
        ],
        out_specs=pl.BlockSpec((B * T, HID), lambda l, xl: (0, 0)),
        scratch_shapes=[pltpu.VMEM((B * T, HID), jnp.float32),            # residual stream
                        pltpu.VMEM((T, HID), jnp.float32)],               # per-batch head context
    )
    return pl.pallas_call(
        _encoder_kernel,
        out_shape=jax.ShapeDtypeStruct((B * T, HID), jnp.float32),
        grid_spec=grid_spec,
        compiler_params=pltpu.CompilerParams(dimension_semantics=("arbitrary",)),
    )(xlens.astype(jnp.int32), xs.reshape(B * T, IDIM), p['pe'], p['x_w'], p['fix'],
      p['wqkv'], p['wo'], p['w1'], p['w2'], p['vec'])


def decoder_forward_loss(p, enc2d, enc_lens, ys_in, ys_in_lens, ys_out):
    # token embedding gather + sqrt(d) scale + PE stays in plain JAX (cheap, runs once)
    x_in = jnp.take(p['embed'], ys_in, axis=0).reshape(B * LDEC, HID) * SQRT_HID + p['pe']
    tgt = ys_out.reshape(B * LDEC, 1).astype(jnp.int32)
    grid_spec = pltpu.PrefetchScalarGridSpec(
        num_scalar_prefetch=2,
        grid=(DBLOCKS,),
        in_specs=[
            pl.BlockSpec((B * LDEC, HID), lambda l, yl, el: (0, 0)),          # embedded input
            pl.BlockSpec((B * T, HID), lambda l, yl, el: (0, 0)),             # encoder out
            pl.BlockSpec((B * LDEC, 1), lambda l, yl, el: (0, 0)),            # targets
            pl.BlockSpec((3, HID), lambda l, yl, el: (0, 0)),                 # fixed vecs
            pl.BlockSpec((HID, ODIM), lambda l, yl, el: (0, 0)),              # output proj w
            pl.BlockSpec((1, HID, 3 * HID), lambda l, yl, el: (l, 0, 0)),     # wqkv (self)
            pl.BlockSpec((1, HID, HID), lambda l, yl, el: (l, 0, 0)),         # wo   (self)
            pl.BlockSpec((1, HID, HID), lambda l, yl, el: (l, 0, 0)),         # wq   (cross)
            pl.BlockSpec((1, HID, 2 * HID), lambda l, yl, el: (l, 0, 0)),     # wkv  (cross)
            pl.BlockSpec((1, HID, HID), lambda l, yl, el: (l, 0, 0)),         # wo   (cross)
            pl.BlockSpec((1, HID, FF), lambda l, yl, el: (l, 0, 0)),          # w1
            pl.BlockSpec((1, FF, HID), lambda l, yl, el: (l, 0, 0)),          # w2
            pl.BlockSpec((1, 13, VW), lambda l, yl, el: (l, 0, 0)),           # packed small params
        ],
        out_specs=pl.BlockSpec((1, 1), lambda l, yl, el: (0, 0),
                               memory_space=pltpu.MemorySpace.SMEM),
        scratch_shapes=[pltpu.VMEM((B * LDEC, HID), jnp.float32),             # residual stream
                        pltpu.VMEM((LDEC, HID), jnp.float32)],                # head context
    )
    out = pl.pallas_call(
        _decoder_kernel,
        out_shape=jax.ShapeDtypeStruct((1, 1), jnp.float32),
        grid_spec=grid_spec,
        compiler_params=pltpu.CompilerParams(dimension_semantics=("arbitrary",)),
    )(ys_in_lens.astype(jnp.int32), enc_lens.astype(jnp.int32),
      x_in, enc2d, tgt, p['fix'], p['out_w'],
      p['wqkv_s'], p['wo_s'], p['wq_c'], p['wkv_c'], p['wo_c'],
      p['w1'], p['w2'], p['vec'])
    return out[0, 0]


# ----------------------------- plain-JAX glue -----------------------------
def sinusoidal_pe(maxlen, d):
    pos = jnp.arange(maxlen, dtype=jnp.float32)[:, None]
    div = jnp.exp(jnp.arange(0, d, 2, dtype=jnp.float32) * (-math.log(10000.0) / d))
    pe = jnp.zeros((maxlen, d), jnp.float32)
    pe = pe.at[:, 0::2].set(jnp.sin(pos * div))
    pe = pe.at[:, 1::2].set(jnp.cos(pos * div))
    return pe


def add_sos_eos(ys, ylens):
    Bb, Lmax = ys.shape
    L = Lmax + 1
    idx = jnp.arange(L)[None, :]
    ys_clean = jnp.where(ys == IGNORE_ID, EOS, ys)
    ys_in = jnp.concatenate([jnp.full((Bb, 1), SOS, ys.dtype), ys_clean], axis=1)
    ys_in = jnp.where(idx <= ylens[:, None], ys_in, EOS)
    ys_out = jnp.concatenate([ys_clean, jnp.full((Bb, 1), EOS, ys.dtype)], axis=1)
    ys_out = jnp.where(idx < ylens[:, None], ys_out,
                       jnp.where(idx == ylens[:, None], EOS, IGNORE_ID))
    return ys_in, ys_out


def asr_forward(params, xs, xlens, ys, ylens):
    enc2d = encoder_forward(params['enc'], xs, xlens)
    ys_in, ys_out = add_sos_eos(ys, ylens)
    # linear embedding => encoder_out_lens == xlens
    return decoder_forward_loss(params['dec'], enc2d, xlens, ys_in, ylens + 1, ys_out)


# ----------------------------- deterministic parameter init -----------------------------
def _uniform(key, shape, din):
    lim = 1.0 / math.sqrt(din)
    return jax.random.uniform(key, shape, jnp.float32, -lim, lim)


def _pad_row(v, width):
    v = jnp.reshape(v, (-1,))
    return jnp.pad(v, (0, width - v.shape[0]))


def init_params(key):
    ke, kd = jax.random.split(key)
    ones = jnp.ones((HID,), jnp.float32)
    zeros = jnp.zeros((HID,), jnp.float32)
    pe = sinusoidal_pe(max(T, LDEC), HID)

    # ----- encoder -----
    keys = jax.random.split(ke, EBLOCKS + 2)
    enc = {
        'x_w': _uniform(keys[0], (IDIM, HID), IDIM),
        # fixed vecs: [emb_b, emb_ln_g, emb_ln_b, final_ln_g, final_ln_b]
        'fix': jnp.stack([_uniform(keys[1], (HID,), IDIM), ones, zeros, ones, zeros]),
        'pe': jnp.tile(pe[:T], (B, 1)),
        'wqkv': [], 'wo': [], 'w1': [], 'w2': [], 'vec': [],
    }
    for i in range(EBLOCKS):
        k = jax.random.split(keys[i + 2], 8)
        wqkv = _uniform(k[0], (HID, 3 * HID), HID); bqkv = _uniform(k[1], (3 * HID,), HID)
        wo = _uniform(k[2], (HID, HID), HID);       bo = _uniform(k[3], (HID,), HID)
        w1 = _uniform(k[4], (HID, FF), HID);        b1 = _uniform(k[5], (FF,), HID)
        w2 = _uniform(k[6], (FF, HID), FF);         b2 = _uniform(k[7], (HID,), FF)
        enc['wqkv'].append(wqkv); enc['wo'].append(wo)
        enc['w1'].append(w1); enc['w2'].append(w2)
        enc['vec'].append(jnp.stack([
            _pad_row(ones, VW), _pad_row(zeros, VW),            # ln1 g, b
            _pad_row(ones, VW), _pad_row(zeros, VW),            # ln2 g, b
            _pad_row(bqkv, VW), _pad_row(bo, VW),
            _pad_row(b1, VW), _pad_row(b2, VW)]))
    for name in ('wqkv', 'wo', 'w1', 'w2', 'vec'):
        enc[name] = jnp.stack(enc[name])

    # ----- decoder -----
    keys = jax.random.split(kd, DBLOCKS + 3)
    out_b = _uniform(keys[2], (ODIM,), HID)
    dec = {
        'embed': jax.random.normal(keys[0], (ODIM, HID), jnp.float32) * 0.1,
        'pe': jnp.tile(pe[:LDEC], (B, 1)),
        'out_w': _uniform(keys[1], (HID, ODIM), HID),
        # fixed vecs: [final_ln_g, final_ln_b, out_b (zero-padded to HID)]
        'fix': jnp.stack([ones, zeros, _pad_row(out_b, HID)]),
        'wqkv_s': [], 'wo_s': [], 'wq_c': [], 'wkv_c': [], 'wo_c': [],
        'w1': [], 'w2': [], 'vec': [],
    }
    for i in range(DBLOCKS):
        k = jax.random.split(keys[i + 3], 14)
        wqkv_s = _uniform(k[0], (HID, 3 * HID), HID); bqkv_s = _uniform(k[1], (3 * HID,), HID)
        wo_s = _uniform(k[2], (HID, HID), HID);       bo_s = _uniform(k[3], (HID,), HID)
        wq_c = _uniform(k[4], (HID, HID), HID);       bq_c = _uniform(k[5], (HID,), HID)
        wkv_c = _uniform(k[6], (HID, 2 * HID), HID);  bkv_c = _uniform(k[7], (2 * HID,), HID)
        wo_c = _uniform(k[8], (HID, HID), HID);       bo_c = _uniform(k[9], (HID,), HID)
        w1 = _uniform(k[10], (HID, FF), HID);         b1 = _uniform(k[11], (FF,), HID)
        w2 = _uniform(k[12], (FF, HID), FF);          b2 = _uniform(k[13], (HID,), FF)
        dec['wqkv_s'].append(wqkv_s); dec['wo_s'].append(wo_s)
        dec['wq_c'].append(wq_c); dec['wkv_c'].append(wkv_c); dec['wo_c'].append(wo_c)
        dec['w1'].append(w1); dec['w2'].append(w2)
        dec['vec'].append(jnp.stack([
            _pad_row(ones, VW), _pad_row(zeros, VW),            # ln1 g, b
            _pad_row(ones, VW), _pad_row(zeros, VW),            # ln2 g, b
            _pad_row(ones, VW), _pad_row(zeros, VW),            # ln3 g, b
            _pad_row(bqkv_s, VW), _pad_row(bo_s, VW),
            _pad_row(bq_c, VW), _pad_row(bkv_c, VW), _pad_row(bo_c, VW),
            _pad_row(b1, VW), _pad_row(b2, VW)]))
    for name in ('wqkv_s', 'wo_s', 'wq_c', 'wkv_c', 'wo_c', 'w1', 'w2', 'vec'):
        dec[name] = jnp.stack(dec[name])

    return {'enc': enc, 'dec': dec}


# ----------------------------- main -----------------------------
if __name__ == "__main__":
    root = jax.random.PRNGKey(0)
    kp, kx, ky = jax.random.split(root, 3)

    params = init_params(kp)
    xs = jax.random.normal(kx, (B, T, IDIM), jnp.float32)
    xlens = jnp.array([T, T - 4], jnp.int32)
    ylens = jnp.array([5, 3], jnp.int32)
    ys_raw = jax.random.randint(ky, (B, YMAX), 0, ODIM - 1, jnp.int32)
    ys = jnp.where(jnp.arange(YMAX)[None, :] < ylens[:, None], ys_raw, IGNORE_ID)

    loss = jax.jit(asr_forward)(params, xs, xlens, ys, ylens)
    loss = jax.block_until_ready(loss)
    assert jnp.isfinite(loss), "loss is not finite"
    print("KERNEL_OK")
</pallas_src>

<mosaic_0001>
module attributes {stable_mosaic.version = 11 : i64} {
  func.func @_encoder_kernel(%arg0: i32, %arg1: memref<2xi32, #tpu.memory_space<smem>>, %arg2: memref<32x8xf32, #tpu.memory_space<vmem>>, %arg3: memref<32x32xf32, #tpu.memory_space<vmem>>, %arg4: memref<8x32xf32, #tpu.memory_space<vmem>>, %arg5: memref<5x32xf32, #tpu.memory_space<vmem>>, %arg6: memref<1x32x96xf32, #tpu.memory_space<vmem>>, %arg7: memref<1x32x32xf32, #tpu.memory_space<vmem>>, %arg8: memref<1x32x64xf32, #tpu.memory_space<vmem>>, %arg9: memref<1x64x32xf32, #tpu.memory_space<vmem>>, %arg10: memref<1x8x96xf32, #tpu.memory_space<vmem>>, %arg11: memref<32x32xf32, #tpu.memory_space<vmem>>, %arg12: memref<32x32xf32, #tpu.memory_space<vmem>>, %arg13: memref<16x32xf32, #tpu.memory_space<vmem>>) attributes {dimension_semantics = [#tpu.dimension_semantics<arbitrary>], iteration_bounds = array<i64: 2>, scalar_prefetch = 1 : i64, scratch_operands = 2 : i64, tpu.core_type = #tpu.core_type<tc>, window_params = [{pipeline_mode = #tpu.pipeline_mode<synchronous>, transform_indices = @transform_0, window_bounds = array<i64: 32, 8>}, {pipeline_mode = #tpu.pipeline_mode<synchronous>, transform_indices = @transform_1, window_bounds = array<i64: 32, 32>}, {pipeline_mode = #tpu.pipeline_mode<synchronous>, transform_indices = @transform_2, window_bounds = array<i64: 8, 32>}, {pipeline_mode = #tpu.pipeline_mode<synchronous>, transform_indices = @transform_3, window_bounds = array<i64: 5, 32>}, {transform_indices = @transform_4, window_bounds = array<i64: 1, 32, 96>}, {transform_indices = @transform_5, window_bounds = array<i64: 1, 32, 32>}, {transform_indices = @transform_6, window_bounds = array<i64: 1, 32, 64>}, {transform_indices = @transform_7, window_bounds = array<i64: 1, 64, 32>}, {transform_indices = @transform_8, window_bounds = array<i64: 1, 8, 96>}, {pipeline_mode = #tpu.pipeline_mode<synchronous>, transform_indices = @transform_9, window_bounds = array<i64: 32, 32>}]} {
    %c0_i32 = arith.constant 0 : i32
    %0 = arith.cmpi eq, %arg0, %c0_i32 : i32
    %1 = arith.extui %0 : i1 to i32
    %c0_i32_0 = arith.constant 0 : i32
    %2 = arith.cmpi ne, %1, %c0_i32_0 : i32
    scf.if %2 {
      %c0_106 = arith.constant 0 : index
      %c0_107 = arith.constant 0 : index
      %271 = vector.load %arg2[%c0_106, %c0_107] : memref<32x8xf32, #tpu.memory_space<vmem>>, vector<32x8xf32>
      %c0_108 = arith.constant 0 : index
      %c0_109 = arith.constant 0 : index
      %272 = vector.load %arg4[%c0_108, %c0_109] : memref<8x32xf32, #tpu.memory_space<vmem>>, vector<8x32xf32>
      %cst_110 = arith.constant dense<0.000000e+00> : vector<32x32xf32>
      %273 = tpu.matmul %271, %272, %cst_110 {dimension_numbers = #tpu.dot_dimension_numbers<[1], [0], [0], [1], [0, 0, 1, 1], [], []>} : vector<32x8xf32>, vector<8x32xf32>, vector<32x32xf32> -> vector<32x32xf32>
      %c0_111 = arith.constant 0 : index
      %c0_112 = arith.constant 0 : index
      %274 = vector.load %arg5[%c0_111, %c0_112] : memref<5x32xf32, #tpu.memory_space<vmem>>, vector<1x32xf32>
      %275 = vector.broadcast %274 : vector<1x32xf32> to vector<32x32xf32>
      %276 = arith.addf %273, %275 : vector<32x32xf32>
      %c1_113 = arith.constant 1 : index
      %c0_114 = arith.constant 0 : index
      %277 = vector.load %arg5[%c1_113, %c0_114] : memref<5x32xf32, #tpu.memory_space<vmem>>, vector<1x32xf32>
      %c2 = arith.constant 2 : index
      %c0_115 = arith.constant 0 : index
      %278 = vector.load %arg5[%c2, %c0_115] : memref<5x32xf32, #tpu.memory_space<vmem>>, vector<1x32xf32>
      %cst_116 = arith.constant dense<0.000000e+00> : vector<32xf32>
      %279 = vector.multi_reduction <add>, %276, %cst_116 [1] : vector<32x32xf32> to vector<32xf32>
      %280 = vector.shape_cast %279 : vector<32xf32> to vector<32x1xf32>
      %cst_117 = arith.constant 3.200000e+01 : f32
      %281 = vector.broadcast %cst_117 : f32 to vector<32x1xf32>
      %282 = arith.divf %280, %281 : vector<32x1xf32>
      %283 = vector.broadcast %282 : vector<32x1xf32> to vector<32x32xf32>
      %284 = arith.subf %276, %283 : vector<32x32xf32>
      %285 = arith.mulf %284, %284 : vector<32x32xf32>
      %cst_118 = arith.constant dense<0.000000e+00> : vector<32xf32>
      %286 = vector.multi_reduction <add>, %285, %cst_118 [1] : vector<32x32xf32> to vector<32xf32>
      %287 = vector.shape_cast %286 : vector<32xf32> to vector<32x1xf32>
      %cst_119 = arith.constant 3.200000e+01 : f32
      %288 = vector.broadcast %cst_119 : f32 to vector<32x1xf32>
      %289 = arith.divf %287, %288 : vector<32x1xf32>
      %290 = vector.broadcast %282 : vector<32x1xf32> to vector<32x32xf32>
      %291 = arith.subf %276, %290 : vector<32x32xf32>
      %cst_120 = arith.constant 9.99999996E-13 : f32
      %292 = vector.broadcast %cst_120 : f32 to vector<32x1xf32>
      %293 = arith.addf %289, %292 : vector<32x1xf32>
      %294 = math.rsqrt %293 : vector<32x1xf32>
      %295 = vector.broadcast %294 : vector<32x1xf32> to vector<32x32xf32>
      %296 = arith.mulf %291, %295 : vector<32x32xf32>
      %297 = vector.broadcast %277 : vector<1x32xf32> to vector<32x32xf32>
      %298 = arith.mulf %296, %297 : vector<32x32xf32>
      %299 = vector.broadcast %278 : vector<1x32xf32> to vector<32x32xf32>
      %300 = arith.addf %298, %299 : vector<32x32xf32>
      %cst_121 = arith.constant 0.000000e+00 : f32
      %301 = vector.broadcast %cst_121 : f32 to vector<32x32xf32>
      %302 = arith.maximumf %300, %301 : vector<32x32xf32>
      %cst_122 = arith.constant 5.65685415 : f32
      %303 = vector.broadcast %cst_122 : f32 to vector<32x32xf32>
      %304 = arith.mulf %302, %303 : vector<32x32xf32>
      %c0_123 = arith.constant 0 : index
      %c0_124 = arith.constant 0 : index
      %305 = vector.load %arg3[%c0_123, %c0_124] : memref<32x32xf32, #tpu.memory_space<vmem>>, vector<32x32xf32>
      %306 = arith.addf %304, %305 : vector<32x32xf32>
      %c0_125 = arith.constant 0 : index
      %c0_126 = arith.constant 0 : index
      %307 = vector.load %arg12[%c0_125, %c0_126] : memref<32x32xf32, #tpu.memory_space<vmem>>, vector<32x32xf32>
      tpu.vector_store %arg12[%c0_125, %c0_126], %306 {strides = array<i32>} : memref<32x32xf32, #tpu.memory_space<vmem>>, vector<32x32xf32>,
    } else {
    }
    %c0 = arith.constant 0 : index
    %c0_1 = arith.constant 0 : index
    %c0_2 = arith.constant 0 : index
    %3 = vector.load %arg10[%c0, %c0_1, %c0_2] : memref<1x8x96xf32, #tpu.memory_space<vmem>>, vector<1x8x96xf32>
    %4 = vector.shape_cast %3 : vector<1x8x96xf32> to vector<8x96xf32>
    %5 = vector.extract_strided_slice %4 {offsets = [0, 0], sizes = [1, 32], strides = [1, 1]} : vector<8x96xf32> to vector<1x32xf32>
    %6 = vector.extract_strided_slice %4 {offsets = [1, 0], sizes = [1, 32], strides = [1, 1]} : vector<8x96xf32> to vector<1x32xf32>
    %7 = vector.extract_strided_slice %4 {offsets = [2, 0], sizes = [1, 32], strides = [1, 1]} : vector<8x96xf32> to vector<1x32xf32>
    %8 = vector.extract_strided_slice %4 {offsets = [3, 0], sizes = [1, 32], strides = [1, 1]} : vector<8x96xf32> to vector<1x32xf32>
    %9 = vector.extract_strided_slice %4 {offsets = [4, 0], sizes = [1, 96], strides = [1, 1]} : vector<8x96xf32> to vector<1x96xf32>
    %10 = vector.extract_strided_slice %4 {offsets = [5, 0], sizes = [1, 32], strides = [1, 1]} : vector<8x96xf32> to vector<1x32xf32>
    %11 = vector.extract_strided_slice %4 {offsets = [6, 0], sizes = [1, 64], strides = [1, 1]} : vector<8x96xf32> to vector<1x64xf32>
    %12 = vector.extract_strided_slice %4 {offsets = [7, 0], sizes = [1, 32], strides = [1, 1]} : vector<8x96xf32> to vector<1x32xf32>
    %c0_3 = arith.constant 0 : index
    %c0_4 = arith.constant 0 : index
    %13 = vector.load %arg12[%c0_3, %c0_4] : memref<32x32xf32, #tpu.memory_space<vmem>>, vector<32x32xf32>
    %cst = arith.constant dense<0.000000e+00> : vector<32xf32>
    %14 = vector.multi_reduction <add>, %13, %cst [1] : vector<32x32xf32> to vector<32xf32>
    %15 = vector.shape_cast %14 : vector<32xf32> to vector<32x1xf32>
    %cst_5 = arith.constant 3.200000e+01 : f32
    %16 = vector.broadcast %cst_5 : f32 to vector<32x1xf32>
    %17 = arith.divf %15, %16 : vector<32x1xf32>
    %18 = vector.broadcast %17 : vector<32x1xf32> to vector<32x32xf32>
    %19 = arith.subf %13, %18 : vector<32x32xf32>
    %20 = arith.mulf %19, %19 : vector<32x32xf32>
    %cst_6 = arith.constant dense<0.000000e+00> : vector<32xf32>
    %21 = vector.multi_reduction <add>, %20, %cst_6 [1] : vector<32x32xf32> to vector<32xf32>
    %22 = vector.shape_cast %21 : vector<32xf32> to vector<32x1xf32>
    %cst_7 = arith.constant 3.200000e+01 : f32
    %23 = vector.broadcast %cst_7 : f32 to vector<32x1xf32>
    %24 = arith.divf %22, %23 : vector<32x1xf32>
    %25 = vector.broadcast %17 : vector<32x1xf32> to vector<32x32xf32>
    %26 = arith.subf %13, %25 : vector<32x32xf32>
    %cst_8 = arith.constant 9.99999996E-13 : f32
    %27 = vector.broadcast %cst_8 : f32 to vector<32x1xf32>
    %28 = arith.addf %24, %27 : vector<32x1xf32>
    %29 = math.rsqrt %28 : vector<32x1xf32>
    %30 = vector.broadcast %29 : vector<32x1xf32> to vector<32x32xf32>
    %31 = arith.mulf %26, %30 : vector<32x32xf32>
    %32 = vector.broadcast %5 : vector<1x32xf32> to vector<32x32xf32>
    %33 = arith.mulf %31, %32 : vector<32x32xf32>
    %34 = vector.broadcast %6 : vector<1x32xf32> to vector<32x32xf32>
    %35 = arith.addf %33, %34 : vector<32x32xf32>
    %c0_9 = arith.constant 0 : index
    %c0_10 = arith.constant 0 : index
    %c0_11 = arith.constant 0 : index
    %36 = vector.load %arg6[%c0_9, %c0_10, %c0_11] : memref<1x32x96xf32, #tpu.memory_space<vmem>>, vector<1x32x96xf32>
    %37 = vector.shape_cast %36 : vector<1x32x96xf32> to vector<32x96xf32>
    %cst_12 = arith.constant dense<0.000000e+00> : vector<32x96xf32>
    %38 = tpu.matmul %35, %37, %cst_12 {dimension_numbers = #tpu.dot_dimension_numbers<[1], [0], [0], [1], [0, 0, 1, 1], [], []>} : vector<32x32xf32>, vector<32x96xf32>, vector<32x96xf32> -> vector<32x96xf32>
    %39 = vector.broadcast %9 : vector<1x96xf32> to vector<32x96xf32>
    %40 = arith.addf %38, %39 : vector<32x96xf32>
    %c0_13 = arith.constant 0 : index
    %41 = memref.load %arg1[%c0_13] : memref<2xi32, #tpu.memory_space<smem>>
    %42 = tpu.iota {dimensions = array<i32: 1>} : vector<16x16xi32>
    %43 = vector.broadcast %41 : i32 to vector<16x16xi32>
    %44 = arith.cmpi slt, %42, %43 : vector<16x16xi32>
    %cst_14 = arith.constant 0.000000e+00 : f32
    %cst_15 = arith.constant -1.000000e+09 : f32
    %45 = vector.broadcast %cst_14 : f32 to vector<16x16xf32>
    %46 = vector.broadcast %cst_15 : f32 to vector<16x16xf32>
    %47 = arith.select %44, %45, %46 : vector<16x16xi1>, vector<16x16xf32>
    %48 = vector.extract_strided_slice %40 {offsets = [0, 0], sizes = [16, 32], strides = [1, 1]} : vector<32x96xf32> to vector<16x32xf32>
    %49 = vector.extract_strided_slice %40 {offsets = [0, 32], sizes = [16, 32], strides = [1, 1]} : vector<32x96xf32> to vector<16x32xf32>
    %50 = vector.extract_strided_slice %40 {offsets = [0, 64], sizes = [16, 32], strides = [1, 1]} : vector<32x96xf32> to vector<16x32xf32>
    %51 = vector.extract_strided_slice %48 {offsets = [0, 0], sizes = [16, 8], strides = [1, 1]} : vector<16x32xf32> to vector<16x8xf32>
    %52 = vector.extract_strided_slice %49 {offsets = [0, 0], sizes = [16, 8], strides = [1, 1]} : vector<16x32xf32> to vector<16x8xf32>
    %cst_16 = arith.constant dense<0.000000e+00> : vector<16x16xf32>
    %53 = tpu.matmul %51, %52, %cst_16 {dimension_numbers = #tpu.dot_dimension_numbers<[1], [1], [0], [0], [0, 0, 1, 0], [], []>} : vector<16x8xf32>, vector<16x8xf32>, vector<16x16xf32> -> vector<16x16xf32>
    %cst_17 = arith.constant 0.353553385 : f32
    %54 = vector.broadcast %cst_17 : f32 to vector<16x16xf32>
    %55 = arith.mulf %53, %54 : vector<16x16xf32>
    %56 = arith.addf %55, %47 : vector<16x16xf32>
    %cst_18 = arith.constant dense<0xFF800000> : vector<16xf32>
    %57 = vector.multi_reduction <maximumf>, %56, %cst_18 [1] : vector<16x16xf32> to vector<16xf32>
    %58 = vector.shape_cast %57 : vector<16xf32> to vector<16x1xf32>
    %59 = vector.broadcast %58 : vector<16x1xf32> to vector<16x16xf32>
    %60 = arith.subf %56, %59 : vector<16x16xf32>
    %61 = math.exp %60 : vector<16x16xf32>
    %cst_19 = arith.constant dense<0.000000e+00> : vector<16xf32>
    %62 = vector.multi_reduction <add>, %61, %cst_19 [1] : vector<16x16xf32> to vector<16xf32>
    %63 = vector.shape_cast %62 : vector<16xf32> to vector<16x1xf32>
    %64 = tpu.reciprocal %63 {approx = true} : vector<16x1xf32> -> vector<16x1xf32>
    %65 = vector.broadcast %64 : vector<16x1xf32> to vector<16x16xf32>
    %66 = arith.mulf %61, %65 : vector<16x16xf32>
    %67 = vector.extract_strided_slice %50 {offsets = [0, 0], sizes = [16, 8], strides = [1, 1]} : vector<16x32xf32> to vector<16x8xf32>
    %cst_20 = arith.constant dense<0.000000e+00> : vector<16x8xf32>
    %68 = tpu.matmul %66, %67, %cst_20 {dimension_numbers = #tpu.dot_dimension_numbers<[1], [0], [0], [1], [0, 0, 1, 1], [], []>} : vector<16x16xf32>, vector<16x8xf32>, vector<16x8xf32> -> vector<16x8xf32>
    %c0_21 = arith.constant 0 : index
    %c0_22 = arith.constant 0 : index
    %69 = vector.load %arg13[%c0_21, %c0_22] : memref<16x32xf32, #tpu.memory_space<vmem>>, vector<16x8xf32>
    tpu.vector_store %arg13[%c0_21, %c0_22], %68 {strides = array<i32>} : memref<16x32xf32, #tpu.memory_space<vmem>>, vector<16x8xf32>,
    %70 = vector.extract_strided_slice %48 {offsets = [0, 8], sizes = [16, 8], strides = [1, 1]} : vector<16x32xf32> to vector<16x8xf32>
    %71 = vector.extract_strided_slice %49 {offsets = [0, 8], sizes = [16, 8], strides = [1, 1]} : vector<16x32xf32> to vector<16x8xf32>
    %cst_23 = arith.constant dense<0.000000e+00> : vector<16x16xf32>
    %72 = tpu.matmul %70, %71, %cst_23 {dimension_numbers = #tpu.dot_dimension_numbers<[1], [1], [0], [0], [0, 0, 1, 0], [], []>} : vector<16x8xf32>, vector<16x8xf32>, vector<16x16xf32> -> vector<16x16xf32>
    %cst_24 = arith.constant 0.353553385 : f32
    %73 = vector.broadcast %cst_24 : f32 to vector<16x16xf32>
    %74 = arith.mulf %72, %73 : vector<16x16xf32>
    %75 = arith.addf %74, %47 : vector<16x16xf32>
    %cst_25 = arith.constant dense<0xFF800000> : vector<16xf32>
    %76 = vector.multi_reduction <maximumf>, %75, %cst_25 [1] : vector<16x16xf32> to vector<16xf32>
    %77 = vector.shape_cast %76 : vector<16xf32> to vector<16x1xf32>
    %78 = vector.broadcast %77 : vector<16x1xf32> to vector<16x16xf32>
    %79 = arith.subf %75, %78 : vector<16x16xf32>
    %80 = math.exp %79 : vector<16x16xf32>
    %cst_26 = arith.constant dense<0.000000e+00> : vector<16xf32>
    %81 = vector.multi_reduction <add>, %80, %cst_26 [1] : vector<16x16xf32> to vector<16xf32>
    %82 = vector.shape_cast %81 : vector<16xf32> to vector<16x1xf32>
    %83 = tpu.reciprocal %82 {approx = true} : vector<16x1xf32> -> vector<16x1xf32>
    %84 = vector.broadcast %83 : vector<16x1xf32> to vector<16x16xf32>
    %85 = arith.mulf %80, %84 : vector<16x16xf32>
    %86 = vector.extract_strided_slice %50 {offsets = [0, 8], sizes = [16, 8], strides = [1, 1]} : vector<16x32xf32> to vector<16x8xf32>
    %cst_27 = arith.constant dense<0.000000e+00> : vector<16x8xf32>
    %87 = tpu.matmul %85, %86, %cst_27 {dimension_numbers = #tpu.dot_dimension_numbers<[1], [0], [0], [1], [0, 0, 1, 1], [], []>} : vector<16x16xf32>, vector<16x8xf32>, vector<16x8xf32> -> vector<16x8xf32>
    %c0_28 = arith.constant 0 : index
    %c8 = arith.constant 8 : index
    %88 = vector.load %arg13[%c0_28, %c8] : memref<16x32xf32, #tpu.memory_space<vmem>>, vector<16x8xf32>
    tpu.vector_store %arg13[%c0_28, %c8], %87 {strides = array<i32>} : memref<16x32xf32, #tpu.memory_space<vmem>>, vector<16x8xf32>,
    %89 = vector.extract_strided_slice %48 {offsets = [0, 16], sizes = [16, 8], strides = [1, 1]} : vector<16x32xf32> to vector<16x8xf32>
    %90 = vector.extract_strided_slice %49 {offsets = [0, 16], sizes = [16, 8], strides = [1, 1]} : vector<16x32xf32> to vector<16x8xf32>
    %cst_29 = arith.constant dense<0.000000e+00> : vector<16x16xf32>
    %91 = tpu.matmul %89, %90, %cst_29 {dimension_numbers = #tpu.dot_dimension_numbers<[1], [1], [0], [0], [0, 0, 1, 0], [], []>} : vector<16x8xf32>, vector<16x8xf32>, vector<16x16xf32> -> vector<16x16xf32>
    %cst_30 = arith.constant 0.353553385 : f32
    %92 = vector.broadcast %cst_30 : f32 to vector<16x16xf32>
    %93 = arith.mulf %91, %92 : vector<16x16xf32>
    %94 = arith.addf %93, %47 : vector<16x16xf32>
    %cst_31 = arith.constant dense<0xFF800000> : vector<16xf32>
    %95 = vector.multi_reduction <maximumf>, %94, %cst_31 [1] : vector<16x16xf32> to vector<16xf32>
    %96 = vector.shape_cast %95 : vector<16xf32> to vector<16x1xf32>
    %97 = vector.broadcast %96 : vector<16x1xf32> to vector<16x16xf32>
    %98 = arith.subf %94, %97 : vector<16x16xf32>
    %99 = math.exp %98 : vector<16x16xf32>
    %cst_32 = arith.constant dense<0.000000e+00> : vector<16xf32>
    %100 = vector.multi_reduction <add>, %99, %cst_32 [1] : vector<16x16xf32> to vector<16xf32>
    %101 = vector.shape_cast %100 : vector<16xf32> to vector<16x1xf32>
    %102 = tpu.reciprocal %101 {approx = true} : vector<16x1xf32> -> vector<16x1xf32>
    %103 = vector.broadcast %102 : vector<16x1xf32> to vector<16x16xf32>
    %104 = arith.mulf %99, %103 : vector<16x16xf32>
    %105 = vector.extract_strided_slice %50 {offsets = [0, 16], sizes = [16, 8], strides = [1, 1]} : vector<16x32xf32> to vector<16x8xf32>
    %cst_33 = arith.constant dense<0.000000e+00> : vector<16x8xf32>
    %106 = tpu.matmul %104, %105, %cst_33 {dimension_numbers = #tpu.dot_dimension_numbers<[1], [0], [0], [1], [0, 0, 1, 1], [], []>} : vector<16x16xf32>, vector<16x8xf32>, vector<16x8xf32> -> vector<16x8xf32>
    %c0_34 = arith.constant 0 : index
    %c16 = arith.constant 16 : index
    %107 = vector.load %arg13[%c0_34, %c16] : memref<16x32xf32, #tpu.memory_space<vmem>>, vector<16x8xf32>
    tpu.vector_store %arg13[%c0_34, %c16], %106 {strides = array<i32>} : memref<16x32xf32, #tpu.memory_space<vmem>>, vector<16x8xf32>,
    %108 = vector.extract_strided_slice %48 {offsets = [0, 24], sizes = [16, 8], strides = [1, 1]} : vector<16x32xf32> to vector<16x8xf32>
    %109 = vector.extract_strided_slice %49 {offsets = [0, 24], sizes = [16, 8], strides = [1, 1]} : vector<16x32xf32> to vector<16x8xf32>
    %cst_35 = arith.constant dense<0.000000e+00> : vector<16x16xf32>
    %110 = tpu.matmul %108, %109, %cst_35 {dimension_numbers = #tpu.dot_dimension_numbers<[1], [1], [0], [0], [0, 0, 1, 0], [], []>} : vector<16x8xf32>, vector<16x8xf32>, vector<16x16xf32> -> vector<16x16xf32>
    %cst_36 = arith.constant 0.353553385 : f32
    %111 = vector.broadcast %cst_36 : f32 to vector<16x16xf32>
    %112 = arith.mulf %110, %111 : vector<16x16xf32>
    %113 = arith.addf %112, %47 : vector<16x16xf32>
    %cst_37 = arith.constant dense<0xFF800000> : vector<16xf32>
    %114 = vector.multi_reduction <maximumf>, %113, %cst_37 [1] : vector<16x16xf32> to vector<16xf32>
    %115 = vector.shape_cast %114 : vector<16xf32> to vector<16x1xf32>
    %116 = vector.broadcast %115 : vector<16x1xf32> to vector<16x16xf32>
    %117 = arith.subf %113, %116 : vector<16x16xf32>
    %118 = math.exp %117 : vector<16x16xf32>
    %cst_38 = arith.constant dense<0.000000e+00> : vector<16xf32>
    %119 = vector.multi_reduction <add>, %118, %cst_38 [1] : vector<16x16xf32> to vector<16xf32>
    %120 = vector.shape_cast %119 : vector<16xf32> to vector<16x1xf32>
    %121 = tpu.reciprocal %120 {approx = true} : vector<16x1xf32> -> vector<16x1xf32>
    %122 = vector.broadcast %121 : vector<16x1xf32> to vector<16x16xf32>
    %123 = arith.mulf %118, %122 : vector<16x16xf32>
    %124 = vector.extract_strided_slice %50 {offsets = [0, 24], sizes = [16, 8], strides = [1, 1]} : vector<16x32xf32> to vector<16x8xf32>
    %cst_39 = arith.constant dense<0.000000e+00> : vector<16x8xf32>
    %125 = tpu.matmul %123, %124, %cst_39 {dimension_numbers = #tpu.dot_dimension_numbers<[1], [0], [0], [1], [0, 0, 1, 1], [], []>} : vector<16x16xf32>, vector<16x8xf32>, vector<16x8xf32> -> vector<16x8xf32>
    %c0_40 = arith.constant 0 : index
    %c24 = arith.constant 24 : index
    %126 = vector.load %arg13[%c0_40, %c24] : memref<16x32xf32, #tpu.memory_space<vmem>>, vector<16x8xf32>
    tpu.vector_store %arg13[%c0_40, %c24], %125 {strides = array<i32>} : memref<16x32xf32, #tpu.memory_space<vmem>>, vector<16x8xf32>,
    %c0_41 = arith.constant 0 : index
    %c0_42 = arith.constant 0 : index
    %127 = vector.load %arg13[%c0_41, %c0_42] : memref<16x32xf32, #tpu.memory_space<vmem>>, vector<16x32xf32>
    %c0_43 = arith.constant 0 : index
    %c0_44 = arith.constant 0 : index
    %c0_45 = arith.constant 0 : index
    %128 = vector.load %arg7[%c0_43, %c0_44, %c0_45] : memref<1x32x32xf32, #tpu.memory_space<vmem>>, vector<1x32x32xf32>
    %129 = vector.shape_cast %128 : vector<1x32x32xf32> to vector<32x32xf32>
    %cst_46 = arith.constant dense<0.000000e+00> : vector<16x32xf32>
    %130 = tpu.matmul %127, %129, %cst_46 {dimension_numbers = #tpu.dot_dimension_numbers<[1], [0], [0], [1], [0, 0, 1, 1], [], []>} : vector<16x32xf32>, vector<32x32xf32>, vector<16x32xf32> -> vector<16x32xf32>
    %131 = vector.extract_strided_slice %13 {offsets = [0, 0], sizes = [16, 32], strides = [1, 1]} : vector<32x32xf32> to vector<16x32xf32>
    %132 = arith.addf %131, %130 : vector<16x32xf32>
    %133 = vector.broadcast %10 : vector<1x32xf32> to vector<16x32xf32>
    %134 = arith.addf %132, %133 : vector<16x32xf32>
    %c0_47 = arith.constant 0 : index
    %c0_48 = arith.constant 0 : index
    %135 = vector.load %arg12[%c0_47, %c0_48] : memref<32x32xf32, #tpu.memory_space<vmem>>, vector<16x32xf32>
    tpu.vector_store %arg12[%c0_47, %c0_48], %134 {strides = array<i32>} : memref<32x32xf32, #tpu.memory_space<vmem>>, vector<16x32xf32>,
    %c1 = arith.constant 1 : index
    %136 = memref.load %arg1[%c1] : memref<2xi32, #tpu.memory_space<smem>>
    %137 = tpu.iota {dimensions = array<i32: 1>} : vector<16x16xi32>
    %138 = vector.broadcast %136 : i32 to vector<16x16xi32>
    %139 = arith.cmpi slt, %137, %138 : vector<16x16xi32>
    %cst_49 = arith.constant 0.000000e+00 : f32
    %cst_50 = arith.constant -1.000000e+09 : f32
    %140 = vector.broadcast %cst_49 : f32 to vector<16x16xf32>
    %141 = vector.broadcast %cst_50 : f32 to vector<16x16xf32>
    %142 = arith.select %139, %140, %141 : vector<16x16xi1>, vector<16x16xf32>
    %143 = vector.extract_strided_slice %40 {offsets = [16, 0], sizes = [16, 32], strides = [1, 1]} : vector<32x96xf32> to vector<16x32xf32>
    %144 = vector.extract_strided_slice %40 {offsets = [16, 32], sizes = [16, 32], strides = [1, 1]} : vector<32x96xf32> to vector<16x32xf32>
    %145 = vector.extract_strided_slice %40 {offsets = [16, 64], sizes = [16, 32], strides = [1, 1]} : vector<32x96xf32> to vector<16x32xf32>
    %146 = vector.extract_strided_slice %143 {offsets = [0, 0], sizes = [16, 8], strides = [1, 1]} : vector<16x32xf32> to vector<16x8xf32>
    %147 = vector.extract_strided_slice %144 {offsets = [0, 0], sizes = [16, 8], strides = [1, 1]} : vector<16x32xf32> to vector<16x8xf32>
    %cst_51 = arith.constant dense<0.000000e+00> : vector<16x16xf32>
    %148 = tpu.matmul %146, %147, %cst_51 {dimension_numbers = #tpu.dot_dimension_numbers<[1], [1], [0], [0], [0, 0, 1, 0], [], []>} : vector<16x8xf32>, vector<16x8xf32>, vector<16x16xf32> -> vector<16x16xf32>
    %cst_52 = arith.constant 0.353553385 : f32
    %149 = vector.broadcast %cst_52 : f32 to vector<16x16xf32>
    %150 = arith.mulf %148, %149 : vector<16x16xf32>
    %151 = arith.addf %150, %142 : vector<16x16xf32>
    %cst_53 = arith.constant dense<0xFF800000> : vector<16xf32>
    %152 = vector.multi_reduction <maximumf>, %151, %cst_53 [1] : vector<16x16xf32> to vector<16xf32>
    %153 = vector.shape_cast %152 : vector<16xf32> to vector<16x1xf32>
    %154 = vector.broadcast %153 : vector<16x1xf32> to vector<16x16xf32>
    %155 = arith.subf %151, %154 : vector<16x16xf32>
    %156 = math.exp %155 : vector<16x16xf32>
    %cst_54 = arith.constant dense<0.000000e+00> : vector<16xf32>
    %157 = vector.multi_reduction <add>, %156, %cst_54 [1] : vector<16x16xf32> to vector<16xf32>
    %158 = vector.shape_cast %157 : vector<16xf32> to vector<16x1xf32>
    %159 = tpu.reciprocal %158 {approx = true} : vector<16x1xf32> -> vector<16x1xf32>
    %160 = vector.broadcast %159 : vector<16x1xf32> to vector<16x16xf32>
    %161 = arith.mulf %156, %160 : vector<16x16xf32>
    %162 = vector.extract_strided_slice %145 {offsets = [0, 0], sizes = [16, 8], strides = [1, 1]} : vector<16x32xf32> to vector<16x8xf32>
    %cst_55 = arith.constant dense<0.000000e+00> : vector<16x8xf32>
    %163 = tpu.matmul %161, %162, %cst_55 {dimension_numbers = #tpu.dot_dimension_numbers<[1], [0], [0], [1], [0, 0, 1, 1], [], []>} : vector<16x16xf32>, vector<16x8xf32>, vector<16x8xf32> -> vector<16x8xf32>
    %c0_56 = arith.constant 0 : index
    %c0_57 = arith.constant 0 : index
    %164 = vector.load %arg13[%c0_56, %c0_57] : memref<16x32xf32, #tpu.memory_space<vmem>>, vector<16x8xf32>
    tpu.vector_store %arg13[%c0_56, %c0_57], %163 {strides = array<i32>} : memref<16x32xf32, #tpu.memory_space<vmem>>, vector<16x8xf32>,
    %165 = vector.extract_strided_slice %143 {offsets = [0, 8], sizes = [16, 8], strides = [1, 1]} : vector<16x32xf32> to vector<16x8xf32>
    %166 = vector.extract_strided_slice %144 {offsets = [0, 8], sizes = [16, 8], strides = [1, 1]} : vector<16x32xf32> to vector<16x8xf32>
    %cst_58 = arith.constant dense<0.000000e+00> : vector<16x16xf32>
    %167 = tpu.matmul %165, %166, %cst_58 {dimension_numbers = #tpu.dot_dimension_numbers<[1], [1], [0], [0], [0, 0, 1, 0], [], []>} : vector<16x8xf32>, vector<16x8xf32>, vector<16x16xf32> -> vector<16x16xf32>
    %cst_59 = arith.constant 0.353553385 : f32
    %168 = vector.broadcast %cst_59 : f32 to vector<16x16xf32>
    %169 = arith.mulf %167, %168 : vector<16x16xf32>
    %170 = arith.addf %169, %142 : vector<16x16xf32>
    %cst_60 = arith.constant dense<0xFF800000> : vector<16xf32>
    %171 = vector.multi_reduction <maximumf>, %170, %cst_60 [1] : vector<16x16xf32> to vector<16xf32>
    %172 = vector.shape_cast %171 : vector<16xf32> to vector<16x1xf32>
    %173 = vector.broadcast %172 : vector<16x1xf32> to vector<16x16xf32>
    %174 = arith.subf %170, %173 : vector<16x16xf32>
    %175 = math.exp %174 : vector<16x16xf32>
    %cst_61 = arith.constant dense<0.000000e+00> : vector<16xf32>
    %176 = vector.multi_reduction <add>, %175, %cst_61 [1] : vector<16x16xf32> to vector<16xf32>
    %177 = vector.shape_cast %176 : vector<16xf32> to vector<16x1xf32>
    %178 = tpu.reciprocal %177 {approx = true} : vector<16x1xf32> -> vector<16x1xf32>
    %179 = vector.broadcast %178 : vector<16x1xf32> to vector<16x16xf32>
    %180 = arith.mulf %175, %179 : vector<16x16xf32>
    %181 = vector.extract_strided_slice %145 {offsets = [0, 8], sizes = [16, 8], strides = [1, 1]} : vector<16x32xf32> to vector<16x8xf32>
    %cst_62 = arith.constant dense<0.000000e+00> : vector<16x8xf32>
    %182 = tpu.matmul %180, %181, %cst_62 {dimension_numbers = #tpu.dot_dimension_numbers<[1], [0], [0], [1], [0, 0, 1, 1], [], []>} : vector<16x16xf32>, vector<16x8xf32>, vector<16x8xf32> -> vector<16x8xf32>
    %c0_63 = arith.constant 0 : index
    %c8_64 = arith.constant 8 : index
    %183 = vector.load %arg13[%c0_63, %c8_64] : memref<16x32xf32, #tpu.memory_space<vmem>>, vector<16x8xf32>
    tpu.vector_store %arg13[%c0_63, %c8_64], %182 {strides = array<i32>} : memref<16x32xf32, #tpu.memory_space<vmem>>, vector<16x8xf32>,
    %184 = vector.extract_strided_slice %143 {offsets = [0, 16], sizes = [16, 8], strides = [1, 1]} : vector<16x32xf32> to vector<16x8xf32>
    %185 = vector.extract_strided_slice %144 {offsets = [0, 16], sizes = [16, 8], strides = [1, 1]} : vector<16x32xf32> to vector<16x8xf32>
    %cst_65 = arith.constant dense<0.000000e+00> : vector<16x16xf32>
    %186 = tpu.matmul %184, %185, %cst_65 {dimension_numbers = #tpu.dot_dimension_numbers<[1], [1], [0], [0], [0, 0, 1, 0], [], []>} : vector<16x8xf32>, vector<16x8xf32>, vector<16x16xf32> -> vector<16x16xf32>
    %cst_66 = arith.constant 0.353553385 : f32
    %187 = vector.broadcast %cst_66 : f32 to vector<16x16xf32>
    %188 = arith.mulf %186, %187 : vector<16x16xf32>
    %189 = arith.addf %188, %142 : vector<16x16xf32>
    %cst_67 = arith.constant dense<0xFF800000> : vector<16xf32>
    %190 = vector.multi_reduction <maximumf>, %189, %cst_67 [1] : vector<16x16xf32> to vector<16xf32>
    %191 = vector.shape_cast %190 : vector<16xf32> to vector<16x1xf32>
    %192 = vector.broadcast %191 : vector<16x1xf32> to vector<16x16xf32>
    %193 = arith.subf %189, %192 : vector<16x16xf32>
    %194 = math.exp %193 : vector<16x16xf32>
    %cst_68 = arith.constant dense<0.000000e+00> : vector<16xf32>
    %195 = vector.multi_reduction <add>, %194, %cst_68 [1] : vector<16x16xf32> to vector<16xf32>
    %196 = vector.shape_cast %195 : vector<16xf32> to vector<16x1xf32>
    %197 = tpu.reciprocal %196 {approx = true} : vector<16x1xf32> -> vector<16x1xf32>
    %198 = vector.broadcast %197 : vector<16x1xf32> to vector<16x16xf32>
    %199 = arith.mulf %194, %198 : vector<16x16xf32>
    %200 = vector.extract_strided_slice %145 {offsets = [0, 16], sizes = [16, 8], strides = [1, 1]} : vector<16x32xf32> to vector<16x8xf32>
    %cst_69 = arith.constant dense<0.000000e+00> : vector<16x8xf32>
    %201 = tpu.matmul %199, %200, %cst_69 {dimension_numbers = #tpu.dot_dimension_numbers<[1], [0], [0], [1], [0, 0, 1, 1], [], []>} : vector<16x16xf32>, vector<16x8xf32>, vector<16x8xf32> -> vector<16x8xf32>
    %c0_70 = arith.constant 0 : index
    %c16_71 = arith.constant 16 : index
    %202 = vector.load %arg13[%c0_70, %c16_71] : memref<16x32xf32, #tpu.memory_space<vmem>>, vector<16x8xf32>
    tpu.vector_store %arg13[%c0_70, %c16_71], %201 {strides = array<i32>} : memref<16x32xf32, #tpu.memory_space<vmem>>, vector<16x8xf32>,
    %203 = vector.extract_strided_slice %143 {offsets = [0, 24], sizes = [16, 8], strides = [1, 1]} : vector<16x32xf32> to vector<16x8xf32>
    %204 = vector.extract_strided_slice %144 {offsets = [0, 24], sizes = [16, 8], strides = [1, 1]} : vector<16x32xf32> to vector<16x8xf32>
    %cst_72 = arith.constant dense<0.000000e+00> : vector<16x16xf32>
    %205 = tpu.matmul %203, %204, %cst_72 {dimension_numbers = #tpu.dot_dimension_numbers<[1], [1], [0], [0], [0, 0, 1, 0], [], []>} : vector<16x8xf32>, vector<16x8xf32>, vector<16x16xf32> -> vector<16x16xf32>
    %cst_73 = arith.constant 0.353553385 : f32
    %206 = vector.broadcast %cst_73 : f32 to vector<16x16xf32>
    %207 = arith.mulf %205, %206 : vector<16x16xf32>
    %208 = arith.addf %207, %142 : vector<16x16xf32>
    %cst_74 = arith.constant dense<0xFF800000> : vector<16xf32>
    %209 = vector.multi_reduction <maximumf>, %208, %cst_74 [1] : vector<16x16xf32> to vector<16xf32>
    %210 = vector.shape_cast %209 : vector<16xf32> to vector<16x1xf32>
    %211 = vector.broadcast %210 : vector<16x1xf32> to vector<16x16xf32>
    %212 = arith.subf %208, %211 : vector<16x16xf32>
    %213 = math.exp %212 : vector<16x16xf32>
    %cst_75 = arith.constant dense<0.000000e+00> : vector<16xf32>
    %214 = vector.multi_reduction <add>, %213, %cst_75 [1] : vector<16x16xf32> to vector<16xf32>
    %215 = vector.shape_cast %214 : vector<16xf32> to vector<16x1xf32>
    %216 = tpu.reciprocal %215 {approx = true} : vector<16x1xf32> -> vector<16x1xf32>
    %217 = vector.broadcast %216 : vector<16x1xf32> to vector<16x16xf32>
    %218 = arith.mulf %213, %217 : vector<16x16xf32>
    %219 = vector.extract_strided_slice %145 {offsets = [0, 24], sizes = [16, 8], strides = [1, 1]} : vector<16x32xf32> to vector<16x8xf32>
    %cst_76 = arith.constant dense<0.000000e+00> : vector<16x8xf32>
    %220 = tpu.matmul %218, %219, %cst_76 {dimension_numbers = #tpu.dot_dimension_numbers<[1], [0], [0], [1], [0, 0, 1, 1], [], []>} : vector<16x16xf32>, vector<16x8xf32>, vector<16x8xf32> -> vector<16x8xf32>
    %c0_77 = arith.constant 0 : index
    %c24_78 = arith.constant 24 : index
    %221 = vector.load %arg13[%c0_77, %c24_78] : memref<16x32xf32, #tpu.memory_space<vmem>>, vector<16x8xf32>
    tpu.vector_store %arg13[%c0_77, %c24_78], %220 {strides = array<i32>} : memref<16x32xf32, #tpu.memory_space<vmem>>, vector<16x8xf32>,
    %c0_79 = arith.constant 0 : index
    %c0_80 = arith.constant 0 : index
    %222 = vector.load %arg13[%c0_79, %c0_80] : memref<16x32xf32, #tpu.memory_space<vmem>>, vector<16x32xf32>
    %c0_81 = arith.constant 0 : index
    %c0_82 = arith.constant 0 : index
    %c0_83 = arith.constant 0 : index
    %223 = vector.load %arg7[%c0_81, %c0_82, %c0_83] : memref<1x32x32xf32, #tpu.memory_space<vmem>>, vector<1x32x32xf32>
    %224 = vector.shape_cast %223 : vector<1x32x32xf32> to vector<32x32xf32>
    %cst_84 = arith.constant dense<0.000000e+00> : vector<16x32xf32>
    %225 = tpu.matmul %222, %224, %cst_84 {dimension_numbers = #tpu.dot_dimension_numbers<[1], [0], [0], [1], [0, 0, 1, 1], [], []>} : vector<16x32xf32>, vector<32x32xf32>, vector<16x32xf32> -> vector<16x32xf32>
    %226 = vector.extract_strided_slice %13 {offsets = [16, 0], sizes = [16, 32], strides = [1, 1]} : vector<32x32xf32> to vector<16x32xf32>
    %227 = arith.addf %226, %225 : vector<16x32xf32>
    %228 = vector.broadcast %10 : vector<1x32xf32> to vector<16x32xf32>
    %229 = arith.addf %227, %228 : vector<16x32xf32>
    %c16_85 = arith.constant 16 : index
    %c0_86 = arith.constant 0 : index
    %230 = vector.load %arg12[%c16_85, %c0_86] : memref<32x32xf32, #tpu.memory_space<vmem>>, vector<16x32xf32>
    tpu.vector_store %arg12[%c16_85, %c0_86], %229 {strides = array<i32>} : memref<32x32xf32, #tpu.memory_space<vmem>>, vector<16x32xf32>,
    %c0_87 = arith.constant 0 : index
    %c0_88 = arith.constant 0 : index
    %231 = vector.load %arg12[%c0_87, %c0_88] : memref<32x32xf32, #tpu.memory_space<vmem>>, vector<32x32xf32>
    %cst_89 = arith.constant dense<0.000000e+00> : vector<32xf32>
    %232 = vector.multi_reduction <add>, %231, %cst_89 [1] : vector<32x32xf32> to vector<32xf32>
    %233 = vector.shape_cast %232 : vector<32xf32> to vector<32x1xf32>
    %cst_90 = arith.constant 3.200000e+01 : f32
    %234 = vector.broadcast %cst_90 : f32 to vector<32x1xf32>
    %235 = arith.divf %233, %234 : vector<32x1xf32>
    %236 = vector.broadcast %235 : vector<32x1xf32> to vector<32x32xf32>
    %237 = arith.subf %231, %236 : vector<32x32xf32>
    %238 = arith.mulf %237, %237 : vector<32x32xf32>
    %cst_91 = arith.constant dense<0.000000e+00> : vector<32xf32>
    %239 = vector.multi_reduction <add>, %238, %cst_91 [1] : vector<32x32xf32> to vector<32xf32>
    %240 = vector.shape_cast %239 : vector<32xf32> to vector<32x1xf32>
    %cst_92 = arith.constant 3.200000e+01 : f32
    %241 = vector.broadcast %cst_92 : f32 to vector<32x1xf32>
    %242 = arith.divf %240, %241 : vector<32x1xf32>
    %243 = vector.broadcast %235 : vector<32x1xf32> to vector<32x32xf32>
    %244 = arith.subf %231, %243 : vector<32x32xf32>
    %cst_93 = arith.constant 9.99999996E-13 : f32
    %245 = vector.broadcast %cst_93 : f32 to vector<32x1xf32>
    %246 = arith.addf %242, %245 : vector<32x1xf32>
    %247 = math.rsqrt %246 : vector<32x1xf32>
    %248 = vector.broadcast %247 : vector<32x1xf32> to vector<32x32xf32>
    %249 = arith.mulf %244, %248 : vector<32x32xf32>
    %250 = vector.broadcast %7 : vector<1x32xf32> to vector<32x32xf32>
    %251 = arith.mulf %249, %250 : vector<32x32xf32>
    %252 = vector.broadcast %8 : vector<1x32xf32> to vector<32x32xf32>
    %253 = arith.addf %251, %252 : vector<32x32xf32>
    %c0_94 = arith.constant 0 : index
    %c0_95 = arith.constant 0 : index
    %c0_96 = arith.constant 0 : index
    %254 = vector.load %arg8[%c0_94, %c0_95, %c0_96] : memref<1x32x64xf32, #tpu.memory_space<vmem>>, vector<1x32x64xf32>
    %255 = vector.shape_cast %254 : vector<1x32x64xf32> to vector<32x64xf32>
    %c0_97 = arith.constant 0 : index
    %c0_98 = arith.constant 0 : index
    %c0_99 = arith.constant 0 : index
    %256 = vector.load %arg9[%c0_97, %c0_98, %c0_99] : memref<1x64x32xf32, #tpu.memory_space<vmem>>, vector<1x64x32xf32>
    %257 = vector.shape_cast %256 : vector<1x64x32xf32> to vector<64x32xf32>
    %cst_100 = arith.constant dense<0.000000e+00> : vector<32x64xf32>
    %258 = tpu.matmul %253, %255, %cst_100 {dimension_numbers = #tpu.dot_dimension_numbers<[1], [0], [0], [1], [0, 0, 1, 1], [], []>} : vector<32x32xf32>, vector<32x64xf32>, vector<32x64xf32> -> vector<32x64xf32>
    %259 = vector.broadcast %11 : vector<1x64xf32> to vector<32x64xf32>
    %260 = arith.addf %258, %259 : vector<32x64xf32>
    %cst_101 = arith.constant 0.000000e+00 : f32
    %261 = vector.broadcast %cst_101 : f32 to vector<32x64xf32>
    %262 = arith.maximumf %260, %261 : vector<32x64xf32>
    %cst_102 = arith.constant dense<0.000000e+00> : vector<32x32xf32>
    %263 = tpu.matmul %262, %257, %cst_102 {dimension_numbers = #tpu.dot_dimension_numbers<[1], [0], [0], [1], [0, 0, 1, 1], [], []>} : vector<32x64xf32>, vector<64x32xf32>, vector<32x32xf32> -> vector<32x32xf32>
    %264 = vector.broadcast %12 : vector<1x32xf32> to vector<32x32xf32>
    %265 = arith.addf %263, %264 : vector<32x32xf32>
    %266 = arith.addf %231, %265 : vector<32x32xf32>
    %c0_103 = arith.constant 0 : index
    %c0_104 = arith.constant 0 : index
    %267 = vector.load %arg12[%c0_103, %c0_104] : memref<32x32xf32, #tpu.memory_space<vmem>>, vector<32x32xf32>
    tpu.vector_store %arg12[%c0_103, %c0_104], %266 {strides = array<i32>} : memref<32x32xf32, #tpu.memory_space<vmem>>, vector<32x32xf32>,
    %c1_i32 = arith.constant 1 : i32
    %268 = arith.cmpi eq, %arg0, %c1_i32 : i32
    %269 = arith.extui %268 : i1 to i32
    %c0_i32_105 = arith.constant 0 : i32
    %270 = arith.cmpi ne, %269, %c0_i32_105 : i32
    scf.if %270 {
      %c0_106 = arith.constant 0 : index
      %c0_107 = arith.constant 0 : index
      %271 = vector.load %arg12[%c0_106, %c0_107] : memref<32x32xf32, #tpu.memory_space<vmem>>, vector<32x32xf32>
      %c3 = arith.constant 3 : index
      %c0_108 = arith.constant 0 : index
      %272 = vector.load %arg5[%c3, %c0_108] : memref<5x32xf32, #tpu.memory_space<vmem>>, vector<1x32xf32>
      %c4 = arith.constant 4 : index
      %c0_109 = arith.constant 0 : index
      %273 = vector.load %arg5[%c4, %c0_109] : memref<5x32xf32, #tpu.memory_space<vmem>>, vector<1x32xf32>
      %cst_110 = arith.constant dense<0.000000e+00> : vector<32xf32>
      %274 = vector.multi_reduction <add>, %271, %cst_110 [1] : vector<32x32xf32> to vector<32xf32>
      %275 = vector.shape_cast %274 : vector<32xf32> to vector<32x1xf32>
      %cst_111 = arith.constant 3.200000e+01 : f32
      %276 = vector.broadcast %cst_111 : f32 to vector<32x1xf32>
      %277 = arith.divf %275, %276 : vector<32x1xf32>
      %278 = vector.broadcast %277 : vector<32x1xf32> to vector<32x32xf32>
      %279 = arith.subf %271, %278 : vector<32x32xf32>
      %280 = arith.mulf %279, %279 : vector<32x32xf32>
      %cst_112 = arith.constant dense<0.000000e+00> : vector<32xf32>
      %281 = vector.multi_reduction <add>, %280, %cst_112 [1] : vector<32x32xf32> to vector<32xf32>
      %282 = vector.shape_cast %281 : vector<32xf32> to vector<32x1xf32>
      %cst_113 = arith.constant 3.200000e+01 : f32
      %283 = vector.broadcast %cst_113 : f32 to vector<32x1xf32>
      %284 = arith.divf %282, %283 : vector<32x1xf32>
      %285 = vector.broadcast %277 : vector<32x1xf32> to vector<32x32xf32>
      %286 = arith.subf %271, %285 : vector<32x32xf32>
      %cst_114 = arith.constant 9.99999996E-13 : f32
      %287 = vector.broadcast %cst_114 : f32 to vector<32x1xf32>
      %288 = arith.addf %284, %287 : vector<32x1xf32>
      %289 = math.rsqrt %288 : vector<32x1xf32>
      %290 = vector.broadcast %289 : vector<32x1xf32> to vector<32x32xf32>
      %291 = arith.mulf %286, %290 : vector<32x32xf32>
      %292 = vector.broadcast %272 : vector<1x32xf32> to vector<32x32xf32>
      %293 = arith.mulf %291, %292 : vector<32x32xf32>
      %294 = vector.broadcast %273 : vector<1x32xf32> to vector<32x32xf32>
      %295 = arith.addf %293, %294 : vector<32x32xf32>
      %c0_115 = arith.constant 0 : index
      %c0_116 = arith.constant 0 : index
      %296 = vector.load %arg11[%c0_115, %c0_116] : memref<32x32xf32, #tpu.memory_space<vmem>>, vector<32x32xf32>
      tpu.vector_store %arg11[%c0_115, %c0_116], %295 {strides = array<i32>} : memref<32x32xf32, #tpu.memory_space<vmem>>, vector<32x32xf32>,
    } else {
    }
    return
  }
  func.func @transform_0(%arg0: i32, %arg1: memref<2xi32, #tpu.memory_space<smem>>) -> (i32, i32) {
    %c0_i32 = arith.constant 0 : i32
    %c0_i32_0 = arith.constant 0 : i32
    %c0_i32_1 = arith.constant 0 : i32
    return %c0_i32, %c0_i32_0 : i32, i32
  }
  func.func @transform_1(%arg0: i32, %arg1: memref<2xi32, #tpu.memory_space<smem>>) -> (i32, i32) {
    %c0_i32 = arith.constant 0 : i32
    %c0_i32_0 = arith.constant 0 : i32
    %c0_i32_1 = arith.constant 0 : i32
    return %c0_i32, %c0_i32_0 : i32, i32
  }
  func.func @transform_2(%arg0: i32, %arg1: memref<2xi32, #tpu.memory_space<smem>>) -> (i32, i32) {
    %c0_i32 = arith.constant 0 : i32
    %c0_i32_0 = arith.constant 0 : i32
    %c0_i32_1 = arith.constant 0 : i32
    return %c0_i32, %c0_i32_0 : i32, i32
  }
  func.func @transform_3(%arg0: i32, %arg1: memref<2xi32, #tpu.memory_space<smem>>) -> (i32, i32) {
    %c0_i32 = arith.constant 0 : i32
    %c0_i32_0 = arith.constant 0 : i32
    %c0_i32_1 = arith.constant 0 : i32
    return %c0_i32, %c0_i32_0 : i32, i32
  }
  func.func @transform_4(%arg0: i32, %arg1: memref<2xi32, #tpu.memory_space<smem>>) -> (i32, i32, i32) {
    %c0_i32 = arith.constant 0 : i32
    %c0_i32_0 = arith.constant 0 : i32
    %c0_i32_1 = arith.constant 0 : i32
    return %arg0, %c0_i32, %c0_i32_0 : i32, i32, i32
  }
  func.func @transform_5(%arg0: i32, %arg1: memref<2xi32, #tpu.memory_space<smem>>) -> (i32, i32, i32) {
    %c0_i32 = arith.constant 0 : i32
    %c0_i32_0 = arith.constant 0 : i32
    %c0_i32_1 = arith.constant 0 : i32
    return %arg0, %c0_i32, %c0_i32_0 : i32, i32, i32
  }
  func.func @transform_6(%arg0: i32, %arg1: memref<2xi32, #tpu.memory_space<smem>>) -> (i32, i32, i32) {
    %c0_i32 = arith.constant 0 : i32
    %c0_i32_0 = arith.constant 0 : i32
    %c0_i32_1 = arith.constant 0 : i32
    return %arg0, %c0_i32, %c0_i32_0 : i32, i32, i32
  }
  func.func @transform_7(%arg0: i32, %arg1: memref<2xi32, #tpu.memory_space<smem>>) -> (i32, i32, i32) {
    %c0_i32 = arith.constant 0 : i32
    %c0_i32_0 = arith.constant 0 : i32
    %c0_i32_1 = arith.constant 0 : i32
    return %arg0, %c0_i32, %c0_i32_0 : i32, i32, i32
  }
  func.func @transform_8(%arg0: i32, %arg1: memref<2xi32, #tpu.memory_space<smem>>) -> (i32, i32, i32) {
    %c0_i32 = arith.constant 0 : i32
    %c0_i32_0 = arith.constant 0 : i32
    %c0_i32_1 = arith.constant 0 : i32
    return %arg0, %c0_i32, %c0_i32_0 : i32, i32, i32
  }
  func.func @transform_9(%arg0: i32, %arg1: memref<2xi32, #tpu.memory_space<smem>>) -> (i32, i32) {
    %c0_i32 = arith.constant 0 : i32
    %c0_i32_0 = arith.constant 0 : i32
    %c0_i32_1 = arith.constant 0 : i32
    return %c0_i32, %c0_i32_0 : i32, i32
  }
}

module attributes {stable_mosaic.version = 11 : i64} {
  func.func @_decoder_kernel(%arg0: i32, %arg1: memref<2xi32, #tpu.memory_space<smem>>, %arg2: memref<2xi32, #tpu.memory_space<smem>>, %arg3: memref<16x32xf32, #tpu.memory_space<vmem>>, %arg4: memref<32x32xf32, #tpu.memory_space<vmem>>, %arg5: memref<16x1xi32, #tpu.memory_space<vmem>>, %arg6: memref<3x32xf32, #tpu.memory_space<vmem>>, %arg7: memref<32x16xf32, #tpu.memory_space<vmem>>, %arg8: memref<1x32x96xf32, #tpu.memory_space<vmem>>, %arg9: memref<1x32x32xf32, #tpu.memory_space<vmem>>, %arg10: memref<1x32x32xf32, #tpu.memory_space<vmem>>, %arg11: memref<1x32x64xf32, #tpu.memory_space<vmem>>, %arg12: memref<1x32x32xf32, #tpu.memory_space<vmem>>, %arg13: memref<1x32x64xf32, #tpu.memory_space<vmem>>, %arg14: memref<1x64x32xf32, #tpu.memory_space<vmem>>, %arg15: memref<1x13x96xf32, #tpu.memory_space<vmem>>, %arg16: memref<1x1xf32, #tpu.memory_space<smem>>, %arg17: memref<16x32xf32, #tpu.memory_space<vmem>>, %arg18: memref<8x32xf32, #tpu.memory_space<vmem>>) attributes {dimension_semantics = [#tpu.dimension_semantics<arbitrary>], iteration_bounds = array<i64: 2>, scalar_prefetch = 2 : i64, scratch_operands = 2 : i64, tpu.core_type = #tpu.core_type<tc>, window_params = [{pipeline_mode = #tpu.pipeline_mode<synchronous>, transform_indices = @transform_0, window_bounds = array<i64: 16, 32>}, {pipeline_mode = #tpu.pipeline_mode<synchronous>, transform_indices = @transform_1, window_bounds = array<i64: 32, 32>}, {pipeline_mode = #tpu.pipeline_mode<synchronous>, transform_indices = @transform_2, window_bounds = array<i64: 16, 1>}, {pipeline_mode = #tpu.pipeline_mode<synchronous>, transform_indices = @transform_3, window_bounds = array<i64: 3, 32>}, {pipeline_mode = #tpu.pipeline_mode<synchronous>, transform_indices = @transform_4, window_bounds = array<i64: 32, 16>}, {transform_indices = @transform_5, window_bounds = array<i64: 1, 32, 96>}, {transform_indices = @transform_6, window_bounds = array<i64: 1, 32, 32>}, {transform_indices = @transform_7, window_bounds = array<i64: 1, 32, 32>}, {transform_indices = @transform_8, window_bounds = array<i64: 1, 32, 64>}, {transform_indices = @transform_9, window_bounds = array<i64: 1, 32, 32>}, {transform_indices = @transform_10, window_bounds = array<i64: 1, 32, 64>}, {transform_indices = @transform_11, window_bounds = array<i64: 1, 64, 32>}, {transform_indices = @transform_12, window_bounds = array<i64: 1, 13, 96>}, {transform_indices = @transform_13, window_bounds = array<i64: 1, 1>}]} {
    %c0_i32 = arith.constant 0 : i32
    %0 = arith.cmpi eq, %arg0, %c0_i32 : i32
    %1 = arith.extui %0 : i1 to i32
    %c0_i32_0 = arith.constant 0 : i32
    %2 = arith.cmpi ne, %1, %c0_i32_0 : i32
    scf.if %2 {
      %c0_201 = arith.constant 0 : index
      %c0_202 = arith.constant 0 : index
      %506 = vector.load %arg3[%c0_201, %c0_202] : memref<16x32xf32, #tpu.memory_space<vmem>>, vector<16x32xf32>
      %c0_203 = arith.constant 0 : index
      %c0_204 = arith.constant 0 : index
      %507 = vector.load %arg17[%c0_203, %c0_204] : memref<16x32xf32, #tpu.memory_space<vmem>>, vector<16x32xf32>
      tpu.vector_store %arg17[%c0_203, %c0_204], %506 {strides = array<i32>} : memref<16x32xf32, #tpu.memory_space<vmem>>, vector<16x32xf32>,
    } else {
    }
    %c0 = arith.constant 0 : index
    %c0_1 = arith.constant 0 : index
    %c0_2 = arith.constant 0 : index
    %3 = vector.load %arg15[%c0, %c0_1, %c0_2] : memref<1x13x96xf32, #tpu.memory_space<vmem>>, vector<1x13x96xf32>
    %4 = vector.shape_cast %3 : vector<1x13x96xf32> to vector<13x96xf32>
    %5 = vector.extract_strided_slice %4 {offsets = [0, 0], sizes = [1, 32], strides = [1, 1]} : vector<13x96xf32> to vector<1x32xf32>
    %6 = vector.extract_strided_slice %4 {offsets = [1, 0], sizes = [1, 32], strides = [1, 1]} : vector<13x96xf32> to vector<1x32xf32>
    %7 = vector.extract_strided_slice %4 {offsets = [2, 0], sizes = [1, 32], strides = [1, 1]} : vector<13x96xf32> to vector<1x32xf32>
    %8 = vector.extract_strided_slice %4 {offsets = [3, 0], sizes = [1, 32], strides = [1, 1]} : vector<13x96xf32> to vector<1x32xf32>
    %9 = vector.extract_strided_slice %4 {offsets = [4, 0], sizes = [1, 32], strides = [1, 1]} : vector<13x96xf32> to vector<1x32xf32>
    %10 = vector.extract_strided_slice %4 {offsets = [5, 0], sizes = [1, 32], strides = [1, 1]} : vector<13x96xf32> to vector<1x32xf32>
    %11 = vector.extract_strided_slice %4 {offsets = [6, 0], sizes = [1, 96], strides = [1, 1]} : vector<13x96xf32> to vector<1x96xf32>
    %12 = vector.extract_strided_slice %4 {offsets = [7, 0], sizes = [1, 32], strides = [1, 1]} : vector<13x96xf32> to vector<1x32xf32>
    %13 = vector.extract_strided_slice %4 {offsets = [8, 0], sizes = [1, 32], strides = [1, 1]} : vector<13x96xf32> to vector<1x32xf32>
    %14 = vector.extract_strided_slice %4 {offsets = [9, 0], sizes = [1, 64], strides = [1, 1]} : vector<13x96xf32> to vector<1x64xf32>
    %15 = vector.extract_strided_slice %4 {offsets = [10, 0], sizes = [1, 32], strides = [1, 1]} : vector<13x96xf32> to vector<1x32xf32>
    %16 = vector.extract_strided_slice %4 {offsets = [11, 0], sizes = [1, 64], strides = [1, 1]} : vector<13x96xf32> to vector<1x64xf32>
    %17 = vector.extract_strided_slice %4 {offsets = [12, 0], sizes = [1, 32], strides = [1, 1]} : vector<13x96xf32> to vector<1x32xf32>
    %c0_3 = arith.constant 0 : index
    %c0_4 = arith.constant 0 : index
    %18 = vector.load %arg17[%c0_3, %c0_4] : memref<16x32xf32, #tpu.memory_space<vmem>>, vector<16x32xf32>
    %cst = arith.constant dense<0.000000e+00> : vector<16xf32>
    %19 = vector.multi_reduction <add>, %18, %cst [1] : vector<16x32xf32> to vector<16xf32>
    %20 = vector.shape_cast %19 : vector<16xf32> to vector<16x1xf32>
    %cst_5 = arith.constant 3.200000e+01 : f32
    %21 = vector.broadcast %cst_5 : f32 to vector<16x1xf32>
    %22 = arith.divf %20, %21 : vector<16x1xf32>
    %23 = vector.broadcast %22 : vector<16x1xf32> to vector<16x32xf32>
    %24 = arith.subf %18, %23 : vector<16x32xf32>
    %25 = arith.mulf %24, %24 : vector<16x32xf32>
    %cst_6 = arith.constant dense<0.000000e+00> : vector<16xf32>
    %26 = vector.multi_reduction <add>, %25, %cst_6 [1] : vector<16x32xf32> to vector<16xf32>
    %27 = vector.shape_cast %26 : vector<16xf32> to vector<16x1xf32>
    %cst_7 = arith.constant 3.200000e+01 : f32
    %28 = vector.broadcast %cst_7 : f32 to vector<16x1xf32>
    %29 = arith.divf %27, %28 : vector<16x1xf32>
    %30 = vector.broadcast %22 : vector<16x1xf32> to vector<16x32xf32>
    %31 = arith.subf %18, %30 : vector<16x32xf32>
    %cst_8 = arith.constant 9.99999996E-13 : f32
    %32 = vector.broadcast %cst_8 : f32 to vector<16x1xf32>
    %33 = arith.addf %29, %32 : vector<16x1xf32>
    %34 = math.rsqrt %33 : vector<16x1xf32>
    %35 = vector.broadcast %34 : vector<16x1xf32> to vector<16x32xf32>
    %36 = arith.mulf %31, %35 : vector<16x32xf32>
    %37 = vector.broadcast %5 : vector<1x32xf32> to vector<16x32xf32>
    %38 = arith.mulf %36, %37 : vector<16x32xf32>
    %39 = vector.broadcast %6 : vector<1x32xf32> to vector<16x32xf32>
    %40 = arith.addf %38, %39 : vector<16x32xf32>
    %c0_9 = arith.constant 0 : index
    %c0_10 = arith.constant 0 : index
    %c0_11 = arith.constant 0 : index
    %41 = vector.load %arg8[%c0_9, %c0_10, %c0_11] : memref<1x32x96xf32, #tpu.memory_space<vmem>>, vector<1x32x96xf32>
    %42 = vector.shape_cast %41 : vector<1x32x96xf32> to vector<32x96xf32>
    %cst_12 = arith.constant dense<0.000000e+00> : vector<16x96xf32>
    %43 = tpu.matmul %40, %42, %cst_12 {dimension_numbers = #tpu.dot_dimension_numbers<[1], [0], [0], [1], [0, 0, 1, 1], [], []>} : vector<16x32xf32>, vector<32x96xf32>, vector<16x96xf32> -> vector<16x96xf32>
    %44 = vector.broadcast %11 : vector<1x96xf32> to vector<16x96xf32>
    %45 = arith.addf %43, %44 : vector<16x96xf32>
    %c0_13 = arith.constant 0 : index
    %46 = memref.load %arg1[%c0_13] : memref<2xi32, #tpu.memory_space<smem>>
    %47 = tpu.iota {dimensions = array<i32: 0>} : vector<8x8xi32>
    %48 = tpu.iota {dimensions = array<i32: 1>} : vector<8x8xi32>
    %49 = arith.cmpi sle, %48, %47 : vector<8x8xi32>
    %50 = vector.broadcast %46 : i32 to vector<8x8xi32>
    %51 = arith.cmpi slt, %48, %50 : vector<8x8xi32>
    %52 = arith.andi %49, %51 : vector<8x8xi1>
    %cst_14 = arith.constant 0.000000e+00 : f32
    %cst_15 = arith.constant -1.000000e+09 : f32
    %53 = vector.broadcast %cst_14 : f32 to vector<8x8xf32>
    %54 = vector.broadcast %cst_15 : f32 to vector<8x8xf32>
    %55 = arith.select %52, %53, %54 : vector<8x8xi1>, vector<8x8xf32>
    %56 = vector.extract_strided_slice %45 {offsets = [0, 0], sizes = [8, 32], strides = [1, 1]} : vector<16x96xf32> to vector<8x32xf32>
    %57 = vector.extract_strided_slice %45 {offsets = [0, 32], sizes = [8, 32], strides = [1, 1]} : vector<16x96xf32> to vector<8x32xf32>
    %58 = vector.extract_strided_slice %45 {offsets = [0, 64], sizes = [8, 32], strides = [1, 1]} : vector<16x96xf32> to vector<8x32xf32>
    %59 = vector.extract_strided_slice %56 {offsets = [0, 0], sizes = [8, 8], strides = [1, 1]} : vector<8x32xf32> to vector<8x8xf32>
    %60 = vector.extract_strided_slice %57 {offsets = [0, 0], sizes = [8, 8], strides = [1, 1]} : vector<8x32xf32> to vector<8x8xf32>
    %cst_16 = arith.constant dense<0.000000e+00> : vector<8x8xf32>
    %61 = tpu.matmul %59, %60, %cst_16 {dimension_numbers = #tpu.dot_dimension_numbers<[1], [1], [0], [0], [0, 0, 1, 0], [], []>} : vector<8x8xf32>, vector<8x8xf32>, vector<8x8xf32> -> vector<8x8xf32>
    %cst_17 = arith.constant 0.353553385 : f32
    %62 = vector.broadcast %cst_17 : f32 to vector<8x8xf32>
    %63 = arith.mulf %61, %62 : vector<8x8xf32>
    %64 = arith.addf %63, %55 : vector<8x8xf32>
    %cst_18 = arith.constant dense<0xFF800000> : vector<8xf32>
    %65 = vector.multi_reduction <maximumf>, %64, %cst_18 [1] : vector<8x8xf32> to vector<8xf32>
    %66 = vector.shape_cast %65 : vector<8xf32> to vector<8x1xf32>
    %67 = vector.broadcast %66 : vector<8x1xf32> to vector<8x8xf32>
    %68 = arith.subf %64, %67 : vector<8x8xf32>
    %69 = math.exp %68 : vector<8x8xf32>
    %cst_19 = arith.constant dense<0.000000e+00> : vector<8xf32>
    %70 = vector.multi_reduction <add>, %69, %cst_19 [1] : vector<8x8xf32> to vector<8xf32>
    %71 = vector.shape_cast %70 : vector<8xf32> to vector<8x1xf32>
    %72 = tpu.reciprocal %71 {approx = true} : vector<8x1xf32> -> vector<8x1xf32>
    %73 = vector.broadcast %72 : vector<8x1xf32> to vector<8x8xf32>
    %74 = arith.mulf %69, %73 : vector<8x8xf32>
    %75 = vector.extract_strided_slice %58 {offsets = [0, 0], sizes = [8, 8], strides = [1, 1]} : vector<8x32xf32> to vector<8x8xf32>
    %cst_20 = arith.constant dense<0.000000e+00> : vector<8x8xf32>
    %76 = tpu.matmul %74, %75, %cst_20 {dimension_numbers = #tpu.dot_dimension_numbers<[1], [0], [0], [1], [0, 0, 1, 1], [], []>} : vector<8x8xf32>, vector<8x8xf32>, vector<8x8xf32> -> vector<8x8xf32>
    %c0_21 = arith.constant 0 : index
    %c0_22 = arith.constant 0 : index
    %77 = vector.load %arg18[%c0_21, %c0_22] : memref<8x32xf32, #tpu.memory_space<vmem>>, vector<8x8xf32>
    tpu.vector_store %arg18[%c0_21, %c0_22], %76 {strides = array<i32>} : memref<8x32xf32, #tpu.memory_space<vmem>>, vector<8x8xf32>,
    %78 = vector.extract_strided_slice %56 {offsets = [0, 8], sizes = [8, 8], strides = [1, 1]} : vector<8x32xf32> to vector<8x8xf32>
    %79 = vector.extract_strided_slice %57 {offsets = [0, 8], sizes = [8, 8], strides = [1, 1]} : vector<8x32xf32> to vector<8x8xf32>
    %cst_23 = arith.constant dense<0.000000e+00> : vector<8x8xf32>
    %80 = tpu.matmul %78, %79, %cst_23 {dimension_numbers = #tpu.dot_dimension_numbers<[1], [1], [0], [0], [0, 0, 1, 0], [], []>} : vector<8x8xf32>, vector<8x8xf32>, vector<8x8xf32> -> vector<8x8xf32>
    %cst_24 = arith.constant 0.353553385 : f32
    %81 = vector.broadcast %cst_24 : f32 to vector<8x8xf32>
    %82 = arith.mulf %80, %81 : vector<8x8xf32>
    %83 = arith.addf %82, %55 : vector<8x8xf32>
    %cst_25 = arith.constant dense<0xFF800000> : vector<8xf32>
    %84 = vector.multi_reduction <maximumf>, %83, %cst_25 [1] : vector<8x8xf32> to vector<8xf32>
    %85 = vector.shape_cast %84 : vector<8xf32> to vector<8x1xf32>
    %86 = vector.broadcast %85 : vector<8x1xf32> to vector<8x8xf32>
    %87 = arith.subf %83, %86 : vector<8x8xf32>
    %88 = math.exp %87 : vector<8x8xf32>
    %cst_26 = arith.constant dense<0.000000e+00> : vector<8xf32>
    %89 = vector.multi_reduction <add>, %88, %cst_26 [1] : vector<8x8xf32> to vector<8xf32>
    %90 = vector.shape_cast %89 : vector<8xf32> to vector<8x1xf32>
    %91 = tpu.reciprocal %90 {approx = true} : vector<8x1xf32> -> vector<8x1xf32>
    %92 = vector.broadcast %91 : vector<8x1xf32> to vector<8x8xf32>
    %93 = arith.mulf %88, %92 : vector<8x8xf32>
    %94 = vector.extract_strided_slice %58 {offsets = [0, 8], sizes = [8, 8], strides = [1, 1]} : vector<8x32xf32> to vector<8x8xf32>
    %cst_27 = arith.constant dense<0.000000e+00> : vector<8x8xf32>
    %95 = tpu.matmul %93, %94, %cst_27 {dimension_numbers = #tpu.dot_dimension_numbers<[1], [0], [0], [1], [0, 0, 1, 1], [], []>} : vector<8x8xf32>, vector<8x8xf32>, vector<8x8xf32> -> vector<8x8xf32>
    %c0_28 = arith.constant 0 : index
    %c8 = arith.constant 8 : index
    %96 = vector.load %arg18[%c0_28, %c8] : memref<8x32xf32, #tpu.memory_space<vmem>>, vector<8x8xf32>
    tpu.vector_store %arg18[%c0_28, %c8], %95 {strides = array<i32>} : memref<8x32xf32, #tpu.memory_space<vmem>>, vector<8x8xf32>,
    %97 = vector.extract_strided_slice %56 {offsets = [0, 16], sizes = [8, 8], strides = [1, 1]} : vector<8x32xf32> to vector<8x8xf32>
    %98 = vector.extract_strided_slice %57 {offsets = [0, 16], sizes = [8, 8], strides = [1, 1]} : vector<8x32xf32> to vector<8x8xf32>
    %cst_29 = arith.constant dense<0.000000e+00> : vector<8x8xf32>
    %99 = tpu.matmul %97, %98, %cst_29 {dimension_numbers = #tpu.dot_dimension_numbers<[1], [1], [0], [0], [0, 0, 1, 0], [], []>} : vector<8x8xf32>, vector<8x8xf32>, vector<8x8xf32> -> vector<8x8xf32>
    %cst_30 = arith.constant 0.353553385 : f32
    %100 = vector.broadcast %cst_30 : f32 to vector<8x8xf32>
    %101 = arith.mulf %99, %100 : vector<8x8xf32>
    %102 = arith.addf %101, %55 : vector<8x8xf32>
    %cst_31 = arith.constant dense<0xFF800000> : vector<8xf32>
    %103 = vector.multi_reduction <maximumf>, %102, %cst_31 [1] : vector<8x8xf32> to vector<8xf32>
    %104 = vector.shape_cast %103 : vector<8xf32> to vector<8x1xf32>
    %105 = vector.broadcast %104 : vector<8x1xf32> to vector<8x8xf32>
    %106 = arith.subf %102, %105 : vector<8x8xf32>
    %107 = math.exp %106 : vector<8x8xf32>
    %cst_32 = arith.constant dense<0.000000e+00> : vector<8xf32>
    %108 = vector.multi_reduction <add>, %107, %cst_32 [1] : vector<8x8xf32> to vector<8xf32>
    %109 = vector.shape_cast %108 : vector<8xf32> to vector<8x1xf32>
    %110 = tpu.reciprocal %109 {approx = true} : vector<8x1xf32> -> vector<8x1xf32>
    %111 = vector.broadcast %110 : vector<8x1xf32> to vector<8x8xf32>
    %112 = arith.mulf %107, %111 : vector<8x8xf32>
    %113 = vector.extract_strided_slice %58 {offsets = [0, 16], sizes = [8, 8], strides = [1, 1]} : vector<8x32xf32> to vector<8x8xf32>
    %cst_33 = arith.constant dense<0.000000e+00> : vector<8x8xf32>
    %114 = tpu.matmul %112, %113, %cst_33 {dimension_numbers = #tpu.dot_dimension_numbers<[1], [0], [0], [1], [0, 0, 1, 1], [], []>} : vector<8x8xf32>, vector<8x8xf32>, vector<8x8xf32> -> vector<8x8xf32>
    %c0_34 = arith.constant 0 : index
    %c16 = arith.constant 16 : index
    %115 = vector.load %arg18[%c0_34, %c16] : memref<8x32xf32, #tpu.memory_space<vmem>>, vector<8x8xf32>
    tpu.vector_store %arg18[%c0_34, %c16], %114 {strides = array<i32>} : memref<8x32xf32, #tpu.memory_space<vmem>>, vector<8x8xf32>,
    %116 = vector.extract_strided_slice %56 {offsets = [0, 24], sizes = [8, 8], strides = [1, 1]} : vector<8x32xf32> to vector<8x8xf32>
    %117 = vector.extract_strided_slice %57 {offsets = [0, 24], sizes = [8, 8], strides = [1, 1]} : vector<8x32xf32> to vector<8x8xf32>
    %cst_35 = arith.constant dense<0.000000e+00> : vector<8x8xf32>
    %118 = tpu.matmul %116, %117, %cst_35 {dimension_numbers = #tpu.dot_dimension_numbers<[1], [1], [0], [0], [0, 0, 1, 0], [], []>} : vector<8x8xf32>, vector<8x8xf32>, vector<8x8xf32> -> vector<8x8xf32>
    %cst_36 = arith.constant 0.353553385 : f32
    %119 = vector.broadcast %cst_36 : f32 to vector<8x8xf32>
    %120 = arith.mulf %118, %119 : vector<8x8xf32>
    %121 = arith.addf %120, %55 : vector<8x8xf32>
    %cst_37 = arith.constant dense<0xFF800000> : vector<8xf32>
    %122 = vector.multi_reduction <maximumf>, %121, %cst_37 [1] : vector<8x8xf32> to vector<8xf32>
    %123 = vector.shape_cast %122 : vector<8xf32> to vector<8x1xf32>
    %124 = vector.broadcast %123 : vector<8x1xf32> to vector<8x8xf32>
    %125 = arith.subf %121, %124 : vector<8x8xf32>
    %126 = math.exp %125 : vector<8x8xf32>
    %cst_38 = arith.constant dense<0.000000e+00> : vector<8xf32>
    %127 = vector.multi_reduction <add>, %126, %cst_38 [1] : vector<8x8xf32> to vector<8xf32>
    %128 = vector.shape_cast %127 : vector<8xf32> to vector<8x1xf32>
    %129 = tpu.reciprocal %128 {approx = true} : vector<8x1xf32> -> vector<8x1xf32>
    %130 = vector.broadcast %129 : vector<8x1xf32> to vector<8x8xf32>
    %131 = arith.mulf %126, %130 : vector<8x8xf32>
    %132 = vector.extract_strided_slice %58 {offsets = [0, 24], sizes = [8, 8], strides = [1, 1]} : vector<8x32xf32> to vector<8x8xf32>
    %cst_39 = arith.constant dense<0.000000e+00> : vector<8x8xf32>
    %133 = tpu.matmul %131, %132, %cst_39 {dimension_numbers = #tpu.dot_dimension_numbers<[1], [0], [0], [1], [0, 0, 1, 1], [], []>} : vector<8x8xf32>, vector<8x8xf32>, vector<8x8xf32> -> vector<8x8xf32>
    %c0_40 = arith.constant 0 : index
    %c24 = arith.constant 24 : index
    %134 = vector.load %arg18[%c0_40, %c24] : memref<8x32xf32, #tpu.memory_space<vmem>>, vector<8x8xf32>
    tpu.vector_store %arg18[%c0_40, %c24], %133 {strides = array<i32>} : memref<8x32xf32, #tpu.memory_space<vmem>>, vector<8x8xf32>,
    %c0_41 = arith.constant 0 : index
    %c0_42 = arith.constant 0 : index
    %135 = vector.load %arg18[%c0_41, %c0_42] : memref<8x32xf32, #tpu.memory_space<vmem>>, vector<8x32xf32>
    %c0_43 = arith.constant 0 : index
    %c0_44 = arith.constant 0 : index
    %c0_45 = arith.constant 0 : index
    %136 = vector.load %arg9[%c0_43, %c0_44, %c0_45] : memref<1x32x32xf32, #tpu.memory_space<vmem>>, vector<1x32x32xf32>
    %137 = vector.shape_cast %136 : vector<1x32x32xf32> to vector<32x32xf32>
    %cst_46 = arith.constant dense<0.000000e+00> : vector<8x32xf32>
    %138 = tpu.matmul %135, %137, %cst_46 {dimension_numbers = #tpu.dot_dimension_numbers<[1], [0], [0], [1], [0, 0, 1, 1], [], []>} : vector<8x32xf32>, vector<32x32xf32>, vector<8x32xf32> -> vector<8x32xf32>
    %139 = vector.extract_strided_slice %18 {offsets = [0, 0], sizes = [8, 32], strides = [1, 1]} : vector<16x32xf32> to vector<8x32xf32>
    %140 = arith.addf %139, %138 : vector<8x32xf32>
    %141 = vector.broadcast %12 : vector<1x32xf32> to vector<8x32xf32>
    %142 = arith.addf %140, %141 : vector<8x32xf32>
    %c0_47 = arith.constant 0 : index
    %c0_48 = arith.constant 0 : index
    %143 = vector.load %arg17[%c0_47, %c0_48] : memref<16x32xf32, #tpu.memory_space<vmem>>, vector<8x32xf32>
    tpu.vector_store %arg17[%c0_47, %c0_48], %142 {strides = array<i32>} : memref<16x32xf32, #tpu.memory_space<vmem>>, vector<8x32xf32>,
    %c1 = arith.constant 1 : index
    %144 = memref.load %arg1[%c1] : memref<2xi32, #tpu.memory_space<smem>>
    %145 = tpu.iota {dimensions = array<i32: 0>} : vector<8x8xi32>
    %146 = tpu.iota {dimensions = array<i32: 1>} : vector<8x8xi32>
    %147 = arith.cmpi sle, %146, %145 : vector<8x8xi32>
    %148 = vector.broadcast %144 : i32 to vector<8x8xi32>
    %149 = arith.cmpi slt, %146, %148 : vector<8x8xi32>
    %150 = arith.andi %147, %149 : vector<8x8xi1>
    %cst_49 = arith.constant 0.000000e+00 : f32
    %cst_50 = arith.constant -1.000000e+09 : f32
    %151 = vector.broadcast %cst_49 : f32 to vector<8x8xf32>
    %152 = vector.broadcast %cst_50 : f32 to vector<8x8xf32>
    %153 = arith.select %150, %151, %152 : vector<8x8xi1>, vector<8x8xf32>
    %154 = vector.extract_strided_slice %45 {offsets = [8, 0], sizes = [8, 32], strides = [1, 1]} : vector<16x96xf32> to vector<8x32xf32>
    %155 = vector.extract_strided_slice %45 {offsets = [8, 32], sizes = [8, 32], strides = [1, 1]} : vector<16x96xf32> to vector<8x32xf32>
    %156 = vector.extract_strided_slice %45 {offsets = [8, 64], sizes = [8, 32], strides = [1, 1]} : vector<16x96xf32> to vector<8x32xf32>
    %157 = vector.extract_strided_slice %154 {offsets = [0, 0], sizes = [8, 8], strides = [1, 1]} : vector<8x32xf32> to vector<8x8xf32>
    %158 = vector.extract_strided_slice %155 {offsets = [0, 0], sizes = [8, 8], strides = [1, 1]} : vector<8x32xf32> to vector<8x8xf32>
    %cst_51 = arith.constant dense<0.000000e+00> : vector<8x8xf32>
    %159 = tpu.matmul %157, %158, %cst_51 {dimension_numbers = #tpu.dot_dimension_numbers<[1], [1], [0], [0], [0, 0, 1, 0], [], []>} : vector<8x8xf32>, vector<8x8xf32>, vector<8x8xf32> -> vector<8x8xf32>
    %cst_52 = arith.constant 0.353553385 : f32
    %160 = vector.broadcast %cst_52 : f32 to vector<8x8xf32>
    %161 = arith.mulf %159, %160 : vector<8x8xf32>
    %162 = arith.addf %161, %153 : vector<8x8xf32>
    %cst_53 = arith.constant dense<0xFF800000> : vector<8xf32>
    %163 = vector.multi_reduction <maximumf>, %162, %cst_53 [1] : vector<8x8xf32> to vector<8xf32>
    %164 = vector.shape_cast %163 : vector<8xf32> to vector<8x1xf32>
    %165 = vector.broadcast %164 : vector<8x1xf32> to vector<8x8xf32>
    %166 = arith.subf %162, %165 : vector<8x8xf32>
    %167 = math.exp %166 : vector<8x8xf32>
    %cst_54 = arith.constant dense<0.000000e+00> : vector<8xf32>
    %168 = vector.multi_reduction <add>, %167, %cst_54 [1] : vector<8x8xf32> to vector<8xf32>
    %169 = vector.shape_cast %168 : vector<8xf32> to vector<8x1xf32>
    %170 = tpu.reciprocal %169 {approx = true} : vector<8x1xf32> -> vector<8x1xf32>
    %171 = vector.broadcast %170 : vector<8x1xf32> to vector<8x8xf32>
    %172 = arith.mulf %167, %171 : vector<8x8xf32>
    %173 = vector.extract_strided_slice %156 {offsets = [0, 0], sizes = [8, 8], strides = [1, 1]} : vector<8x32xf32> to vector<8x8xf32>
    %cst_55 = arith.constant dense<0.000000e+00> : vector<8x8xf32>
    %174 = tpu.matmul %172, %173, %cst_55 {dimension_numbers = #tpu.dot_dimension_numbers<[1], [0], [0], [1], [0, 0, 1, 1], [], []>} : vector<8x8xf32>, vector<8x8xf32>, vector<8x8xf32> -> vector<8x8xf32>
    %c0_56 = arith.constant 0 : index
    %c0_57 = arith.constant 0 : index
    %175 = vector.load %arg18[%c0_56, %c0_57] : memref<8x32xf32, #tpu.memory_space<vmem>>, vector<8x8xf32>
    tpu.vector_store %arg18[%c0_56, %c0_57], %174 {strides = array<i32>} : memref<8x32xf32, #tpu.memory_space<vmem>>, vector<8x8xf32>,
    %176 = vector.extract_strided_slice %154 {offsets = [0, 8], sizes = [8, 8], strides = [1, 1]} : vector<8x32xf32> to vector<8x8xf32>
    %177 = vector.extract_strided_slice %155 {offsets = [0, 8], sizes = [8, 8], strides = [1, 1]} : vector<8x32xf32> to vector<8x8xf32>
    %cst_58 = arith.constant dense<0.000000e+00> : vector<8x8xf32>
    %178 = tpu.matmul %176, %177, %cst_58 {dimension_numbers = #tpu.dot_dimension_numbers<[1], [1], [0], [0], [0, 0, 1, 0], [], []>} : vector<8x8xf32>, vector<8x8xf32>, vector<8x8xf32> -> vector<8x8xf32>
    %cst_59 = arith.constant 0.353553385 : f32
    %179 = vector.broadcast %cst_59 : f32 to vector<8x8xf32>
    %180 = arith.mulf %178, %179 : vector<8x8xf32>
    %181 = arith.addf %180, %153 : vector<8x8xf32>
    %cst_60 = arith.constant dense<0xFF800000> : vector<8xf32>
    %182 = vector.multi_reduction <maximumf>, %181, %cst_60 [1] : vector<8x8xf32> to vector<8xf32>
    %183 = vector.shape_cast %182 : vector<8xf32> to vector<8x1xf32>
    %184 = vector.broadcast %183 : vector<8x1xf32> to vector<8x8xf32>
    %185 = arith.subf %181, %184 : vector<8x8xf32>
    %186 = math.exp %185 : vector<8x8xf32>
    %cst_61 = arith.constant dense<0.000000e+00> : vector<8xf32>
    %187 = vector.multi_reduction <add>, %186, %cst_61 [1] : vector<8x8xf32> to vector<8xf32>
    %188 = vector.shape_cast %187 : vector<8xf32> to vector<8x1xf32>
    %189 = tpu.reciprocal %188 {approx = true} : vector<8x1xf32> -> vector<8x1xf32>
    %190 = vector.broadcast %189 : vector<8x1xf32> to vector<8x8xf32>
    %191 = arith.mulf %186, %190 : vector<8x8xf32>
    %192 = vector.extract_strided_slice %156 {offsets = [0, 8], sizes = [8, 8], strides = [1, 1]} : vector<8x32xf32> to vector<8x8xf32>
    %cst_62 = arith.constant dense<0.000000e+00> : vector<8x8xf32>
    %193 = tpu.matmul %191, %192, %cst_62 {dimension_numbers = #tpu.dot_dimension_numbers<[1], [0], [0], [1], [0, 0, 1, 1], [], []>} : vector<8x8xf32>, vector<8x8xf32>, vector<8x8xf32> -> vector<8x8xf32>
    %c0_63 = arith.constant 0 : index
    %c8_64 = arith.constant 8 : index
    %194 = vector.load %arg18[%c0_63, %c8_64] : memref<8x32xf32, #tpu.memory_space<vmem>>, vector<8x8xf32>
    tpu.vector_store %arg18[%c0_63, %c8_64], %193 {strides = array<i32>} : memref<8x32xf32, #tpu.memory_space<vmem>>, vector<8x8xf32>,
    %195 = vector.extract_strided_slice %154 {offsets = [0, 16], sizes = [8, 8], strides = [1, 1]} : vector<8x32xf32> to vector<8x8xf32>
    %196 = vector.extract_strided_slice %155 {offsets = [0, 16], sizes = [8, 8], strides = [1, 1]} : vector<8x32xf32> to vector<8x8xf32>
    %cst_65 = arith.constant dense<0.000000e+00> : vector<8x8xf32>
    %197 = tpu.matmul %195, %196, %cst_65 {dimension_numbers = #tpu.dot_dimension_numbers<[1], [1], [0], [0], [0, 0, 1, 0], [], []>} : vector<8x8xf32>, vector<8x8xf32>, vector<8x8xf32> -> vector<8x8xf32>
    %cst_66 = arith.constant 0.353553385 : f32
    %198 = vector.broadcast %cst_66 : f32 to vector<8x8xf32>
    %199 = arith.mulf %197, %198 : vector<8x8xf32>
    %200 = arith.addf %199, %153 : vector<8x8xf32>
    %cst_67 = arith.constant dense<0xFF800000> : vector<8xf32>
    %201 = vector.multi_reduction <maximumf>, %200, %cst_67 [1] : vector<8x8xf32> to vector<8xf32>
    %202 = vector.shape_cast %201 : vector<8xf32> to vector<8x1xf32>
    %203 = vector.broadcast %202 : vector<8x1xf32> to vector<8x8xf32>
    %204 = arith.subf %200, %203 : vector<8x8xf32>
    %205 = math.exp %204 : vector<8x8xf32>
    %cst_68 = arith.constant dense<0.000000e+00> : vector<8xf32>
    %206 = vector.multi_reduction <add>, %205, %cst_68 [1] : vector<8x8xf32> to vector<8xf32>
    %207 = vector.shape_cast %206 : vector<8xf32> to vector<8x1xf32>
    %208 = tpu.reciprocal %207 {approx = true} : vector<8x1xf32> -> vector<8x1xf32>
    %209 = vector.broadcast %208 : vector<8x1xf32> to vector<8x8xf32>
    %210 = arith.mulf %205, %209 : vector<8x8xf32>
    %211 = vector.extract_strided_slice %156 {offsets = [0, 16], sizes = [8, 8], strides = [1, 1]} : vector<8x32xf32> to vector<8x8xf32>
    %cst_69 = arith.constant dense<0.000000e+00> : vector<8x8xf32>
    %212 = tpu.matmul %210, %211, %cst_69 {dimension_numbers = #tpu.dot_dimension_numbers<[1], [0], [0], [1], [0, 0, 1, 1], [], []>} : vector<8x8xf32>, vector<8x8xf32>, vector<8x8xf32> -> vector<8x8xf32>
    %c0_70 = arith.constant 0 : index
    %c16_71 = arith.constant 16 : index
    %213 = vector.load %arg18[%c0_70, %c16_71] : memref<8x32xf32, #tpu.memory_space<vmem>>, vector<8x8xf32>
    tpu.vector_store %arg18[%c0_70, %c16_71], %212 {strides = array<i32>} : memref<8x32xf32, #tpu.memory_space<vmem>>, vector<8x8xf32>,
    %214 = vector.extract_strided_slice %154 {offsets = [0, 24], sizes = [8, 8], strides = [1, 1]} : vector<8x32xf32> to vector<8x8xf32>
    %215 = vector.extract_strided_slice %155 {offsets = [0, 24], sizes = [8, 8], strides = [1, 1]} : vector<8x32xf32> to vector<8x8xf32>
    %cst_72 = arith.constant dense<0.000000e+00> : vector<8x8xf32>
    %216 = tpu.matmul %214, %215, %cst_72 {dimension_numbers = #tpu.dot_dimension_numbers<[1], [1], [0], [0], [0, 0, 1, 0], [], []>} : vector<8x8xf32>, vector<8x8xf32>, vector<8x8xf32> -> vector<8x8xf32>
    %cst_73 = arith.constant 0.353553385 : f32
    %217 = vector.broadcast %cst_73 : f32 to vector<8x8xf32>
    %218 = arith.mulf %216, %217 : vector<8x8xf32>
    %219 = arith.addf %218, %153 : vector<8x8xf32>
    %cst_74 = arith.constant dense<0xFF800000> : vector<8xf32>
    %220 = vector.multi_reduction <maximumf>, %219, %cst_74 [1] : vector<8x8xf32> to vector<8xf32>
    %221 = vector.shape_cast %220 : vector<8xf32> to vector<8x1xf32>
    %222 = vector.broadcast %221 : vector<8x1xf32> to vector<8x8xf32>
    %223 = arith.subf %219, %222 : vector<8x8xf32>
    %224 = math.exp %223 : vector<8x8xf32>
    %cst_75 = arith.constant dense<0.000000e+00> : vector<8xf32>
    %225 = vector.multi_reduction <add>, %224, %cst_75 [1] : vector<8x8xf32> to vector<8xf32>
    %226 = vector.shape_cast %225 : vector<8xf32> to vector<8x1xf32>
    %227 = tpu.reciprocal %226 {approx = true} : vector<8x1xf32> -> vector<8x1xf32>
    %228 = vector.broadcast %227 : vector<8x1xf32> to vector<8x8xf32>
    %229 = arith.mulf %224, %228 : vector<8x8xf32>
    %230 = vector.extract_strided_slice %156 {offsets = [0, 24], sizes = [8, 8], strides = [1, 1]} : vector<8x32xf32> to vector<8x8xf32>
    %cst_76 = arith.constant dense<0.000000e+00> : vector<8x8xf32>
    %231 = tpu.matmul %229, %230, %cst_76 {dimension_numbers = #tpu.dot_dimension_numbers<[1], [0], [0], [1], [0, 0, 1, 1], [], []>} : vector<8x8xf32>, vector<8x8xf32>, vector<8x8xf32> -> vector<8x8xf32>
    %c0_77 = arith.constant 0 : index
    %c24_78 = arith.constant 24 : index
    %232 = vector.load %arg18[%c0_77, %c24_78] : memref<8x32xf32, #tpu.memory_space<vmem>>, vector<8x8xf32>
    tpu.vector_store %arg18[%c0_77, %c24_78], %231 {strides = array<i32>} : memref<8x32xf32, #tpu.memory_space<vmem>>, vector<8x8xf32>,
    %c0_79 = arith.constant 0 : index
    %c0_80 = arith.constant 0 : index
    %233 = vector.load %arg18[%c0_79, %c0_80] : memref<8x32xf32, #tpu.memory_space<vmem>>, vector<8x32xf32>
    %c0_81 = arith.constant 0 : index
    %c0_82 = arith.constant 0 : index
    %c0_83 = arith.constant 0 : index
    %234 = vector.load %arg9[%c0_81, %c0_82, %c0_83] : memref<1x32x32xf32, #tpu.memory_space<vmem>>, vector<1x32x32xf32>
    %235 = vector.shape_cast %234 : vector<1x32x32xf32> to vector<32x32xf32>
    %cst_84 = arith.constant dense<0.000000e+00> : vector<8x32xf32>
    %236 = tpu.matmul %233, %235, %cst_84 {dimension_numbers = #tpu.dot_dimension_numbers<[1], [0], [0], [1], [0, 0, 1, 1], [], []>} : vector<8x32xf32>, vector<32x32xf32>, vector<8x32xf32> -> vector<8x32xf32>
    %237 = vector.extract_strided_slice %18 {offsets = [8, 0], sizes = [8, 32], strides = [1, 1]} : vector<16x32xf32> to vector<8x32xf32>
    %238 = arith.addf %237, %236 : vector<8x32xf32>
    %239 = vector.broadcast %12 : vector<1x32xf32> to vector<8x32xf32>
    %240 = arith.addf %238, %239 : vector<8x32xf32>
    %c8_85 = arith.constant 8 : index
    %c0_86 = arith.constant 0 : index
    %241 = vector.load %arg17[%c8_85, %c0_86] : memref<16x32xf32, #tpu.memory_space<vmem>>, vector<8x32xf32>
    tpu.vector_store %arg17[%c8_85, %c0_86], %240 {strides = array<i32>} : memref<16x32xf32, #tpu.memory_space<vmem>>, vector<8x32xf32>,
    %c0_87 = arith.constant 0 : index
    %c0_88 = arith.constant 0 : index
    %242 = vector.load %arg17[%c0_87, %c0_88] : memref<16x32xf32, #tpu.memory_space<vmem>>, vector<16x32xf32>
    %cst_89 = arith.constant dense<0.000000e+00> : vector<16xf32>
    %243 = vector.multi_reduction <add>, %242, %cst_89 [1] : vector<16x32xf32> to vector<16xf32>
    %244 = vector.shape_cast %243 : vector<16xf32> to vector<16x1xf32>
    %cst_90 = arith.constant 3.200000e+01 : f32
    %245 = vector.broadcast %cst_90 : f32 to vector<16x1xf32>
    %246 = arith.divf %244, %245 : vector<16x1xf32>
    %247 = vector.broadcast %246 : vector<16x1xf32> to vector<16x32xf32>
    %248 = arith.subf %242, %247 : vector<16x32xf32>
    %249 = arith.mulf %248, %248 : vector<16x32xf32>
    %cst_91 = arith.constant dense<0.000000e+00> : vector<16xf32>
    %250 = vector.multi_reduction <add>, %249, %cst_91 [1] : vector<16x32xf32> to vector<16xf32>
    %251 = vector.shape_cast %250 : vector<16xf32> to vector<16x1xf32>
    %cst_92 = arith.constant 3.200000e+01 : f32
    %252 = vector.broadcast %cst_92 : f32 to vector<16x1xf32>
    %253 = arith.divf %251, %252 : vector<16x1xf32>
    %254 = vector.broadcast %246 : vector<16x1xf32> to vector<16x32xf32>
    %255 = arith.subf %242, %254 : vector<16x32xf32>
    %cst_93 = arith.constant 9.99999996E-13 : f32
    %256 = vector.broadcast %cst_93 : f32 to vector<16x1xf32>
    %257 = arith.addf %253, %256 : vector<16x1xf32>
    %258 = math.rsqrt %257 : vector<16x1xf32>
    %259 = vector.broadcast %258 : vector<16x1xf32> to vector<16x32xf32>
    %260 = arith.mulf %255, %259 : vector<16x32xf32>
    %261 = vector.broadcast %7 : vector<1x32xf32> to vector<16x32xf32>
    %262 = arith.mulf %260, %261 : vector<16x32xf32>
    %263 = vector.broadcast %8 : vector<1x32xf32> to vector<16x32xf32>
    %264 = arith.addf %262, %263 : vector<16x32xf32>
    %c0_94 = arith.constant 0 : index
    %c0_95 = arith.constant 0 : index
    %c0_96 = arith.constant 0 : index
    %265 = vector.load %arg10[%c0_94, %c0_95, %c0_96] : memref<1x32x32xf32, #tpu.memory_space<vmem>>, vector<1x32x32xf32>
    %266 = vector.shape_cast %265 : vector<1x32x32xf32> to vector<32x32xf32>
    %cst_97 = arith.constant dense<0.000000e+00> : vector<16x32xf32>
    %267 = tpu.matmul %264, %266, %cst_97 {dimension_numbers = #tpu.dot_dimension_numbers<[1], [0], [0], [1], [0, 0, 1, 1], [], []>} : vector<16x32xf32>, vector<32x32xf32>, vector<16x32xf32> -> vector<16x32xf32>
    %268 = vector.broadcast %13 : vector<1x32xf32> to vector<16x32xf32>
    %269 = arith.addf %267, %268 : vector<16x32xf32>
    %c0_98 = arith.constant 0 : index
    %c0_99 = arith.constant 0 : index
    %270 = vector.load %arg4[%c0_98, %c0_99] : memref<32x32xf32, #tpu.memory_space<vmem>>, vector<32x32xf32>
    %c0_100 = arith.constant 0 : index
    %c0_101 = arith.constant 0 : index
    %c0_102 = arith.constant 0 : index
    %271 = vector.load %arg11[%c0_100, %c0_101, %c0_102] : memref<1x32x64xf32, #tpu.memory_space<vmem>>, vector<1x32x64xf32>
    %272 = vector.shape_cast %271 : vector<1x32x64xf32> to vector<32x64xf32>
    %cst_103 = arith.constant dense<0.000000e+00> : vector<32x64xf32>
    %273 = tpu.matmul %270, %272, %cst_103 {dimension_numbers = #tpu.dot_dimension_numbers<[1], [0], [0], [1], [0, 0, 1, 1], [], []>} : vector<32x32xf32>, vector<32x64xf32>, vector<32x64xf32> -> vector<32x64xf32>
    %274 = vector.broadcast %14 : vector<1x64xf32> to vector<32x64xf32>
    %275 = arith.addf %273, %274 : vector<32x64xf32>
    %c0_104 = arith.constant 0 : index
    %276 = memref.load %arg2[%c0_104] : memref<2xi32, #tpu.memory_space<smem>>
    %277 = tpu.iota {dimensions = array<i32: 1>} : vector<8x16xi32>
    %278 = vector.broadcast %276 : i32 to vector<8x16xi32>
    %279 = arith.cmpi slt, %277, %278 : vector<8x16xi32>
    %cst_105 = arith.constant 0.000000e+00 : f32
    %cst_106 = arith.constant -1.000000e+09 : f32
    %280 = vector.broadcast %cst_105 : f32 to vector<8x16xf32>
    %281 = vector.broadcast %cst_106 : f32 to vector<8x16xf32>
    %282 = arith.select %279, %280, %281 : vector<8x16xi1>, vector<8x16xf32>
    %283 = vector.extract_strided_slice %269 {offsets = [0, 0], sizes = [8, 32], strides = [1, 1]} : vector<16x32xf32> to vector<8x32xf32>
    %284 = vector.extract_strided_slice %275 {offsets = [0, 0], sizes = [16, 32], strides = [1, 1]} : vector<32x64xf32> to vector<16x32xf32>
    %285 = vector.extract_strided_slice %275 {offsets = [0, 32], sizes = [16, 32], strides = [1, 1]} : vector<32x64xf32> to vector<16x32xf32>
    %286 = vector.extract_strided_slice %283 {offsets = [0, 0], sizes = [8, 8], strides = [1, 1]} : vector<8x32xf32> to vector<8x8xf32>
    %287 = vector.extract_strided_slice %284 {offsets = [0, 0], sizes = [16, 8], strides = [1, 1]} : vector<16x32xf32> to vector<16x8xf32>
    %cst_107 = arith.constant dense<0.000000e+00> : vector<8x16xf32>
    %288 = tpu.matmul %286, %287, %cst_107 {dimension_numbers = #tpu.dot_dimension_numbers<[1], [1], [0], [0], [0, 0, 1, 0], [], []>} : vector<8x8xf32>, vector<16x8xf32>, vector<8x16xf32> -> vector<8x16xf32>
    %cst_108 = arith.constant 0.353553385 : f32
    %289 = vector.broadcast %cst_108 : f32 to vector<8x16xf32>
    %290 = arith.mulf %288, %289 : vector<8x16xf32>
    %291 = arith.addf %290, %282 : vector<8x16xf32>
    %cst_109 = arith.constant dense<0xFF800000> : vector<8xf32>
    %292 = vector.multi_reduction <maximumf>, %291, %cst_109 [1] : vector<8x16xf32> to vector<8xf32>
    %293 = vector.shape_cast %292 : vector<8xf32> to vector<8x1xf32>
    %294 = vector.broadcast %293 : vector<8x1xf32> to vector<8x16xf32>
    %295 = arith.subf %291, %294 : vector<8x16xf32>
    %296 = math.exp %295 : vector<8x16xf32>
    %cst_110 = arith.constant dense<0.000000e+00> : vector<8xf32>
    %297 = vector.multi_reduction <add>, %296, %cst_110 [1] : vector<8x16xf32> to vector<8xf32>
    %298 = vector.shape_cast %297 : vector<8xf32> to vector<8x1xf32>
    %299 = tpu.reciprocal %298 {approx = true} : vector<8x1xf32> -> vector<8x1xf32>
    %300 = vector.broadcast %299 : vector<8x1xf32> to vector<8x16xf32>
    %301 = arith.mulf %296, %300 : vector<8x16xf32>
    %302 = vector.extract_strided_slice %285 {offsets = [0, 0], sizes = [16, 8], strides = [1, 1]} : vector<16x32xf32> to vector<16x8xf32>
    %cst_111 = arith.constant dense<0.000000e+00> : vector<8x8xf32>
    %303 = tpu.matmul %301, %302, %cst_111 {dimension_numbers = #tpu.dot_dimension_numbers<[1], [0], [0], [1], [0, 0, 1, 1], [], []>} : vector<8x16xf32>, vector<16x8xf32>, vector<8x8xf32> -> vector<8x8xf32>
    %c0_112 = arith.constant 0 : index
    %c0_113 = arith.constant 0 : index
    %304 = vector.load %arg18[%c0_112, %c0_113] : memref<8x32xf32, #tpu.memory_space<vmem>>, vector<8x8xf32>
    tpu.vector_store %arg18[%c0_112, %c0_113], %303 {strides = array<i32>} : memref<8x32xf32, #tpu.memory_space<vmem>>, vector<8x8xf32>,
    %305 = vector.extract_strided_slice %283 {offsets = [0, 8], sizes = [8, 8], strides = [1, 1]} : vector<8x32xf32> to vector<8x8xf32>
    %306 = vector.extract_strided_slice %284 {offsets = [0, 8], sizes = [16, 8], strides = [1, 1]} : vector<16x32xf32> to vector<16x8xf32>
    %cst_114 = arith.constant dense<0.000000e+00> : vector<8x16xf32>
    %307 = tpu.matmul %305, %306, %cst_114 {dimension_numbers = #tpu.dot_dimension_numbers<[1], [1], [0], [0], [0, 0, 1, 0], [], []>} : vector<8x8xf32>, vector<16x8xf32>, vector<8x16xf32> -> vector<8x16xf32>
    %cst_115 = arith.constant 0.353553385 : f32
    %308 = vector.broadcast %cst_115 : f32 to vector<8x16xf32>
    %309 = arith.mulf %307, %308 : vector<8x16xf32>
    %310 = arith.addf %309, %282 : vector<8x16xf32>
    %cst_116 = arith.constant dense<0xFF800000> : vector<8xf32>
    %311 = vector.multi_reduction <maximumf>, %310, %cst_116 [1] : vector<8x16xf32> to vector<8xf32>
    %312 = vector.shape_cast %311 : vector<8xf32> to vector<8x1xf32>
    %313 = vector.broadcast %312 : vector<8x1xf32> to vector<8x16xf32>
    %314 = arith.subf %310, %313 : vector<8x16xf32>
    %315 = math.exp %314 : vector<8x16xf32>
    %cst_117 = arith.constant dense<0.000000e+00> : vector<8xf32>
    %316 = vector.multi_reduction <add>, %315, %cst_117 [1] : vector<8x16xf32> to vector<8xf32>
    %317 = vector.shape_cast %316 : vector<8xf32> to vector<8x1xf32>
    %318 = tpu.reciprocal %317 {approx = true} : vector<8x1xf32> -> vector<8x1xf32>
    %319 = vector.broadcast %318 : vector<8x1xf32> to vector<8x16xf32>
    %320 = arith.mulf %315, %319 : vector<8x16xf32>
    %321 = vector.extract_strided_slice %285 {offsets = [0, 8], sizes = [16, 8], strides = [1, 1]} : vector<16x32xf32> to vector<16x8xf32>
    %cst_118 = arith.constant dense<0.000000e+00> : vector<8x8xf32>
    %322 = tpu.matmul %320, %321, %cst_118 {dimension_numbers = #tpu.dot_dimension_numbers<[1], [0], [0], [1], [0, 0, 1, 1], [], []>} : vector<8x16xf32>, vector<16x8xf32>, vector<8x8xf32> -> vector<8x8xf32>
    %c0_119 = arith.constant 0 : index
    %c8_120 = arith.constant 8 : index
    %323 = vector.load %arg18[%c0_119, %c8_120] : memref<8x32xf32, #tpu.memory_space<vmem>>, vector<8x8xf32>
    tpu.vector_store %arg18[%c0_119, %c8_120], %322 {strides = array<i32>} : memref<8x32xf32, #tpu.memory_space<vmem>>, vector<8x8xf32>,
    %324 = vector.extract_strided_slice %283 {offsets = [0, 16], sizes = [8, 8], strides = [1, 1]} : vector<8x32xf32> to vector<8x8xf32>
    %325 = vector.extract_strided_slice %284 {offsets = [0, 16], sizes = [16, 8], strides = [1, 1]} : vector<16x32xf32> to vector<16x8xf32>
    %cst_121 = arith.constant dense<0.000000e+00> : vector<8x16xf32>
    %326 = tpu.matmul %324, %325, %cst_121 {dimension_numbers = #tpu.dot_dimension_numbers<[1], [1], [0], [0], [0, 0, 1, 0], [], []>} : vector<8x8xf32>, vector<16x8xf32>, vector<8x16xf32> -> vector<8x16xf32>
    %cst_122 = arith.constant 0.353553385 : f32
    %327 = vector.broadcast %cst_122 : f32 to vector<8x16xf32>
    %328 = arith.mulf %326, %327 : vector<8x16xf32>
    %329 = arith.addf %328, %282 : vector<8x16xf32>
    %cst_123 = arith.constant dense<0xFF800000> : vector<8xf32>
    %330 = vector.multi_reduction <maximumf>, %329, %cst_123 [1] : vector<8x16xf32> to vector<8xf32>
    %331 = vector.shape_cast %330 : vector<8xf32> to vector<8x1xf32>
    %332 = vector.broadcast %331 : vector<8x1xf32> to vector<8x16xf32>
    %333 = arith.subf %329, %332 : vector<8x16xf32>
    %334 = math.exp %333 : vector<8x16xf32>
    %cst_124 = arith.constant dense<0.000000e+00> : vector<8xf32>
    %335 = vector.multi_reduction <add>, %334, %cst_124 [1] : vector<8x16xf32> to vector<8xf32>
    %336 = vector.shape_cast %335 : vector<8xf32> to vector<8x1xf32>
    %337 = tpu.reciprocal %336 {approx = true} : vector<8x1xf32> -> vector<8x1xf32>
    %338 = vector.broadcast %337 : vector<8x1xf32> to vector<8x16xf32>
    %339 = arith.mulf %334, %338 : vector<8x16xf32>
    %340 = vector.extract_strided_slice %285 {offsets = [0, 16], sizes = [16, 8], strides = [1, 1]} : vector<16x32xf32> to vector<16x8xf32>
    %cst_125 = arith.constant dense<0.000000e+00> : vector<8x8xf32>
    %341 = tpu.matmul %339, %340, %cst_125 {dimension_numbers = #tpu.dot_dimension_numbers<[1], [0], [0], [1], [0, 0, 1, 1], [], []>} : vector<8x16xf32>, vector<16x8xf32>, vector<8x8xf32> -> vector<8x8xf32>
    %c0_126 = arith.constant 0 : index
    %c16_127 = arith.constant 16 : index
    %342 = vector.load %arg18[%c0_126, %c16_127] : memref<8x32xf32, #tpu.memory_space<vmem>>, vector<8x8xf32>
    tpu.vector_store %arg18[%c0_126, %c16_127], %341 {strides = array<i32>} : memref<8x32xf32, #tpu.memory_space<vmem>>, vector<8x8xf32>,
    %343 = vector.extract_strided_slice %283 {offsets = [0, 24], sizes = [8, 8], strides = [1, 1]} : vector<8x32xf32> to vector<8x8xf32>
    %344 = vector.extract_strided_slice %284 {offsets = [0, 24], sizes = [16, 8], strides = [1, 1]} : vector<16x32xf32> to vector<16x8xf32>
    %cst_128 = arith.constant dense<0.000000e+00> : vector<8x16xf32>
    %345 = tpu.matmul %343, %344, %cst_128 {dimension_numbers = #tpu.dot_dimension_numbers<[1], [1], [0], [0], [0, 0, 1, 0], [], []>} : vector<8x8xf32>, vector<16x8xf32>, vector<8x16xf32> -> vector<8x16xf32>
    %cst_129 = arith.constant 0.353553385 : f32
    %346 = vector.broadcast %cst_129 : f32 to vector<8x16xf32>
    %347 = arith.mulf %345, %346 : vector<8x16xf32>
    %348 = arith.addf %347, %282 : vector<8x16xf32>
    %cst_130 = arith.constant dense<0xFF800000> : vector<8xf32>
    %349 = vector.multi_reduction <maximumf>, %348, %cst_130 [1] : vector<8x16xf32> to vector<8xf32>
    %350 = vector.shape_cast %349 : vector<8xf32> to vector<8x1xf32>
    %351 = vector.broadcast %350 : vector<8x1xf32> to vector<8x16xf32>
    %352 = arith.subf %348, %351 : vector<8x16xf32>
    %353 = math.exp %352 : vector<8x16xf32>
    %cst_131 = arith.constant dense<0.000000e+00> : vector<8xf32>
    %354 = vector.multi_reduction <add>, %353, %cst_131 [1] : vector<8x16xf32> to vector<8xf32>
    %355 = vector.shape_cast %354 : vector<8xf32> to vector<8x1xf32>
    %356 = tpu.reciprocal %355 {approx = true} : vector<8x1xf32> -> vector<8x1xf32>
    %357 = vector.broadcast %356 : vector<8x1xf32> to vector<8x16xf32>
    %358 = arith.mulf %353, %357 : vector<8x16xf32>
    %359 = vector.extract_strided_slice %285 {offsets = [0, 24], sizes = [16, 8], strides = [1, 1]} : vector<16x32xf32> to vector<16x8xf32>
    %cst_132 = arith.constant dense<0.000000e+00> : vector<8x8xf32>
    %360 = tpu.matmul %358, %359, %cst_132 {dimension_numbers = #tpu.dot_dimension_numbers<[1], [0], [0], [1], [0, 0, 1, 1], [], []>} : vector<8x16xf32>, vector<16x8xf32>, vector<8x8xf32> -> vector<8x8xf32>
    %c0_133 = arith.constant 0 : index
    %c24_134 = arith.constant 24 : index
    %361 = vector.load %arg18[%c0_133, %c24_134] : memref<8x32xf32, #tpu.memory_space<vmem>>, vector<8x8xf32>
    tpu.vector_store %arg18[%c0_133, %c24_134], %360 {strides = array<i32>} : memref<8x32xf32, #tpu.memory_space<vmem>>, vector<8x8xf32>,
    %c0_135 = arith.constant 0 : index
    %c0_136 = arith.constant 0 : index
    %362 = vector.load %arg18[%c0_135, %c0_136] : memref<8x32xf32, #tpu.memory_space<vmem>>, vector<8x32xf32>
    %c0_137 = arith.constant 0 : index
    %c0_138 = arith.constant 0 : index
    %c0_139 = arith.constant 0 : index
    %363 = vector.load %arg12[%c0_137, %c0_138, %c0_139] : memref<1x32x32xf32, #tpu.memory_space<vmem>>, vector<1x32x32xf32>
    %364 = vector.shape_cast %363 : vector<1x32x32xf32> to vector<32x32xf32>
    %cst_140 = arith.constant dense<0.000000e+00> : vector<8x32xf32>
    %365 = tpu.matmul %362, %364, %cst_140 {dimension_numbers = #tpu.dot_dimension_numbers<[1], [0], [0], [1], [0, 0, 1, 1], [], []>} : vector<8x32xf32>, vector<32x32xf32>, vector<8x32xf32> -> vector<8x32xf32>
    %366 = vector.extract_strided_slice %242 {offsets = [0, 0], sizes = [8, 32], strides = [1, 1]} : vector<16x32xf32> to vector<8x32xf32>
    %367 = arith.addf %366, %365 : vector<8x32xf32>
    %368 = vector.broadcast %15 : vector<1x32xf32> to vector<8x32xf32>
    %369 = arith.addf %367, %368 : vector<8x32xf32>
    %c0_141 = arith.constant 0 : index
    %c0_142 = arith.constant 0 : index
    %370 = vector.load %arg17[%c0_141, %c0_142] : memref<16x32xf32, #tpu.memory_space<vmem>>, vector<8x32xf32>
    tpu.vector_store %arg17[%c0_141, %c0_142], %369 {strides = array<i32>} : memref<16x32xf32, #tpu.memory_space<vmem>>, vector<8x32xf32>,
    %c1_143 = arith.constant 1 : index
    %371 = memref.load %arg2[%c1_143] : memref<2xi32, #tpu.memory_space<smem>>
    %372 = tpu.iota {dimensions = array<i32: 1>} : vector<8x16xi32>
    %373 = vector.broadcast %371 : i32 to vector<8x16xi32>
    %374 = arith.cmpi slt, %372, %373 : vector<8x16xi32>
    %cst_144 = arith.constant 0.000000e+00 : f32
    %cst_145 = arith.constant -1.000000e+09 : f32
    %375 = vector.broadcast %cst_144 : f32 to vector<8x16xf32>
    %376 = vector.broadcast %cst_145 : f32 to vector<8x16xf32>
    %377 = arith.select %374, %375, %376 : vector<8x16xi1>, vector<8x16xf32>
    %378 = vector.extract_strided_slice %269 {offsets = [8, 0], sizes = [8, 32], strides = [1, 1]} : vector<16x32xf32> to vector<8x32xf32>
    %379 = vector.extract_strided_slice %275 {offsets = [16, 0], sizes = [16, 32], strides = [1, 1]} : vector<32x64xf32> to vector<16x32xf32>
    %380 = vector.extract_strided_slice %275 {offsets = [16, 32], sizes = [16, 32], strides = [1, 1]} : vector<32x64xf32> to vector<16x32xf32>
    %381 = vector.extract_strided_slice %378 {offsets = [0, 0], sizes = [8, 8], strides = [1, 1]} : vector<8x32xf32> to vector<8x8xf32>
    %382 = vector.extract_strided_slice %379 {offsets = [0, 0], sizes = [16, 8], strides = [1, 1]} : vector<16x32xf32> to vector<16x8xf32>
    %cst_146 = arith.constant dense<0.000000e+00> : vector<8x16xf32>
    %383 = tpu.matmul %381, %382, %cst_146 {dimension_numbers = #tpu.dot_dimension_numbers<[1], [1], [0], [0], [0, 0, 1, 0], [], []>} : vector<8x8xf32>, vector<16x8xf32>, vector<8x16xf32> -> vector<8x16xf32>
    %cst_147 = arith.constant 0.353553385 : f32
    %384 = vector.broadcast %cst_147 : f32 to vector<8x16xf32>
    %385 = arith.mulf %383, %384 : vector<8x16xf32>
    %386 = arith.addf %385, %377 : vector<8x16xf32>
    %cst_148 = arith.constant dense<0xFF800000> : vector<8xf32>
    %387 = vector.multi_reduction <maximumf>, %386, %cst_148 [1] : vector<8x16xf32> to vector<8xf32>
    %388 = vector.shape_cast %387 : vector<8xf32> to vector<8x1xf32>
    %389 = vector.broadcast %388 : vector<8x1xf32> to vector<8x16xf32>
    %390 = arith.subf %386, %389 : vector<8x16xf32>
    %391 = math.exp %390 : vector<8x16xf32>
    %cst_149 = arith.constant dense<0.000000e+00> : vector<8xf32>
    %392 = vector.multi_reduction <add>, %391, %cst_149 [1] : vector<8x16xf32> to vector<8xf32>
    %393 = vector.shape_cast %392 : vector<8xf32> to vector<8x1xf32>
    %394 = tpu.reciprocal %393 {approx = true} : vector<8x1xf32> -> vector<8x1xf32>
    %395 = vector.broadcast %394 : vector<8x1xf32> to vector<8x16xf32>
    %396 = arith.mulf %391, %395 : vector<8x16xf32>
    %397 = vector.extract_strided_slice %380 {offsets = [0, 0], sizes = [16, 8], strides = [1, 1]} : vector<16x32xf32> to vector<16x8xf32>
    %cst_150 = arith.constant dense<0.000000e+00> : vector<8x8xf32>
    %398 = tpu.matmul %396, %397, %cst_150 {dimension_numbers = #tpu.dot_dimension_numbers<[1], [0], [0], [1], [0, 0, 1, 1], [], []>} : vector<8x16xf32>, vector<16x8xf32>, vector<8x8xf32> -> vector<8x8xf32>
    %c0_151 = arith.constant 0 : index
    %c0_152 = arith.constant 0 : index
    %399 = vector.load %arg18[%c0_151, %c0_152] : memref<8x32xf32, #tpu.memory_space<vmem>>, vector<8x8xf32>
    tpu.vector_store %arg18[%c0_151, %c0_152], %398 {strides = array<i32>} : memref<8x32xf32, #tpu.memory_space<vmem>>, vector<8x8xf32>,
    %400 = vector.extract_strided_slice %378 {offsets = [0, 8], sizes = [8, 8], strides = [1, 1]} : vector<8x32xf32> to vector<8x8xf32>
    %401 = vector.extract_strided_slice %379 {offsets = [0, 8], sizes = [16, 8], strides = [1, 1]} : vector<16x32xf32> to vector<16x8xf32>
    %cst_153 = arith.constant dense<0.000000e+00> : vector<8x16xf32>
    %402 = tpu.matmul %400, %401, %cst_153 {dimension_numbers = #tpu.dot_dimension_numbers<[1], [1], [0], [0], [0, 0, 1, 0], [], []>} : vector<8x8xf32>, vector<16x8xf32>, vector<8x16xf32> -> vector<8x16xf32>
    %cst_154 = arith.constant 0.353553385 : f32
    %403 = vector.broadcast %cst_154 : f32 to vector<8x16xf32>
    %404 = arith.mulf %402, %403 : vector<8x16xf32>
    %405 = arith.addf %404, %377 : vector<8x16xf32>
    %cst_155 = arith.constant dense<0xFF800000> : vector<8xf32>
    %406 = vector.multi_reduction <maximumf>, %405, %cst_155 [1] : vector<8x16xf32> to vector<8xf32>
    %407 = vector.shape_cast %406 : vector<8xf32> to vector<8x1xf32>
    %408 = vector.broadcast %407 : vector<8x1xf32> to vector<8x16xf32>
    %409 = arith.subf %405, %408 : vector<8x16xf32>
    %410 = math.exp %409 : vector<8x16xf32>
    %cst_156 = arith.constant dense<0.000000e+00> : vector<8xf32>
    %411 = vector.multi_reduction <add>, %410, %cst_156 [1] : vector<8x16xf32> to vector<8xf32>
    %412 = vector.shape_cast %411 : vector<8xf32> to vector<8x1xf32>
    %413 = tpu.reciprocal %412 {approx = true} : vector<8x1xf32> -> vector<8x1xf32>
    %414 = vector.broadcast %413 : vector<8x1xf32> to vector<8x16xf32>
    %415 = arith.mulf %410, %414 : vector<8x16xf32>
    %416 = vector.extract_strided_slice %380 {offsets = [0, 8], sizes = [16, 8], strides = [1, 1]} : vector<16x32xf32> to vector<16x8xf32>
    %cst_157 = arith.constant dense<0.000000e+00> : vector<8x8xf32>
    %417 = tpu.matmul %415, %416, %cst_157 {dimension_numbers = #tpu.dot_dimension_numbers<[1], [0], [0], [1], [0, 0, 1, 1], [], []>} : vector<8x16xf32>, vector<16x8xf32>, vector<8x8xf32> -> vector<8x8xf32>
    %c0_158 = arith.constant 0 : index
    %c8_159 = arith.constant 8 : index
    %418 = vector.load %arg18[%c0_158, %c8_159] : memref<8x32xf32, #tpu.memory_space<vmem>>, vector<8x8xf32>
    tpu.vector_store %arg18[%c0_158, %c8_159], %417 {strides = array<i32>} : memref<8x32xf32, #tpu.memory_space<vmem>>, vector<8x8xf32>,
    %419 = vector.extract_strided_slice %378 {offsets = [0, 16], sizes = [8, 8], strides = [1, 1]} : vector<8x32xf32> to vector<8x8xf32>
    %420 = vector.extract_strided_slice %379 {offsets = [0, 16], sizes = [16, 8], strides = [1, 1]} : vector<16x32xf32> to vector<16x8xf32>
    %cst_160 = arith.constant dense<0.000000e+00> : vector<8x16xf32>
    %421 = tpu.matmul %419, %420, %cst_160 {dimension_numbers = #tpu.dot_dimension_numbers<[1], [1], [0], [0], [0, 0, 1, 0], [], []>} : vector<8x8xf32>, vector<16x8xf32>, vector<8x16xf32> -> vector<8x16xf32>
    %cst_161 = arith.constant 0.353553385 : f32
    %422 = vector.broadcast %cst_161 : f32 to vector<8x16xf32>
    %423 = arith.mulf %421, %422 : vector<8x16xf32>
    %424 = arith.addf %423, %377 : vector<8x16xf32>
    %cst_162 = arith.constant dense<0xFF800000> : vector<8xf32>
    %425 = vector.multi_reduction <maximumf>, %424, %cst_162 [1] : vector<8x16xf32> to vector<8xf32>
    %426 = vector.shape_cast %425 : vector<8xf32> to vector<8x1xf32>
    %427 = vector.broadcast %426 : vector<8x1xf32> to vector<8x16xf32>
    %428 = arith.subf %424, %427 : vector<8x16xf32>
    %429 = math.exp %428 : vector<8x16xf32>
    %cst_163 = arith.constant dense<0.000000e+00> : vector<8xf32>
    %430 = vector.multi_reduction <add>, %429, %cst_163 [1] : vector<8x16xf32> to vector<8xf32>
    %431 = vector.shape_cast %430 : vector<8xf32> to vector<8x1xf32>
    %432 = tpu.reciprocal %431 {approx = true} : vector<8x1xf32> -> vector<8x1xf32>
    %433 = vector.broadcast %432 : vector<8x1xf32> to vector<8x16xf32>
    %434 = arith.mulf %429, %433 : vector<8x16xf32>
    %435 = vector.extract_strided_slice %380 {offsets = [0, 16], sizes = [16, 8], strides = [1, 1]} : vector<16x32xf32> to vector<16x8xf32>
    %cst_164 = arith.constant dense<0.000000e+00> : vector<8x8xf32>
    %436 = tpu.matmul %434, %435, %cst_164 {dimension_numbers = #tpu.dot_dimension_numbers<[1], [0], [0], [1], [0, 0, 1, 1], [], []>} : vector<8x16xf32>, vector<16x8xf32>, vector<8x8xf32> -> vector<8x8xf32>
    %c0_165 = arith.constant 0 : index
    %c16_166 = arith.constant 16 : index
    %437 = vector.load %arg18[%c0_165, %c16_166] : memref<8x32xf32, #tpu.memory_space<vmem>>, vector<8x8xf32>
    tpu.vector_store %arg18[%c0_165, %c16_166], %436 {strides = array<i32>} : memref<8x32xf32, #tpu.memory_space<vmem>>, vector<8x8xf32>,
    %438 = vector.extract_strided_slice %378 {offsets = [0, 24], sizes = [8, 8], strides = [1, 1]} : vector<8x32xf32> to vector<8x8xf32>
    %439 = vector.extract_strided_slice %379 {offsets = [0, 24], sizes = [16, 8], strides = [1, 1]} : vector<16x32xf32> to vector<16x8xf32>
    %cst_167 = arith.constant dense<0.000000e+00> : vector<8x16xf32>
    %440 = tpu.matmul %438, %439, %cst_167 {dimension_numbers = #tpu.dot_dimension_numbers<[1], [1], [0], [0], [0, 0, 1, 0], [], []>} : vector<8x8xf32>, vector<16x8xf32>, vector<8x16xf32> -> vector<8x16xf32>
    %cst_168 = arith.constant 0.353553385 : f32
    %441 = vector.broadcast %cst_168 : f32 to vector<8x16xf32>
    %442 = arith.mulf %440, %441 : vector<8x16xf32>
    %443 = arith.addf %442, %377 : vector<8x16xf32>
    %cst_169 = arith.constant dense<0xFF800000> : vector<8xf32>
    %444 = vector.multi_reduction <maximumf>, %443, %cst_169 [1] : vector<8x16xf32> to vector<8xf32>
    %445 = vector.shape_cast %444 : vector<8xf32> to vector<8x1xf32>
    %446 = vector.broadcast %445 : vector<8x1xf32> to vector<8x16xf32>
    %447 = arith.subf %443, %446 : vector<8x16xf32>
    %448 = math.exp %447 : vector<8x16xf32>
    %cst_170 = arith.constant dense<0.000000e+00> : vector<8xf32>
    %449 = vector.multi_reduction <add>, %448, %cst_170 [1] : vector<8x16xf32> to vector<8xf32>
    %450 = vector.shape_cast %449 : vector<8xf32> to vector<8x1xf32>
    %451 = tpu.reciprocal %450 {approx = true} : vector<8x1xf32> -> vector<8x1xf32>
    %452 = vector.broadcast %451 : vector<8x1xf32> to vector<8x16xf32>
    %453 = arith.mulf %448, %452 : vector<8x16xf32>
    %454 = vector.extract_strided_slice %380 {offsets = [0, 24], sizes = [16, 8], strides = [1, 1]} : vector<16x32xf32> to vector<16x8xf32>
    %cst_171 = arith.constant dense<0.000000e+00> : vector<8x8xf32>
    %455 = tpu.matmul %453, %454, %cst_171 {dimension_numbers = #tpu.dot_dimension_numbers<[1], [0], [0], [1], [0, 0, 1, 1], [], []>} : vector<8x16xf32>, vector<16x8xf32>, vector<8x8xf32> -> vector<8x8xf32>
    %c0_172 = arith.constant 0 : index
    %c24_173 = arith.constant 24 : index
    %456 = vector.load %arg18[%c0_172, %c24_173] : memref<8x32xf32, #tpu.memory_space<vmem>>, vector<8x8xf32>
    tpu.vector_store %arg18[%c0_172, %c24_173], %455 {strides = array<i32>} : memref<8x32xf32, #tpu.memory_space<vmem>>, vector<8x8xf32>,
    %c0_174 = arith.constant 0 : index
    %c0_175 = arith.constant 0 : index
    %457 = vector.load %arg18[%c0_174, %c0_175] : memref<8x32xf32, #tpu.memory_space<vmem>>, vector<8x32xf32>
    %c0_176 = arith.constant 0 : index
    %c0_177 = arith.constant 0 : index
    %c0_178 = arith.constant 0 : index
    %458 = vector.load %arg12[%c0_176, %c0_177, %c0_178] : memref<1x32x32xf32, #tpu.memory_space<vmem>>, vector<1x32x32xf32>
    %459 = vector.shape_cast %458 : vector<1x32x32xf32> to vector<32x32xf32>
    %cst_179 = arith.constant dense<0.000000e+00> : vector<8x32xf32>
    %460 = tpu.matmul %457, %459, %cst_179 {dimension_numbers = #tpu.dot_dimension_numbers<[1], [0], [0], [1], [0, 0, 1, 1], [], []>} : vector<8x32xf32>, vector<32x32xf32>, vector<8x32xf32> -> vector<8x32xf32>
    %461 = vector.extract_strided_slice %242 {offsets = [8, 0], sizes = [8, 32], strides = [1, 1]} : vector<16x32xf32> to vector<8x32xf32>
    %462 = arith.addf %461, %460 : vector<8x32xf32>
    %463 = vector.broadcast %15 : vector<1x32xf32> to vector<8x32xf32>
    %464 = arith.addf %462, %463 : vector<8x32xf32>
    %c8_180 = arith.constant 8 : index
    %c0_181 = arith.constant 0 : index
    %465 = vector.load %arg17[%c8_180, %c0_181] : memref<16x32xf32, #tpu.memory_space<vmem>>, vector<8x32xf32>
    tpu.vector_store %arg17[%c8_180, %c0_181], %464 {strides = array<i32>} : memref<16x32xf32, #tpu.memory_space<vmem>>, vector<8x32xf32>,
    %c0_182 = arith.constant 0 : index
    %c0_183 = arith.constant 0 : index
    %466 = vector.load %arg17[%c0_182, %c0_183] : memref<16x32xf32, #tpu.memory_space<vmem>>, vector<16x32xf32>
    %cst_184 = arith.constant dense<0.000000e+00> : vector<16xf32>
    %467 = vector.multi_reduction <add>, %466, %cst_184 [1] : vector<16x32xf32> to vector<16xf32>
    %468 = vector.shape_cast %467 : vector<16xf32> to vector<16x1xf32>
    %cst_185 = arith.constant 3.200000e+01 : f32
    %469 = vector.broadcast %cst_185 : f32 to vector<16x1xf32>
    %470 = arith.divf %468, %469 : vector<16x1xf32>
    %471 = vector.broadcast %470 : vector<16x1xf32> to vector<16x32xf32>
    %472 = arith.subf %466, %471 : vector<16x32xf32>
    %473 = arith.mulf %472, %472 : vector<16x32xf32>
    %cst_186 = arith.constant dense<0.000000e+00> : vector<16xf32>
    %474 = vector.multi_reduction <add>, %473, %cst_186 [1] : vector<16x32xf32> to vector<16xf32>
    %475 = vector.shape_cast %474 : vector<16xf32> to vector<16x1xf32>
    %cst_187 = arith.constant 3.200000e+01 : f32
    %476 = vector.broadcast %cst_187 : f32 to vector<16x1xf32>
    %477 = arith.divf %475, %476 : vector<16x1xf32>
    %478 = vector.broadcast %470 : vector<16x1xf32> to vector<16x32xf32>
    %479 = arith.subf %466, %478 : vector<16x32xf32>
    %cst_188 = arith.constant 9.99999996E-13 : f32
    %480 = vector.broadcast %cst_188 : f32 to vector<16x1xf32>
    %481 = arith.addf %477, %480 : vector<16x1xf32>
    %482 = math.rsqrt %481 : vector<16x1xf32>
    %483 = vector.broadcast %482 : vector<16x1xf32> to vector<16x32xf32>
    %484 = arith.mulf %479, %483 : vector<16x32xf32>
    %485 = vector.broadcast %9 : vector<1x32xf32> to vector<16x32xf32>
    %486 = arith.mulf %484, %485 : vector<16x32xf32>
    %487 = vector.broadcast %10 : vector<1x32xf32> to vector<16x32xf32>
    %488 = arith.addf %486, %487 : vector<16x32xf32>
    %c0_189 = arith.constant 0 : index
    %c0_190 = arith.constant 0 : index
    %c0_191 = arith.constant 0 : index
    %489 = vector.load %arg13[%c0_189, %c0_190, %c0_191] : memref<1x32x64xf32, #tpu.memory_space<vmem>>, vector<1x32x64xf32>
    %490 = vector.shape_cast %489 : vector<1x32x64xf32> to vector<32x64xf32>
    %c0_192 = arith.constant 0 : index
    %c0_193 = arith.constant 0 : index
    %c0_194 = arith.constant 0 : index
    %491 = vector.load %arg14[%c0_192, %c0_193, %c0_194] : memref<1x64x32xf32, #tpu.memory_space<vmem>>, vector<1x64x32xf32>
    %492 = vector.shape_cast %491 : vector<1x64x32xf32> to vector<64x32xf32>
    %cst_195 = arith.constant dense<0.000000e+00> : vector<16x64xf32>
    %493 = tpu.matmul %488, %490, %cst_195 {dimension_numbers = #tpu.dot_dimension_numbers<[1], [0], [0], [1], [0, 0, 1, 1], [], []>} : vector<16x32xf32>, vector<32x64xf32>, vector<16x64xf32> -> vector<16x64xf32>
    %494 = vector.broadcast %16 : vector<1x64xf32> to vector<16x64xf32>
    %495 = arith.addf %493, %494 : vector<16x64xf32>
    %cst_196 = arith.constant 0.000000e+00 : f32
    %496 = vector.broadcast %cst_196 : f32 to vector<16x64xf32>
    %497 = arith.maximumf %495, %496 : vector<16x64xf32>
    %cst_197 = arith.constant dense<0.000000e+00> : vector<16x32xf32>
    %498 = tpu.matmul %497, %492, %cst_197 {dimension_numbers = #tpu.dot_dimension_numbers<[1], [0], [0], [1], [0, 0, 1, 1], [], []>} : vector<16x64xf32>, vector<64x32xf32>, vector<16x32xf32> -> vector<16x32xf32>
    %499 = vector.broadcast %17 : vector<1x32xf32> to vector<16x32xf32>
    %500 = arith.addf %498, %499 : vector<16x32xf32>
    %501 = arith.addf %466, %500 : vector<16x32xf32>
    %c0_198 = arith.constant 0 : index
    %c0_199 = arith.constant 0 : index
    %502 = vector.load %arg17[%c0_198, %c0_199] : memref<16x32xf32, #tpu.memory_space<vmem>>, vector<16x32xf32>
    tpu.vector_store %arg17[%c0_198, %c0_199], %501 {strides = array<i32>} : memref<16x32xf32, #tpu.memory_space<vmem>>, vector<16x32xf32>,
    %c1_i32 = arith.constant 1 : i32
    %503 = arith.cmpi eq, %arg0, %c1_i32 : i32
    %504 = arith.extui %503 : i1 to i32
    %c0_i32_200 = arith.constant 0 : i32
    %505 = arith.cmpi ne, %504, %c0_i32_200 : i32
    scf.if %505 {
      %c0_201 = arith.constant 0 : index
      %c0_202 = arith.constant 0 : index
      %506 = vector.load %arg17[%c0_201, %c0_202] : memref<16x32xf32, #tpu.memory_space<vmem>>, vector<16x32xf32>
      %c0_203 = arith.constant 0 : index
      %c0_204 = arith.constant 0 : index
      %507 = vector.load %arg6[%c0_203, %c0_204] : memref<3x32xf32, #tpu.memory_space<vmem>>, vector<1x32xf32>
      %c1_205 = arith.constant 1 : index
      %c0_206 = arith.constant 0 : index
      %508 = vector.load %arg6[%c1_205, %c0_206] : memref<3x32xf32, #tpu.memory_space<vmem>>, vector<1x32xf32>
      %cst_207 = arith.constant dense<0.000000e+00> : vector<16xf32>
      %509 = vector.multi_reduction <add>, %506, %cst_207 [1] : vector<16x32xf32> to vector<16xf32>
      %510 = vector.shape_cast %509 : vector<16xf32> to vector<16x1xf32>
      %cst_208 = arith.constant 3.200000e+01 : f32
      %511 = vector.broadcast %cst_208 : f32 to vector<16x1xf32>
      %512 = arith.divf %510, %511 : vector<16x1xf32>
      %513 = vector.broadcast %512 : vector<16x1xf32> to vector<16x32xf32>
      %514 = arith.subf %506, %513 : vector<16x32xf32>
      %515 = arith.mulf %514, %514 : vector<16x32xf32>
      %cst_209 = arith.constant dense<0.000000e+00> : vector<16xf32>
      %516 = vector.multi_reduction <add>, %515, %cst_209 [1] : vector<16x32xf32> to vector<16xf32>
      %517 = vector.shape_cast %516 : vector<16xf32> to vector<16x1xf32>
      %cst_210 = arith.constant 3.200000e+01 : f32
      %518 = vector.broadcast %cst_210 : f32 to vector<16x1xf32>
      %519 = arith.divf %517, %518 : vector<16x1xf32>
      %520 = vector.broadcast %512 : vector<16x1xf32> to vector<16x32xf32>
      %521 = arith.subf %506, %520 : vector<16x32xf32>
      %cst_211 = arith.constant 9.99999996E-13 : f32
      %522 = vector.broadcast %cst_211 : f32 to vector<16x1xf32>
      %523 = arith.addf %519, %522 : vector<16x1xf32>
      %524 = math.rsqrt %523 : vector<16x1xf32>
      %525 = vector.broadcast %524 : vector<16x1xf32> to vector<16x32xf32>
      %526 = arith.mulf %521, %525 : vector<16x32xf32>
      %527 = vector.broadcast %507 : vector<1x32xf32> to vector<16x32xf32>
      %528 = arith.mulf %526, %527 : vector<16x32xf32>
      %529 = vector.broadcast %508 : vector<1x32xf32> to vector<16x32xf32>
      %530 = arith.addf %528, %529 : vector<16x32xf32>
      %c0_212 = arith.constant 0 : index
      %c0_213 = arith.constant 0 : index
      %531 = vector.load %arg7[%c0_212, %c0_213] : memref<32x16xf32, #tpu.memory_space<vmem>>, vector<32x16xf32>
      %cst_214 = arith.constant dense<0.000000e+00> : vector<16x16xf32>
      %532 = tpu.matmul %530, %531, %cst_214 {dimension_numbers = #tpu.dot_dimension_numbers<[1], [0], [0], [1], [0, 0, 1, 1], [], []>} : vector<16x32xf32>, vector<32x16xf32>, vector<16x16xf32> -> vector<16x16xf32>
      %c2 = arith.constant 2 : index
      %c0_215 = arith.constant 0 : index
      %533 = vector.load %arg6[%c2, %c0_215] : memref<3x32xf32, #tpu.memory_space<vmem>>, vector<1x16xf32>
      %534 = vector.broadcast %533 : vector<1x16xf32> to vector<16x16xf32>
      %535 = arith.addf %532, %534 : vector<16x16xf32>
      %cst_216 = arith.constant dense<0xFF800000> : vector<16xf32>
      %536 = vector.multi_reduction <maximumf>, %535, %cst_216 [1] : vector<16x16xf32> to vector<16xf32>
      %537 = vector.shape_cast %536 : vector<16xf32> to vector<16x1xf32>
      %538 = vector.broadcast %537 : vector<16x1xf32> to vector<16x16xf32>
      %539 = arith.subf %535, %538 : vector<16x16xf32>
      %540 = math.exp %539 : vector<16x16xf32>
      %cst_217 = arith.constant dense<0.000000e+00> : vector<16xf32>
      %541 = vector.multi_reduction <add>, %540, %cst_217 [1] : vector<16x16xf32> to vector<16xf32>
      %542 = vector.shape_cast %541 : vector<16xf32> to vector<16x1xf32>
      %543 = math.log %542 : vector<16x1xf32>
      %544 = arith.addf %537, %543 : vector<16x1xf32>
      %545 = vector.broadcast %544 : vector<16x1xf32> to vector<16x16xf32>
      %546 = arith.subf %535, %545 : vector<16x16xf32>
      %c0_218 = arith.constant 0 : index
      %c0_219 = arith.constant 0 : index
      %547 = vector.load %arg5[%c0_218, %c0_219] : memref<16x1xi32, #tpu.memory_space<vmem>>, vector<16x1xi32>
      %548 = tpu.iota {dimensions = array<i32: 1>} : vector<16x16xi32>
      %549 = vector.broadcast %547 : vector<16x1xi32> to vector<16x16xi32>
      %550 = arith.cmpi eq, %548, %549 : vector<16x16xi32>
      %551 = arith.extui %550 : vector<16x16xi1> to vector<16x16xi32>
      %552 = arith.sitofp %551 : vector<16x16xi32> to vector<16x16xf32>
      %cst_220 = arith.constant 0.899999976 : f32
      %553 = vector.broadcast %cst_220 : f32 to vector<16x16xf32>
      %554 = arith.mulf %552, %553 : vector<16x16xf32>
      %cst_221 = arith.constant 1.000000e+00 : f32
      %555 = vector.broadcast %cst_221 : f32 to vector<16x16xf32>
      %556 = arith.subf %555, %552 : vector<16x16xf32>
      %cst_222 = arith.constant 0.00666666683 : f32
      %557 = vector.broadcast %cst_222 : f32 to vector<16x16xf32>
      %558 = arith.mulf %556, %557 : vector<16x16xf32>
      %559 = arith.addf %554, %558 : vector<16x16xf32>
      %560 = math.log %559 : vector<16x16xf32>
      %561 = arith.subf %560, %546 : vector<16x16xf32>
      %562 = arith.mulf %559, %561 : vector<16x16xf32>
      %c-1_i32 = arith.constant -1 : i32
      %563 = vector.broadcast %c-1_i32 : i32 to vector<16x1xi32>
      %564 = arith.cmpi ne, %547, %563 : vector<16x1xi32>
      %565 = arith.extui %564 : vector<16x1xi1> to vector<16x1xi32>
      %566 = arith.sitofp %565 : vector<16x1xi32> to vector<16x1xf32>
      %cst_223 = arith.constant dense<0.000000e+00> : vector<16xf32>
      %567 = vector.multi_reduction <add>, %562, %cst_223 [1] : vector<16x16xf32> to vector<16xf32>
      %568 = vector.shape_cast %567 : vector<16xf32> to vector<16x1xf32>
      %569 = arith.mulf %568, %566 : vector<16x1xf32>
      %570 = vector.shape_cast %569 : vector<16x1xf32> to vector<1x16x1xf32>
      %cst_224 = arith.constant dense<0.000000e+00> : vector<1xf32>
      %571 = vector.multi_reduction <add>, %570, %cst_224 [1, 2] : vector<1x16x1xf32> to vector<1xf32>
      %572 = vector.shape_cast %571 : vector<1xf32> to vector<1x1x1xf32>
      %573 = vector.extract %572[0, 0, 0] : f32 from vector<1x1x1xf32>
      %574 = vector.shape_cast %566 : vector<16x1xf32> to vector<1x16x1xf32>
      %cst_225 = arith.constant dense<0.000000e+00> : vector<1xf32>
      %575 = vector.multi_reduction <add>, %574, %cst_225 [1, 2] : vector<1x16x1xf32> to vector<1xf32>
      %576 = vector.shape_cast %575 : vector<1xf32> to vector<1x1x1xf32>
      %577 = vector.extract %576[0, 0, 0] : f32 from vector<1x1x1xf32>
      %cst_226 = arith.constant 1.000000e+00 : f32
      %578 = arith.maximumf %577, %cst_226 : f32
      %579 = arith.divf %573, %578 : f32
      %c0_227 = arith.constant 0 : index
      %c0_228 = arith.constant 0 : index
      %580 = memref.load %arg16[%c0_227, %c0_228] : memref<1x1xf32, #tpu.memory_space<smem>>
      memref.store %579, %arg16[%c0_227, %c0_228] : memref<1x1xf32, #tpu.memory_space<smem>>
    } else {
    }
    return
  }
  func.func @transform_0(%arg0: i32, %arg1: memref<2xi32, #tpu.memory_space<smem>>, %arg2: memref<2xi32, #tpu.memory_space<smem>>) -> (i32, i32) {
    %c0_i32 = arith.constant 0 : i32
    %c0_i32_0 = arith.constant 0 : i32
    %c0_i32_1 = arith.constant 0 : i32
    return %c0_i32, %c0_i32_0 : i32, i32
  }
  func.func @transform_1(%arg0: i32, %arg1: memref<2xi32, #tpu.memory_space<smem>>, %arg2: memref<2xi32, #tpu.memory_space<smem>>) -> (i32, i32) {
    %c0_i32 = arith.constant 0 : i32
    %c0_i32_0 = arith.constant 0 : i32
    %c0_i32_1 = arith.constant 0 : i32
    return %c0_i32, %c0_i32_0 : i32, i32
  }
  func.func @transform_2(%arg0: i32, %arg1: memref<2xi32, #tpu.memory_space<smem>>, %arg2: memref<2xi32, #tpu.memory_space<smem>>) -> (i32, i32) {
    %c0_i32 = arith.constant 0 : i32
    %c0_i32_0 = arith.constant 0 : i32
    %c0_i32_1 = arith.constant 0 : i32
    return %c0_i32, %c0_i32_0 : i32, i32
  }
  func.func @transform_3(%arg0: i32, %arg1: memref<2xi32, #tpu.memory_space<smem>>, %arg2: memref<2xi32, #tpu.memory_space<smem>>) -> (i32, i32) {
    %c0_i32 = arith.constant 0 : i32
    %c0_i32_0 = arith.constant 0 : i32
    %c0_i32_1 = arith.constant 0 : i32
    return %c0_i32, %c0_i32_0 : i32, i32
  }
  func.func @transform_4(%arg0: i32, %arg1: memref<2xi32, #tpu.memory_space<smem>>, %arg2: memref<2xi32, #tpu.memory_space<smem>>) -> (i32, i32) {
    %c0_i32 = arith.constant 0 : i32
    %c0_i32_0 = arith.constant 0 : i32
    %c0_i32_1 = arith.constant 0 : i32
    return %c0_i32, %c0_i32_0 : i32, i32
  }
  func.func @transform_5(%arg0: i32, %arg1: memref<2xi32, #tpu.memory_space<smem>>, %arg2: memref<2xi32, #tpu.memory_space<smem>>) -> (i32, i32, i32) {
    %c0_i32 = arith.constant 0 : i32
    %c0_i32_0 = arith.constant 0 : i32
    %c0_i32_1 = arith.constant 0 : i32
    return %arg0, %c0_i32, %c0_i32_0 : i32, i32, i32
  }
  func.func @transform_6(%arg0: i32, %arg1: memref<2xi32, #tpu.memory_space<smem>>, %arg2: memref<2xi32, #tpu.memory_space<smem>>) -> (i32, i32, i32) {
    %c0_i32 = arith.constant 0 : i32
    %c0_i32_0 = arith.constant 0 : i32
    %c0_i32_1 = arith.constant 0 : i32
    return %arg0, %c0_i32, %c0_i32_0 : i32, i32, i32
  }
  func.func @transform_7(%arg0: i32, %arg1: memref<2xi32, #tpu.memory_space<smem>>, %arg2: memref<2xi32, #tpu.memory_space<smem>>) -> (i32, i32, i32) {
    %c0_i32 = arith.constant 0 : i32
    %c0_i32_0 = arith.constant 0 : i32
    %c0_i32_1 = arith.constant 0 : i32
    return %arg0, %c0_i32, %c0_i32_0 : i32, i32, i32
  }
  func.func @transform_8(%arg0: i32, %arg1: memref<2xi32, #tpu.memory_space<smem>>, %arg2: memref<2xi32, #tpu.memory_space<smem>>) -> (i32, i32, i32) {
    %c0_i32 = arith.constant 0 : i32
    %c0_i32_0 = arith.constant 0 : i32
    %c0_i32_1 = arith.constant 0 : i32
    return %arg0, %c0_i32, %c0_i32_0 : i32, i32, i32
  }
  func.func @transform_9(%arg0: i32, %arg1: memref<2xi32, #tpu.memory_space<smem>>, %arg2: memref<2xi32, #tpu.memory_space<smem>>) -> (i32, i32, i32) {
    %c0_i32 = arith.constant 0 : i32
    %c0_i32_0 = arith.constant 0 : i32
    %c0_i32_1 = arith.constant 0 : i32
    return %arg0, %c0_i32, %c0_i32_0 : i32, i32, i32
  }
  func.func @transform_10(%arg0: i32, %arg1: memref<2xi32, #tpu.memory_space<smem>>, %arg2: memref<2xi32, #tpu.memory_space<smem>>) -> (i32, i32, i32) {
    %c0_i32 = arith.constant 0 : i32
    %c0_i32_0 = arith.constant 0 : i32
    %c0_i32_1 = arith.constant 0 : i32
    return %arg0, %c0_i32, %c0_i32_0 : i32, i32, i32
  }
  func.func @transform_11(%arg0: i32, %arg1: memref<2xi32, #tpu.memory_space<smem>>, %arg2: memref<2xi32, #tpu.memory_space<smem>>) -> (i32, i32, i32) {
    %c0_i32 = arith.constant 0 : i32
    %c0_i32_0 = arith.constant 0 : i32
    %c0_i32_1 = arith.constant 0 : i32
    return %arg0, %c0_i32, %c0_i32_0 : i32, i32, i32
  }
  func.func @transform_12(%arg0: i32, %arg1: memref<2xi32, #tpu.memory_space<smem>>, %arg2: memref<2xi32, #tpu.memory_space<smem>>) -> (i32, i32, i32) {
    %c0_i32 = arith.constant 0 : i32
    %c0_i32_0 = arith.constant 0 : i32
    %c0_i32_1 = arith.constant 0 : i32
    return %arg0, %c0_i32, %c0_i32_0 : i32, i32, i32
  }
  func.func @transform_13(%arg0: i32, %arg1: memref<2xi32, #tpu.memory_space<smem>>, %arg2: memref<2xi32, #tpu.memory_space<smem>>) -> (i32, i32) {
    %c0_i32 = arith.constant 0 : i32
    %c0_i32_0 = arith.constant 0 : i32
    %c0_i32_1 = arith.constant 0 : i32
    return %c0_i32, %c0_i32_0 : i32, i32
  }
}

</mosaic_0001>

<bundles_post_ra>
// kernel: asr_forward.2
= control target key start
LH: loop header
LB: loop body
LE: loop exit
PB: predicated region body
PF: predicated region fallthrough
CT: control target
= control target key end

     0   :  { %s4489_s0 = inlined_call_operand.vmem [shape: s32[2], index: 0, kind: input, shape index: {}]   ;;  %s4490_s1 = inlined_call_operand.vmem [shape: f32[32,8], index: 1, kind: input, shape index: {}]   ;;  %s4491_s2 = inlined_call_operand.vmem [shape: f32[32,32], index: 2, kind: input, shape index: {}]   ;;  %s4492_s3 = inlined_call_operand.vmem [shape: f32[8,32], index: 3, kind: input, shape index: {}]   ;;  %s4493_s4 = inlined_call_operand.vmem [shape: f32[5,32], index: 4, kind: input, shape index: {}]   ;;  %s4494_s5 = inlined_call_operand.vmem [shape: f32[2,32,96], index: 5, kind: input, shape index: {}]   ;;  %s4495_s6 = inlined_call_operand.vmem [shape: f32[2,32,32], index: 6, kind: input, shape index: {}]   ;;  %s4496_s7 = inlined_call_operand.vmem [shape: f32[2,32,64], index: 7, kind: input, shape index: {}]   ;;  %s4497_s8 = inlined_call_operand.vmem [shape: f32[2,64,32], index: 8, kind: input, shape index: {}]   ;;  %s4498_s9 = inlined_call_operand.vmem [shape: f32[2,8,96], index: 9, kind: input, shape index: {}]   ;;  %s4499_s10 = inlined_call_operand.vmem [shape: f32[32,32], index: 10, kind: output, shape index: {}]  }
   0x1   :  { %s15_s15 = sshll.u32 %s4489_s0, 4  ;;  %s16_s15 = int_to_ptr.vmem [resolvable:$true] %s15_s15 }
   0x2   :  { %s3871_s16 = scalar_lea.vmem %s16_s15, 16  ;;  %p3876_p1 = scmp.lt.s32.totalorder %s16_s15, %s16_s15 }
   0x3   :  { %p3872_p0 = scmp.ne.s32.totalorder %s16_s15, %s3871_s16  ;;  %p3877_p2 = scmp.lt.s32.totalorder %s3871_s16, %s3871_s16 }
   0x5   :  { %p3878_p3 = por %p3877_p2, %p3876_p1 }
   0x7   :  { %p3879_p4 = pnand %p3878_p3, %p3872_p0 }
   0x9   :  { %3882 = shalt.err (!%p3879_p4)  }
   0xa   :  { %s3893_s17 = smov [#allocation5]  }
   0xb   :  { %18 = dma.vmem_to_smem %s16_s15, 16, %s3893_s17, [#allocation4] }
   0xc   :  { %3887 = dma.done.wait [#allocation4], 16 }
   0xd   :  { %3888 = vsyncadd [#allocation4], 4294967280 }
   0xe   :  { %20 = sfence }
   0xf   :  { %s3967_s18 = smov 0  }
  0x10 LB: > { %s3973_s0 = sadd.s32 4294967295, %s3891_s18   ;;  %p3143_p5 = scmp.ge.s32.totalorder %s3891_s18, 1  ;;  %s3891_s18 = sphi %s3967_s18, %s26_s18  }
  0x11   : > { %p328_p6 = scmp.lt.s32.totalorder %s3891_s18, 3 }
  0x13   : > { %p329_p7 = pnand %p3143_p5, %p328_p6 }
  0x14   : > { %p378_p8 = scmp.lt.s32.totalorder (!%p329_p7), %s3973_s0, 1  ;;  %p3153_p9 = scmp.ne.s32.totalorder (!%p329_p7), %s3973_s0, 0 }
  0x15   : > { %332 = sbr.rel (%p329_p7) target bundleno = 5481 (0x1569), region = 56 }
  0x1c   : > { %s379_s19 = scalar_select %p378_p8, %s3973_s0, 1 }
  0x1d   : > { %405 = sbr.rel (%p3153_p9) target bundleno = 576 (0x240), region = 60  ;;  %v410_v0 = vld [vmem:[%s4492_s3] sm:$0xff] (!%p3153_p9)  ;;  %vm416_vm0 = vcmask (!%p3153_p9), 64512   ;;  %v408_v2 = vld [vmem:[%s4490_s1 + $0x10] sm:$0xff] (!%p3153_p9)  ;;  %v407_v3 = vld [vmem:[%s4490_s1 + $0x8] sm:$0xff] (!%p3153_p9)  ;;  %vm516_vm1 = vcmask (!%p3153_p9), 261120  }
  0x1e   : > { %s3231_s20 = sshll.u32 %s379_s19, 5  ;;  %s3234_s21 = sshll.u32 %s379_s19, 6  ;;  %v406_v1 = vld [vmem:[%s4490_s1] sm:$0xff] (!%p3153_p9)  ;;  %3344 = vmatprep.subr.mxu0 (!%p3153_p9), %v410_v0  ;;  %3664 = vmatprep.subr.mxu1 (!%p3153_p9), %v410_v0  ;;  %v409_v4 = vld [vmem:[%s4490_s1 + $0x18] sm:$0xff] (!%p3153_p9) }
  0x1f   : > { %s3982_s24 = scalar_lea.vmem %s4494_s5, %s3231_s20  ;;  %s3987_s27 = scalar_lea.vmem %s4495_s6, %s3231_s20  ;;  %3345 = vmatpush3.msra.mxu0 (!%p3153_p9), %v410_v0  ;;  %3665 = vmatpush3.msra.mxu1 (!%p3153_p9), %v410_v0  ;;  %v3154_v5 = vld [vmem:[%s4493_s4] ss:$0 sm:$0xff] (!%p3153_p9)  ;;  %v3159_v51 = vld [vmem:[%s4493_s4 + $0x1] ss:$0 sm:$0xff] (!%p3153_p9)  ;;  %v3160_v53 = vld [vmem:[%s4493_s4 + $0x2] ss:$0 sm:$0xff] (!%p3153_p9) }
  0x20   : > { %s3992_s30 = scalar_lea.vmem %s4496_s7, %s3231_s20  ;;  %s3997_s13 = scalar_lea.vmem %s4497_s8, %s3234_s21  ;;  %3346 = vmatprep.mubr.msk.f32.mxu0 (!%p3153_p9), %vm416_vm0, %v406_v1  ;;  %3349 = vmatprep.mubr.msk.f32.mxu1 (!%p3153_p9), %vm416_vm0, %v408_v2  ;;  %v594_v63 = vld [vmem:[%s4491_s2] sm:$0xff] (!%p3153_p9) }
  0x21   : > { %s3152_s14 = sshll.u32 %s379_s19, 3  ;;  %3347 = vmatmul.mubr.msk.f32.vlgmr.msra.gmra.mrb[0].mxu0 (!%p3153_p9), %vm416_vm0, %v407_v3  ;;  %3350 = vmatmul.mubr.msk.f32.vlgmr.msra.gmra.mrb[0].mxu1 (!%p3153_p9), %vm416_vm0, %v409_v4 }
  0x22   : > { %s4002_s17 = scalar_lea.vmem %s4498_s9, %s3152_s14 }
  0xf4   : > { %v3348_v6 = vpop.f32.mrb[0].mxu0  ;;  %v3351_v7 = vpop.f32.mrb[0].mxu1 }
  0xf5   : > { %v495_v8 = vpop.f32.mrb[1].mxu0  ;;  %v505_v9 = vpop.f32.mrb[1].mxu1  ;;  %v511_v10 = vadd.f32 %v3351_v7, %v3154_v5  ;;  %v501_v13 = vadd.f32 %v3348_v6, %v3154_v5 }
  0xf6   : > { %v496_v11 = vadd.f32 %v3154_v5, %v495_v8  ;;  %v506_v12 = vadd.f32 %v3154_v5, %v505_v9  ;;  %v595_v8 = vld [vmem:[%s4491_s2 + $0x8] sm:$0xff] }
  0xf7   : > { %v526_v16 = vsel %vm516_vm1, %v511_v10, 0.0  ;;  %v520_v17 = vsel %vm516_vm1, %v501_v13, 0.0 }
  0xf8   : > { %v523_v14 = vsel %vm516_vm1, %v506_v12, 0.0  ;;  %v517_v15 = vsel %vm516_vm1, %v496_v11, 0.0 }
  0xf9   : > { %524 = vadd.xlane.f32.xlu1 %v523_v14  ;;  %518 = vadd.xlane.f32.xlu0 %v517_v15 }
  0xfd   : > { %527 = vadd.xlane.f32.xlu1 %v526_v16  ;;  %521 = vadd.xlane.f32.xlu0 %v520_v17  ;;  %v597_v17 = vld [vmem:[%s4491_s2 + $0x18] sm:$0xff] }
 0x186   : > { %v525_v18 = vpop.xlane.xlu1 %524  ;;  %v519_v19 = vpop.xlane.xlu0 %518 }
 0x187   : > { %v532_v20 = vmul.f32 0.03125, %v525_v18  ;;  %v530_v21 = vmul.f32 0.03125, %v519_v19 }
 0x189   : > { %v536_v22 = vsub.f32 %v506_v12, %v532_v20  ;;  %v534_v23 = vsub.f32 %v496_v11, %v530_v21  ;;  %v596_v11 = vld [vmem:[%s4491_s2 + $0x10] sm:$0xff] }
 0x18a   : > { %v528_v24 = vpop.xlane.xlu1 %527  ;;  %v522_v25 = vpop.xlane.xlu0 %521 }
 0x18b   : > { %v533_v26 = vmul.f32 0.03125, %v528_v24  ;;  %v531_v27 = vmul.f32 0.03125, %v522_v25  ;;  %v538_v28 = vmul.f32 %v534_v23, %v534_v23  ;;  %v540_v32 = vmul.f32 %v536_v22, %v536_v22 }
 0x18d   : > { %v537_v29 = vsub.f32 %v511_v10, %v533_v26  ;;  %v535_v30 = vsub.f32 %v501_v13, %v531_v27  ;;  %v542_v31 = vsel %vm516_vm1, %v538_v28, 0.0  ;;  %v548_v34 = vsel %vm516_vm1, %v540_v32, 0.0 }
 0x18e   : > { %543 = vadd.xlane.f32.xlu0 %v542_v31 }
 0x18f   : > { %v539_v33 = vmul.f32 %v535_v30, %v535_v30  ;;  %v541_v36 = vmul.f32 %v537_v29, %v537_v29 }
 0x191   : > { %v545_v35 = vsel %vm516_vm1, %v539_v33, 0.0  ;;  %v551_v37 = vsel %vm516_vm1, %v541_v36, 0.0 }
 0x192   : > { %549 = vadd.xlane.f32.xlu0 %v548_v34  ;;  %546 = vadd.xlane.f32.xlu1 %v545_v35 }
 0x196   : > { %552 = vadd.xlane.f32.xlu1 %v551_v37 }
 0x21b   : > { %v544_v38 = vpop.xlane.xlu0 %543 }
 0x21c   : > { %v554_v39 = vmul.f32 0.03125, %v544_v38 }
 0x21e   : > { %v558_v40 = vadd.f32 1e-12, %v554_v39 }
 0x21f   : > { %v547_v41 = vpop.xlane.xlu1 %546  ;;  %v550_v42 = vpop.xlane.xlu0 %549 }
 0x220   : > { %3690 = vrsqrt.f32 %v558_v40  ;;  %v555_v43 = vmul.f32 0.03125, %v547_v41  ;;  %v556_v44 = vmul.f32 0.03125, %v550_v42 }
 0x222   : > { %v559_v45 = vadd.f32 1e-12, %v555_v43  ;;  %v560_v46 = vadd.f32 1e-12, %v556_v44 }
 0x223   : > { %v553_v47 = vpop.xlane.xlu1 %552 }
 0x224   : > { %3692 = vrsqrt.f32 %v559_v45  ;;  %v557_v48 = vmul.f32 0.03125, %v553_v47 }
 0x225   : > { %3694 = vrsqrt.f32 %v560_v46 }
 0x226   : > { %v561_v49 = vadd.f32 1e-12, %v557_v48 }
 0x228   : > { %3696 = vrsqrt.f32 %v561_v49 }
 0x22a   : > { %v3691_v50 = vpop.eup %3690 }
 0x22b   : > { %v566_v52 = vmul.f32 %v3691_v50, %v534_v23 }
 0x22d   : > { %v574_v54 = vmul.f32 %v3159_v51, %v566_v52 }
 0x22e   : > { %v3693_v55 = vpop.eup %3692 }
 0x22f   : > { %v3695_v56 = vpop.eup %3694  ;;  %v582_v57 = vadd.f32 %v3160_v53, %v574_v54  ;;  %v567_v58 = vmul.f32 %v3693_v55, %v535_v30 }
 0x230   : > { %v568_v59 = vmul.f32 %v3695_v56, %v536_v22 }
 0x231   : > { %v586_v60 = vmax.f32 %v582_v57, 0.0  ;;  %v575_v61 = vmul.f32 %v3159_v51, %v567_v58 }
 0x232   : > { %v3697_v62 = vpop.eup %3696  ;;  %v576_v0 = vmul.f32 %v3159_v51, %v568_v59 }
 0x233   : > { %v590_v1 = vmul.f32 5.656854, %v586_v60  ;;  %v583_v2 = vadd.f32 %v3160_v53, %v575_v61  ;;  %v569_v3 = vmul.f32 %v3697_v62, %v537_v29 }
 0x234   : > { %v584_v4 = vadd.f32 %v3160_v53, %v576_v0 }
 0x235   : > { %v598_v5 = vadd.f32 %v594_v63, %v590_v1  ;;  %v587_v6 = vmax.f32 %v583_v2, 0.0  ;;  %v577_v7 = vmul.f32 %v3159_v51, %v569_v3 }
 0x236   : > { %v588_v9 = vmax.f32 %v584_v4, 0.0 }
 0x237   : > { %602 = vst.msk [vmem:[#allocation2] sm:$0xff] %vm516_vm1, %v598_v5  ;;  %v591_v10 = vmul.f32 5.656854, %v587_v6  ;;  %v585_v12 = vadd.f32 %v3160_v53, %v577_v7 }
 0x238   : > { %v592_v13 = vmul.f32 5.656854, %v588_v9 }
 0x239   : > { %v599_v14 = vadd.f32 %v595_v8, %v591_v10  ;;  %v589_v15 = vmax.f32 %v585_v12, 0.0 }
 0x23a   : > { %v600_v16 = vadd.f32 %v596_v11, %v592_v13 }
 0x23b   : > { %603 = vst.msk [vmem:[#allocation2 + $0x8] sm:$0xff] %vm516_vm1, %v599_v14  ;;  %v593_v18 = vmul.f32 5.656854, %v589_v15 }
 0x23c   : > { %604 = vst.msk [vmem:[#allocation2 + $0x10] sm:$0xff] %vm516_vm1, %v600_v16 }
 0x23d   : > { %v601_v19 = vadd.f32 %v597_v17, %v593_v18 }
 0x23f   : > { %605 = vst.msk [vmem:[#allocation2 + $0x18] sm:$0xff] %vm516_vm1, %v601_v19 }
 0x240 PF: > { %v607_v20 = vld [vmem:[#allocation2] sm:$0xff]  ;;  %vm611_vm2 = vcmask 261120   ;;  %v682_v39 = vld [vmem:[%s3982_s24 + $0x8] sm:$0xff]  ;;  %v683_v40 = vld [vmem:[%s3982_s24 + $0x10] sm:$0xff]  ;;  %v665_v51 = vlaneseq  ;;  %vm798_vm3 = vcmask 64512   ;;  %s3895_s12 = smov 96  }
 0x241   : > { %v612_v22 = vsel %vm611_vm2, %v607_v20, 0.0  ;;  %v681_v38 = vld [vmem:[%s3982_s24] sm:$0xff]  ;;  %v684_v42 = vld [vmem:[%s3982_s24 + $0x18] sm:$0xff]  ;;  %s3894_s24 = smov 88   ;;  %s3896_s14 = smov 120   ;;  %vm4111_vm4 = vmpackc.low %vm798_vm3, %vm798_vm3  ;;  %vm886_vm6 = vcmask 130048  }
 0x242   : > { %v608_v21 = vld [vmem:[#allocation2 + $0x8] sm:$0xff]  ;;  %613 = vadd.xlane.f32.xlu0 %v612_v22  ;;  %v3536_v41 = vpack.c.bf16 %v682_v39, %v681_v38  ;;  %v3540_v43 = vpack.c.bf16 %v684_v42, %v683_v40  ;;  %v4065_v55 = vshrl.u32 %v665_v51, 7  ;;  %v4069_v60 = vld [vmem:[%s4002_s17] sm:$0xff]  ;;  %s3897_s15 = smov 80   ;;  %s3898_s16 = smov 112   ;;  %vm1210_vm8 = vcmask 130112  }
 0x243   : > { %v615_v23 = vsel %vm611_vm2, %v608_v21, 0.0  ;;  %v609_v24 = vld [vmem:[#allocation2 + $0x10] sm:$0xff]  ;;  %s786_s22 = sld [smem:[#allocation5]]  ;;  %s3900_s23 = smov 64   ;;  %vm1425_vm9 = vcmask 195712   ;;  %vm1640_vm10 = vcmask 261312  }
 0x244   : > { %v618_v25 = vsel %vm611_vm2, %v609_v24, 0.0  ;;  %3537 = vmatprep.subr.bf16.mxu1 %v3536_v41  ;;  %v667_v59 = vsub.s32 0, %v4065_v55  ;;  %v675_v62 = vsub.s32 1, %v4065_v55  ;;  %s3901_s20 = smov 48   ;;  %s3902_s25 = smov 72   ;;  %vm2876_vm11 = vcmask 523264  }
 0x245   : > { %3539 = vmatpush3.bf16.msra.mxu1 %v3536_v41  ;;  %s3903_s21 = smov 56   ;;  %s3904_s26 = smov 104  }
 0x246   : > { %616 = vadd.xlane.f32.xlu0 %v615_v23  ;;  %v610_v35 = vld [vmem:[#allocation2 + $0x18] sm:$0xff]  ;;  %3541 = vmatprep.subr.bf16.mxu1 %v3540_v43  ;;  %v668_v0 = vrot.slane %v4069_v60, %v667_v59  ;;  %v676_v4 = vrot.slane %v4069_v60, %v675_v62  ;;  %s3191_s19 = sld [smem:[#allocation5 + $0x1]]  ;;  %s3905_s28 = smov 40  }
 0x247   : > { %v621_v37 = vsel %vm611_vm2, %v610_v35, 0.0  ;;  %s3906_s29 = smov 16   ;;  %s3907_s11 = smov 8  }
 0x248   : > { %p3226_p10 = scmp.ne.s32.totalorder %s3973_s0, 1 }
 0x249   : > { %3543 = vmatpush3.bf16.msra.mxu1 %v3540_v43 }
 0x24a   : > { %619 = vadd.xlane.f32.xlu0 %v618_v25  ;;  %v687_v25 = vsub.s32 4, %v4065_v55 }
 0x2cf   : > { %v614_v26 = vpop.xlane.xlu0 %613 }
 0x2d0   : > { %v625_v27 = vmul.f32 0.03125, %v614_v26  ;;  %v4081_v26 = vrot.slane %v4069_v60, %v687_v25 }
 0x2d2   : > { %v629_v28 = vsub.f32 %v607_v20, %v625_v27 }
 0x2d3   : > { %v617_v29 = vpop.xlane.xlu0 %616 }
 0x2d4   : > { %v626_v30 = vmul.f32 0.03125, %v617_v29  ;;  %v633_v31 = vmul.f32 %v629_v28, %v629_v28 }
 0x2d6   : > { %v630_v32 = vsub.f32 %v608_v21, %v626_v30  ;;  %v637_v33 = vsel %vm611_vm2, %v633_v31, 0.0 }
 0x2d7   : > { %638 = vadd.xlane.f32.xlu1 %v637_v33  ;;  %v620_v44 = vpop.xlane.xlu0 %619 }
 0x2d8   : > { %v634_v34 = vmul.f32 %v630_v32, %v630_v32  ;;  %v627_v45 = vmul.f32 0.03125, %v620_v44 }
 0x2da   : > { %v640_v36 = vsel %vm611_vm2, %v634_v34, 0.0  ;;  %v631_v46 = vsub.f32 %v609_v24, %v627_v45 }
 0x2db   : > { %641 = vadd.xlane.f32.xlu1 %v640_v36 }
 0x2dc   : > { %v635_v47 = vmul.f32 %v631_v46, %v631_v46 }
 0x2de   : > { %v643_v48 = vsel %vm611_vm2, %v635_v47, 0.0 }
 0x2df   : > { %622 = vadd.xlane.f32.xlu1 %v621_v37  ;;  %644 = vadd.xlane.f32.xlu0 %v643_v48 }
 0x364   : > { %v639_v49 = vpop.xlane.xlu1 %638 }
 0x365   : > { %v649_v50 = vmul.f32 0.03125, %v639_v49 }
 0x367   : > { %v653_v52 = vadd.f32 1e-12, %v649_v50 }
 0x368   : > { %v642_v53 = vpop.xlane.xlu1 %641 }
 0x369   : > { %3778 = vrsqrt.f32 %v653_v52  ;;  %v650_v54 = vmul.f32 0.03125, %v642_v53  ;;  %v4138_v52 = vand.u32 127, %v665_v51  ;;  %v789_v53 = vstv %s786_s22 }
 0x36b   : > { %v654_v56 = vadd.f32 1e-12, %v650_v54  ;;  %vm790_vm5 = vcmp.lt.s32.totalorder %v4138_v52, %v789_v53 }
 0x36c   : > { %v623_v57 = vpop.xlane.xlu1 %622  ;;  %v645_v11 = vpop.xlane.xlu0 %644 }
 0x36d   : > { %3780 = vrsqrt.f32 %v654_v56  ;;  %v628_v58 = vmul.f32 0.03125, %v623_v57  ;;  %v651_v12 = vmul.f32 0.03125, %v645_v11  ;;  %v3899_v56 = vmov -1e+09  }
 0x36e   : > { %v4142_v57 = vsel %vm790_vm5, 0.0, %v3899_v56 }
 0x36f   : > { %v632_v61 = vsub.f32 %v610_v35, %v628_v58  ;;  %v655_v13 = vadd.f32 1e-12, %v651_v12 }
 0x371   : > { %v636_v63 = vmul.f32 %v632_v61, %v632_v61  ;;  %3782 = vrsqrt.f32 %v655_v13 }
 0x373   : > { %v3779_v1 = vpop.eup %3778  ;;  %v646_v2 = vsel %vm611_vm2, %v636_v63, 0.0 }
 0x374   : > { %v661_v3 = vmul.f32 %v3779_v1, %v629_v28  ;;  %647 = vadd.xlane.f32.xlu1 %v646_v2 }
 0x376   : > { %v669_v5 = vmul.f32 %v668_v0, %v661_v3 }
 0x377   : > { %v3781_v6 = vpop.eup %3780 }
 0x378   : > { %v677_v7 = vadd.f32 %v676_v4, %v669_v5  ;;  %v662_v8 = vmul.f32 %v3781_v6, %v630_v32 }
 0x37a   : > { %3360 = vmatprep.mubr.msk.f32.mxu1 %vm611_vm2, %v677_v7  ;;  %v670_v9 = vmul.f32 %v668_v0, %v662_v8 }
 0x37b   : > { %v3783_v14 = vpop.eup %3782 }
 0x37c   : > { %v678_v10 = vadd.f32 %v676_v4, %v670_v9  ;;  %v663_v15 = vmul.f32 %v3783_v14, %v631_v46 }
 0x37e   : > { %3361 = vmatmul.mubr.msk.f32.vlgmr.msra.gmra.mrb[0].mxu1 %vm611_vm2, %v678_v10  ;;  %v671_v16 = vmul.f32 %v668_v0, %v663_v15 }
 0x380   : > { %v679_v17 = vadd.f32 %v676_v4, %v671_v16 }
 0x382   : > { %3363 = vmatprep.mubr.msk.f32.mxu1 %vm611_vm2, %v679_v17 }
 0x401   : > { %v648_v18 = vpop.xlane.xlu1 %647 }
 0x402   : > { %v652_v19 = vmul.f32 0.03125, %v648_v18 }
 0x404   : > { %v656_v20 = vadd.f32 1e-12, %v652_v19 }
 0x406   : > { %3784 = vrsqrt.f32 %v656_v20 }
 0x410   : > { %v3785_v21 = vpop.eup %3784 }
 0x411   : > { %v664_v22 = vmul.f32 %v3785_v21, %v632_v61 }
 0x413   : > { %v672_v23 = vmul.f32 %v668_v0, %v664_v22 }
 0x415   : > { %v680_v24 = vadd.f32 %v676_v4, %v672_v23 }
 0x417   : > { %3364 = vmatmul.mubr.msk.f32.gmra.mrb[2].mxu1 %vm611_vm2, %v680_v24 }
 0x451   : > { %v3362_v27 = vpop.f32.mrb[0].mxu1 }
 0x452   : > { %v4084_v28 = vadd.f32 %v3362_v27, %v4081_v26  ;;  %v767_v29 = vpop.f32.mrb[1].mxu1 }
 0x453   : > { %v4087_v30 = vadd.f32 %v767_v29, %v4081_v26 }
 0x455   : > { %3370 = vmatprep.mubr.msk.f32.mxu1 %vm798_vm3, %v4087_v30  ;;  %v4093_v31 = vpack.i.bf16 %v4084_v28, %v4087_v30 }
 0x457   : > { %3704 = vrot.lane.b32.xlu1 %v4093_v31, %s3894_s24  ;;  %3699 = vrot.lane.b32.xlu0 %v4093_v31, %s3895_s12 }
 0x45b   : > { %998 = vrot.lane.b32.xlu1 %v4087_v30, %s3896_s14  ;;  %1000 = vrot.lane.b32.xlu0 %v4084_v28, %s3896_s14 }
 0x45f   : > { %3709 = vrot.lane.b32.xlu1 %v4093_v31, %s3897_s15  ;;  %1215 = vrot.lane.b32.xlu0 %v4084_v28, %s3898_s16 }
 0x463   : > { %1213 = vrot.lane.b32.xlu1 %v4087_v30, %s3898_s16 }
 0x4c9   : > { %v3705_v32 = vpop.permute.xlu1 %3704  ;;  %v3700_v33 = vpop.permute.xlu0 %3699 }
 0x4ca   : > { %v3707_v34 = vunpack.i.h.bf16 %v3705_v32  ;;  %v3706_v35 = vunpack.i.l.bf16 %v3705_v32  ;;  %v3702_v36 = vunpack.i.h.bf16 %v3700_v33  ;;  %v3701_v37 = vunpack.i.l.bf16 %v3700_v33 }
 0x4cc   : > { %v3544_v39 = vpack.c.bf16 %v3702_v36, %v3701_v37  ;;  %v3554_v40 = vpack.c.bf16 %v3707_v34, %v3706_v35 }
 0x4cd   : > { %v999_v41 = vpop.permute.xlu1 %998  ;;  %v1001_v47 = vpop.permute.xlu0 %1000 }
 0x4ce   : > { %3546 = vmatprep.subr.msk.bf16.mxu1 %vm4111_vm4, %v3544_v39  ;;  %3556 = vmatprep.subr.msk.bf16.mxu0 %vm4111_vm4, %v3554_v40 }
 0x4cf   : > { %3384 = vmatprep.mubr.msk.f32.mxu0 %vm798_vm3, %v999_v41  ;;  %3549 = vmatpush3.bf16.xpose.msk.msra.mxu1 %vm4111_vm4, %v3544_v39 }
 0x4d0   : > { %3559 = vmatpush3.bf16.xpose.msk.msra.mxu0 %vm4111_vm4, %v3554_v40 }
 0x4d1   : > { %v3710_v42 = vpop.permute.xlu1 %3709  ;;  %v1216_v48 = vpop.permute.xlu0 %1215 }
 0x4d2   : > { %v3712_v43 = vunpack.i.h.bf16 %v3710_v42  ;;  %v3711_v44 = vunpack.i.l.bf16 %v3710_v42 }
 0x4d4   : > { %v3564_v45 = vpack.c.bf16 %v3712_v43, %v3711_v44 }
 0x4d5   : > { %v1214_v46 = vpop.permute.xlu1 %1213 }
 0x4d6   : > { %3371 = vmatmul.mubr.msk.f32.vlgmr.msra.gmra.mrb[4].mxu1 %vm798_vm3, %v4084_v28  ;;  %3566 = vmatprep.subr.msk.bf16.mxu0 %vm4111_vm4, %v3564_v45 }
 0x4d7   : > { %3385 = vmatmul.mubr.msk.f32.vlgmr.msra.gmra.mrb[0].mxu0 %vm798_vm3, %v1001_v47 }
 0x4d8   : > { %3569 = vmatpush3.bf16.xpose.msk.msra.mxu0 %vm4111_vm4, %v3564_v45  ;;  %3398 = vmatprep.mubr.msk.f32.mxu0 %vm798_vm3, %v1214_v46 }
 0x4df   : > { %3399 = vmatmul.mubr.msk.f32.vlgmr.msra.gmra.mrb[2].mxu0 %vm798_vm3, %v1216_v48 }
 0x4ea   : > { %v4133_v49 = vpop.f32.mrb[2].mxu1 }
 0x4eb   : > { %v4135_v50 = vpop.f32.mrb[3].mxu1 }
 0x5a9   : > { %v3372_v54 = vpop.f32.mrb[4].mxu1 }
 0x5aa   : > { %v883_v58 = vmul.f32 0.35355338, %v3372_v54  ;;  %v3386_v59 = vpop.f32.mrb[0].mxu0  ;;  %v873_v61 = vpop.f32.mrb[5].mxu1 }
 0x5ab   : > { %v882_v62 = vmul.f32 0.35355338, %v873_v61  ;;  %v1080_v63 = vpop.f32.mrb[1].mxu0  ;;  %v1090_v2 = vmul.f32 0.35355338, %v3386_v59  ;;  %v4177_v59 = vadd.f32 %v4133_v49, %v4081_v26  ;;  %v4181_v61 = vadd.f32 %v4135_v50, %v4081_v26 }
 0x5ac   : > { %v1089_v0 = vmul.f32 0.35355338, %v1080_v63  ;;  %v885_v1 = vadd.f32 %v883_v58, %v4142_v57 }
 0x5ad   : > { %v884_v51 = vadd.f32 %v882_v62, %v4142_v57  ;;  %v1092_v8 = vadd.f32 %v1090_v2, %v4142_v57  ;;  %v4188_v63 = vpack.i.bf16 %v4177_v59, %v4181_v61 }
 0x5ae   : > { %v890_v3 = vsel %vm886_vm6, %v885_v1, -inf  ;;  %v1091_v4 = vadd.f32 %v1089_v0, %v4142_v57 }
 0x5af   : > { %891 = vmax.xlane.f32.xlu0 %v890_v3  ;;  %v887_v5 = vsel %vm886_vm6, %v884_v51, -inf  ;;  %v1096_v12 = vsel %vm886_vm6, %v1092_v8, -inf }
 0x5b0   : > { %888 = vmax.xlane.f32.xlu1 %v887_v5  ;;  %v1093_v7 = vsel %vm886_vm6, %v1091_v4, -inf }
 0x5b2   : > { %v3400_v6 = vpop.f32.mrb[2].mxu0 }
 0x5b3   : > { %v1305_v9 = vmul.f32 0.35355338, %v3400_v6  ;;  %v1295_v10 = vpop.f32.mrb[3].mxu0  ;;  %1094 = vmax.xlane.f32.xlu0 %v1093_v7 }
 0x5b4   : > { %v1304_v11 = vmul.f32 0.35355338, %v1295_v10 }
 0x5b5   : > { %v1307_v14 = vadd.f32 %v1305_v9, %v4142_v57 }
 0x5b6   : > { %v4153_v13 = vadd.f32 %v1304_v11, %v4142_v57 }
 0x5b7   : > { %1097 = vmax.xlane.f32.xlu0 %v1096_v12  ;;  %v1311_v16 = vsel %vm886_vm6, %v1307_v14, -inf }
 0x5b8   : > { %v1308_v15 = vsel %vm886_vm6, %v4153_v13, -inf }
 0x5b9   : > { %1309 = vmax.xlane.f32.xlu1 %v1308_v15 }
 0x5bb   : > { %1312 = vmax.xlane.f32.xlu0 %v1311_v16 }
 0x5ca   : > { %3714 = vrot.lane.b32.xlu1 %v4093_v31, %s3900_s23 }
 0x63c   : > { %v892_v17 = vpop.xlane.xlu0 %891 }
 0x63d   : > { %v894_v18 = vsub.f32 %v885_v1, %v892_v17  ;;  %v889_v19 = vpop.xlane.xlu1 %888 }
 0x63e   : > { %v893_v20 = vsub.f32 %v884_v51, %v889_v19 }
 0x63f   : > { %v897_v21 = vmul.f32 1.442695, %v894_v18 }
 0x640   : > { %v895_v22 = vmul.f32 1.442695, %v893_v20  ;;  %v1095_v23 = vpop.xlane.xlu0 %1094 }
 0x641   : > { %3786 = vpow2.f32 %v897_v21  ;;  %v1099_v24 = vsub.f32 %v1091_v4, %v1095_v23 }
 0x642   : > { %3788 = vpow2.f32 %v895_v22 }
 0x643   : > { %v1101_v25 = vmul.f32 1.442695, %v1099_v24 }
 0x644   : > { %v1098_v27 = vpop.xlane.xlu0 %1097 }
 0x645   : > { %3790 = vpow2.f32 %v1101_v25  ;;  %v1100_v29 = vsub.f32 %v1092_v8, %v1098_v27 }
 0x646   : > { %v1310_v32 = vpop.xlane.xlu1 %1309 }
 0x647   : > { %v1103_v33 = vmul.f32 1.442695, %v1100_v29  ;;  %v1314_v62 = vsub.f32 %v4153_v13, %v1310_v32 }
 0x648   : > { %v1313_v34 = vpop.xlane.xlu0 %1312 }
 0x649   : > { %3792 = vpow2.f32 %v1103_v33  ;;  %v1315_v35 = vsub.f32 %v1307_v14, %v1313_v34  ;;  %v1316_v0 = vmul.f32 1.442695, %v1314_v62 }
 0x64a   : > { %v3715_v36 = vpop.permute.xlu1 %3714 }
 0x64b   : > { %v3787_v37 = vpop.eup %3786  ;;  %v1318_v39 = vmul.f32 1.442695, %v1315_v35  ;;  %v3717_v40 = vunpack.i.h.bf16 %v3715_v36  ;;  %v3716_v41 = vunpack.i.l.bf16 %v3715_v36 }
 0x64c   : > { %v3789_v42 = vpop.eup %3788  ;;  %v902_v43 = vsel %vm886_vm6, %v3787_v37, 0.0 }
 0x64d   : > { %3794 = vpow2.f32 %v1318_v39  ;;  %v3550_v44 = vpack.c.bf16 %v3717_v40, %v3716_v41  ;;  %903 = vadd.xlane.f32.xlu0 %v902_v43  ;;  %v899_v45 = vsel %vm886_vm6, %v3789_v42, 0.0 }
 0x64e   : > { %900 = vadd.xlane.f32.xlu1 %v899_v45  ;;  %3796 = vpow2.f32 %v1316_v0 }
 0x64f   : > { %v3791_v46 = vpop.eup %3790  ;;  %3551 = vmatprep.subr.bf16.mxu1 %v3550_v44 }
 0x650   : > { %3553 = vmatpush3.bf16.msra.mxu1 %v3550_v44  ;;  %v1105_v47 = vsel %vm886_vm6, %v3791_v46, 0.0 }
 0x652   : > { %1106 = vadd.xlane.f32.xlu1 %v1105_v47 }
 0x653   : > { %v3793_v48 = vpop.eup %3792 }
 0x654   : > { %v1108_v53 = vsel %vm886_vm6, %v3793_v48, 0.0 }
 0x655   : > { %1109 = vadd.xlane.f32.xlu0 %v1108_v53 }
 0x657   : > { %v4165_v54 = vpop.eup %3794 }
 0x658   : > { %v1323_v58 = vsel %vm886_vm6, %v4165_v54, 0.0  ;;  %v3797_v49 = vpop.eup %3796 }
 0x659   : > { %1324 = vadd.xlane.f32.xlu0 %v1323_v58  ;;  %v1320_v1 = vsel %vm886_vm6, %v3797_v49, 0.0 }
 0x663   : > { %3724 = vrot.lane.b32.xlu1 %v4093_v31, %s3901_s20 }
 0x667   : > { %3729 = vrot.lane.b32.xlu1 %v4093_v31, %s3902_s25 }
 0x66f   : > { %3719 = vrot.lane.b32.xlu0 %v4093_v31, %s3903_s21 }
 0x673   : > { %1430 = vrot.lane.b32.xlu0 %v4084_v28, %s3904_s26 }
 0x677   : > { %3739 = vrot.lane.b32.xlu0 %v4188_v63, %s3894_s24  ;;  %s3908_s24 = smov 24  }
 0x68b   : > { %1321 = vadd.xlane.f32.xlu1 %v1320_v1 }
 0x69c   : > { %1428 = vrot.lane.b32.xlu1 %v4087_v30, %s3904_s26 }
 0x6a0   : > { %3734 = vrot.lane.b32.xlu1 %v4188_v63, %s3895_s12 }
 0x6da   : > { %v904_v26 = vpop.xlane.xlu0 %903 }
 0x6db   : > { %3798 = vrcp.f32 %v904_v26  ;;  %v901_v28 = vpop.xlane.xlu1 %900 }
 0x6dc   : > { %3800 = vrcp.f32 %v901_v28 }
 0x6df   : > { %v1107_v50 = vpop.xlane.xlu1 %1106 }
 0x6e0   : > { %3802 = vrcp.f32 %v1107_v50 }
 0x6e2   : > { %v1110_v51 = vpop.xlane.xlu0 %1109 }
 0x6e3   : > { %3804 = vrcp.f32 %v1110_v51  ;;  %v3725_v4 = vpop.permute.xlu1 %3724 }
 0x6e4   : > { %v3727_v8 = vunpack.i.h.bf16 %v3725_v4  ;;  %v3726_v10 = vunpack.i.l.bf16 %v3725_v4 }
 0x6e5   : > { %v3799_v2 = vpop.eup %3798 }
 0x6e6   : > { %v3801_v3 = vpop.eup %3800  ;;  %v1325_v5 = vpop.xlane.xlu0 %1324  ;;  %v908_v7 = vmul.f32 %v3799_v2, %v3787_v37  ;;  %v3570_v17 = vpack.c.bf16 %v3727_v8, %v3726_v10 }
 0x6e7   : > { %v907_v6 = vmul.f32 %v3801_v3, %v3789_v42  ;;  %v3730_v14 = vpop.permute.xlu1 %3729  ;;  %3806 = vrcp.f32 %v1325_v5 }
 0x6e8   : > { %v3732_v18 = vunpack.i.h.bf16 %v3730_v14  ;;  %v3731_v19 = vunpack.i.l.bf16 %v3730_v14 }
 0x6e9   : > { %3377 = vmatprep.mubr.msk.f32.mxu1 %vm886_vm6, %v907_v6 }
 0x6ea   : > { %v3803_v30 = vpop.eup %3802  ;;  %v3720_v9 = vpop.permute.xlu0 %3719  ;;  %3378 = vmatmul.mubr.msk.f32.vlgmr.msra.gmra.mrb[6].mxu1 %vm886_vm6, %v908_v7  ;;  %v3574_v21 = vpack.c.bf16 %v3732_v18, %v3731_v19  ;;  %v1741_v7 = vstv %s3191_s19 }
 0x6eb   : > { %v3722_v11 = vunpack.i.h.bf16 %v3720_v9  ;;  %v3721_v12 = vunpack.i.l.bf16 %v3720_v9  ;;  %v1113_v13 = vmul.f32 %v3803_v30, %v3791_v46  ;;  %vm1742_vm7 = vcmp.lt.s32.totalorder %v4138_v52, %v1741_v7  ;;  %v1646_v7 = vld [vmem:[%s3987_s27 + $0x8] sm:$0xff] }
 0x6ec   : > { %v4244_v8 = vsel %vm1742_vm7, 0.0, %v3899_v56 }
 0x6ed   : > { %v3560_v15 = vpack.c.bf16 %v3722_v11, %v3721_v12  ;;  %3391 = vmatprep.mubr.msk.f32.mxu1 %vm886_vm6, %v1113_v13  ;;  %v3805_v16 = vpop.eup %3804 }
 0x6ee   : > { %v1114_v20 = vmul.f32 %v3805_v16, %v3793_v48  ;;  %v1431_v27 = vpop.permute.xlu0 %1430 }
 0x6ef   : > { %3561 = vmatprep.subr.bf16.mxu1 %v3560_v15 }
 0x6f0   : > { %3563 = vmatpush3.bf16.msra.mxu1 %v3560_v15 }
 0x6f1   : > { %3571 = vmatprep.subr.bf16.mxu1 %v3570_v17  ;;  %v3807_v25 = vpop.eup %3806 }
 0x6f2   : > { %v1329_v35 = vmul.f32 %v3807_v25, %v4165_v54  ;;  %v3740_v37 = vpop.permute.xlu0 %3739 }
 0x6f3   : > { %3392 = vmatmul.mubr.msk.f32.vlgmr.msra.gmra.mrb[8].mxu1 %vm886_vm6, %v1114_v20  ;;  %v3742_v39 = vunpack.i.h.bf16 %v3740_v37  ;;  %v3741_v40 = vunpack.i.l.bf16 %v3740_v37 }
 0x6f4   : > { %3573 = vmatpush3.bf16.msra.mxu1 %v3570_v17 }
 0x6f5   : > { %3576 = vmatprep.subr.msk.bf16.mxu1 %vm4111_vm4, %v3574_v21  ;;  %v3602_v41 = vpack.c.bf16 %v3742_v39, %v3741_v40 }
 0x718   : > { %v1322_v22 = vpop.xlane.xlu1 %1321 }
 0x719   : > { %3808 = vrcp.f32 %v1322_v22 }
 0x71c   : > { %v1429_v23 = vpop.permute.xlu1 %1428 }
 0x720   : > { %v3735_v24 = vpop.permute.xlu1 %3734 }
 0x721   : > { %v3737_v32 = vunpack.i.h.bf16 %v3735_v24  ;;  %v3736_v33 = vunpack.i.l.bf16 %v3735_v24 }
 0x723   : > { %v3809_v29 = vpop.eup %3808  ;;  %v3592_v36 = vpack.c.bf16 %v3737_v32, %v3736_v33 }
 0x724   : > { %v1328_v34 = vmul.f32 %v3809_v29, %v3797_v49 }
 0x726   : > { %3405 = vmatprep.mubr.msk.f32.mxu1 %vm886_vm6, %v1328_v34 }
 0x727   : > { %3406 = vmatmul.mubr.msk.f32.vlgmr.msra.gmra.mrb[10].mxu1 %vm886_vm6, %v1329_v35 }
 0x728   : > { %3579 = vmatpush3.bf16.xpose.msk.msra.mxu1 %vm4111_vm4, %v3574_v21  ;;  %3412 = vmatprep.mubr.msk.f32.mxu1 %vm798_vm3, %v1429_v23 }
 0x729   : > { %3594 = vmatprep.subr.msk.bf16.mxu1 %vm4111_vm4, %v3592_v36 }
 0x72f   : > { %3413 = vmatmul.mubr.msk.f32.vlgmr.msra.gmra.mrb[12].mxu1 %vm798_vm3, %v1431_v27 }
 0x730   : > { %3597 = vmatpush3.bf16.xpose.msk.msra.mxu1 %vm4111_vm4, %v3592_v36  ;;  %3437 = vmatprep.mubr.msk.f32.mxu1 %vm798_vm3, %v4181_v61 }
 0x731   : > { %3604 = vmatprep.subr.msk.bf16.mxu1 %vm4111_vm4, %v3602_v41 }
 0x737   : > { %3438 = vmatmul.mubr.msk.f32.vlgmr.msra.gmra.mrb[14].mxu1 %vm798_vm3, %v4177_v59 }
 0x738   : > { %3607 = vmatpush3.bf16.xpose.msk.msra.mxu1 %vm4111_vm4, %v3602_v41 }
 0x7bd   : > { %v3379_v42 = vpop.f32.mrb[6].mxu1 }
 0x7be   : > { %997 = vst.msk [vmem:[#allocation3 + $0x8] sm:$0xff] %vm798_vm3, %v3379_v42  ;;  %v987_v43 = vpop.f32.mrb[7].mxu1 }
 0x7bf   : > { %996 = vst.msk [vmem:[#allocation3] sm:$0xff] %vm798_vm3, %v987_v43 }
 0x7c6   : > { %v4224_v44 = vpop.f32.mrb[8].mxu1 }
 0x7c7   : > { %v4226_v45 = vpop.f32.mrb[9].mxu1 }
 0x7fa   : > { %v4228_v46 = vpop.f32.mrb[10].mxu1 }
 0x7fb   : > { %v4230_v47 = vpop.f32.mrb[11].mxu1 }
 0x802   : > { %v3414_v48 = vpop.f32.mrb[12].mxu1 }
 0x803   : > { %v1520_v53 = vmul.f32 0.35355338, %v3414_v48  ;;  %v1510_v54 = vpop.f32.mrb[13].mxu1 }
 0x804   : > { %v1519_v58 = vmul.f32 0.35355338, %v1510_v54 }
 0x805   : > { %v1522_v62 = vadd.f32 %v1520_v53, %v4142_v57 }
 0x806   : > { %v1521_v0 = vadd.f32 %v1519_v58, %v4142_v57 }
 0x807   : > { %v1526_v49 = vsel %vm886_vm6, %v1522_v62, -inf }
 0x808   : > { %1527 = vmax.xlane.f32.xlu1 %v1526_v49  ;;  %v1523_v1 = vsel %vm886_vm6, %v1521_v0, -inf }
 0x809   : > { %1524 = vmax.xlane.f32.xlu0 %v1523_v1 }
 0x80a   : > { %v3439_v26 = vpop.f32.mrb[14].mxu1 }
 0x80b   : > { %v1824_v28 = vpop.f32.mrb[15].mxu1  ;;  %v1834_v12 = vmul.f32 0.35355338, %v3439_v26 }
 0x80c   : > { %v1833_v30 = vmul.f32 0.35355338, %v1824_v28 }
 0x80d   : > { %v1836_v16 = vadd.f32 %v1834_v12, %v4244_v8 }
 0x80e   : > { %v1835_v14 = vadd.f32 %v1833_v30, %v4244_v8 }
 0x80f   : > { %v1840_v52 = vsel %vm886_vm6, %v1836_v16, -inf }
 0x810   : > { %v1837_v15 = vsel %vm886_vm6, %v1835_v14, -inf }
 0x819   : > { %1948 = vrot.lane.b32.xlu1 %v4181_v61, %s3896_s14 }
 0x81f   : > { %1950 = vrot.lane.b32.xlu0 %v4177_v59, %s3896_s14 }
 0x895   : > { %v1528_v50 = vpop.xlane.xlu1 %1527 }
 0x896   : > { %v1530_v51 = vsub.f32 %v1522_v62, %v1528_v50  ;;  %v1525_v2 = vpop.xlane.xlu0 %1524 }
 0x897   : > { %v1529_v3 = vsub.f32 %v1521_v0, %v1525_v2 }
 0x898   : > { %v1533_v57 = vmul.f32 1.442695, %v1530_v51 }
 0x899   : > { %v1531_v4 = vmul.f32 1.442695, %v1529_v3  ;;  %v1949_v5 = vpop.permute.xlu1 %1948 }
 0x89a   : > { %3810 = vpow2.f32 %v1533_v57  ;;  %3451 = vmatprep.mubr.msk.f32.mxu1 %vm798_vm3, %v1949_v5  ;;  %v1951_v6 = vpop.permute.xlu0 %1950 }
 0x89b   : > { %3812 = vpow2.f32 %v1531_v4  ;;  %3452 = vmatmul.mubr.msk.f32.vlgmr.msra.gmra.mrb[16].mxu1 %vm798_vm3, %v1951_v6  ;;  %v1645_v6 = vld [vmem:[%s3987_s27] sm:$0xff] }
 0x89c   : > { %v4290_v30 = vpack.c.bf16 %v1646_v7, %v1645_v6 }
 0x8a4   : > { %v3811_v9 = vpop.eup %3810 }
 0x8a5   : > { %v3813_v10 = vpop.eup %3812  ;;  %v1538_v11 = vsel %vm886_vm6, %v3811_v9, 0.0 }
 0x8a6   : > { %1539 = vadd.xlane.f32.xlu0 %v1538_v11  ;;  %v1535_v13 = vsel %vm886_vm6, %v3813_v10, 0.0 }
 0x8a7   : > { %1536 = vadd.xlane.f32.xlu1 %v1535_v13 }
 0x8ab   : > { %1838 = vmax.xlane.f32.xlu1 %v1837_v15 }
 0x8af   : > { %1841 = vmax.xlane.f32.xlu1 %v1840_v52 }
 0x8bc   : > { %3744 = vrot.lane.b32.xlu0 %v4093_v31, %s3905_s28 }
 0x933   : > { %v1540_v56 = vpop.xlane.xlu0 %1539 }
 0x934   : > { %3814 = vrcp.f32 %v1540_v56  ;;  %v1537_v17 = vpop.xlane.xlu1 %1536 }
 0x935   : > { %3816 = vrcp.f32 %v1537_v17 }
 0x937   : > { %v3745_v18 = vpop.permute.xlu0 %3744 }
 0x938   : > { %v3747_v19 = vunpack.i.h.bf16 %v3745_v18  ;;  %v3746_v20 = vunpack.i.l.bf16 %v3745_v18  ;;  %v1839_v21 = vpop.xlane.xlu1 %1838 }
 0x93a   : > { %v3580_v22 = vpack.c.bf16 %v3747_v19, %v3746_v20 }
 0x93c   : > { %v1842_v23 = vpop.xlane.xlu1 %1841  ;;  %3581 = vmatprep.subr.bf16.mxu0 %v3580_v22 }
 0x93d   : > { %v1844_v24 = vsub.f32 %v1836_v16, %v1842_v23  ;;  %3583 = vmatpush3.bf16.msra.mxu0 %v3580_v22 }
 0x93e   : > { %v3815_v25 = vpop.eup %3814  ;;  %3585 = vmatprep.subr.bf16.mxu0 %v4290_v30 }
 0x93f   : > { %v3817_v27 = vpop.eup %3816  ;;  %v1847_v29 = vmul.f32 1.442695, %v1844_v24  ;;  %v1544_v33 = vmul.f32 %v3815_v25, %v3811_v9  ;;  %v1647_v9 = vld [vmem:[%s3987_s27 + $0x10] sm:$0xff] }
 0x940   : > { %v1543_v32 = vmul.f32 %v3817_v27, %v3813_v10  ;;  %v1648_v10 = vld [vmem:[%s3987_s27 + $0x18] sm:$0xff] }
 0x941   : > { %3818 = vpow2.f32 %v1847_v29  ;;  %v4297_v11 = vpack.c.bf16 %v1648_v10, %v1647_v9 }
 0x942   : > { %3419 = vmatprep.mubr.msk.f32.mxu0 %vm886_vm6, %v1543_v32 }
 0x943   : > { %3420 = vmatmul.mubr.msk.f32.vlgmr.msra.gmra.mrb[4].mxu0 %vm886_vm6, %v1544_v33 }
 0x944   : > { %3587 = vmatpush3.bf16.msra.mxu0 %v4290_v30 }
 0x945   : > { %3589 = vmatprep.subr.bf16.mxu0 %v4297_v11 }
 0x948   : > { %3591 = vmatpush3.bf16.msra.mxu0 %v4297_v11 }
 0x94b   : > { %v4256_v31 = vpop.eup %3818 }
 0x94c   : > { %v1852_v34 = vsel %vm886_vm6, %v4256_v31, 0.0 }
 0x94d   : > { %1853 = vadd.xlane.f32.xlu0 %v1852_v34 }
 0x963   : > { %1419 = vrot.lane.b32.xlu0 %v4230_v47, %s3906_s29  ;;  %v1843_v47 = vsub.f32 %v1835_v14, %v1839_v21 }
 0x965   : > { %v1845_v48 = vmul.f32 1.442695, %v1843_v47 }
 0x967   : > { %2162 = vrot.lane.b32.xlu0 %v4181_v61, %s3898_s16  ;;  %3820 = vpow2.f32 %v1845_v48 }
 0x96e   : > { %v3453_v35 = vpop.f32.mrb[16].mxu1 }
 0x96f   : > { %v2030_v36 = vpop.f32.mrb[17].mxu1  ;;  %v2040_v37 = vmul.f32 0.35355338, %v3453_v35 }
 0x970   : > { %v2039_v39 = vmul.f32 0.35355338, %v2030_v36 }
 0x971   : > { %v2042_v42 = vadd.f32 %v2040_v37, %v4244_v8  ;;  %v4274_v53 = vpop.eup %3820 }
 0x972   : > { %v2041_v40 = vadd.f32 %v2039_v39, %v4244_v8  ;;  %v1849_v54 = vsel %vm886_vm6, %v4274_v53, 0.0 }
 0x973   : > { %v2046_v43 = vsel %vm886_vm6, %v2042_v42, -inf }
 0x974   : > { %v2043_v41 = vsel %vm886_vm6, %v2041_v40, -inf }
 0x975   : > { %2044 = vmax.xlane.f32.xlu1 %v2043_v41 }
 0x979   : > { %2047 = vmax.xlane.f32.xlu1 %v2046_v43  ;;  %v1734_v43 = vsub.s32 5, %v4065_v55 }
 0x97b   : > { %v4328_v47 = vrot.slane %v4069_v60, %v1734_v43 }
 0x98a   : > { %1204 = vrot.lane.b32.xlu1 %v4226_v45, %s3907_s11 }
 0x98e   : > { %1206 = vrot.lane.b32.xlu1 %v4224_v44, %s3907_s11 }
 0x992   : > { %1421 = vrot.lane.b32.xlu1 %v4228_v46, %s3906_s29 }
 0x9b6   : > { %1850 = vadd.xlane.f32.xlu1 %v1849_v54 }
 0x9da   : > { %v1854_v62 = vpop.xlane.xlu0 %1853 }
 0x9de   : > { %v1420_v46 = vpop.permute.xlu0 %1419 }
 0xa02   : > { %v2045_v58 = vpop.xlane.xlu1 %2044 }
 0xa03   : > { %v2049_v0 = vsub.f32 %v2041_v40, %v2045_v58 }
 0xa05   : > { %v2051_v1 = vmul.f32 1.442695, %v2049_v0 }
 0xa06   : > { %v2048_v49 = vpop.xlane.xlu1 %2047 }
 0xa07   : > { %v2050_v45 = vsub.f32 %v2042_v42, %v2048_v49  ;;  %v2163_v42 = vpop.permute.xlu0 %2162 }
 0xa09   : > { %v2053_v44 = vmul.f32 1.442695, %v2050_v45 }
 0xa0a   : > { %v1205_v26 = vpop.permute.xlu1 %1204 }
 0xa0b   : > { %3822 = vpow2.f32 %v2053_v44  ;;  %1211 = vst.msk [vmem:[#allocation3] sm:$0xff] %vm1210_vm8, %v1205_v26 }
 0xa0c   : > { %1426 = vst.msk [vmem:[#allocation3] sm:$0xff] %vm1425_vm9, %v1420_v46  ;;  %3824 = vpow2.f32 %v2051_v1 }
 0xa0e   : > { %v1207_v28 = vpop.permute.xlu1 %1206 }
 0xa0f   : > { %1212 = vst.msk [vmem:[#allocation3 + $0x8] sm:$0xff] %vm1210_vm8, %v1207_v28 }
 0xa12   : > { %v1422_v50 = vpop.permute.xlu1 %1421 }
 0xa13   : > { %1427 = vst.msk [vmem:[#allocation3 + $0x8] sm:$0xff] %vm1425_vm9, %v1422_v50 }
 0xa15   : > { %v4282_v51 = vpop.eup %3822 }
 0xa16   : > { %v3421_v2 = vpop.f32.mrb[4].mxu0  ;;  %v2058_v3 = vsel %vm886_vm6, %v4282_v51, 0.0  ;;  %v3825_v57 = vpop.eup %3824 }
 0xa17   : > { %2059 = vadd.xlane.f32.xlu1 %v2058_v3  ;;  %v1623_v4 = vpop.f32.mrb[5].mxu0  ;;  %v2055_v5 = vsel %vm886_vm6, %v3825_v57, 0.0 }
 0xa1b   : > { %2056 = vadd.xlane.f32.xlu1 %v2055_v5 }
 0xa2c   : > { %1634 = vrot.lane.b32.xlu1 %v1623_v4, %s3908_s24 }
 0xa30   : > { %1636 = vrot.lane.b32.xlu1 %v3421_v2, %s3908_s24 }
 0xa34   : > { %3749 = vrot.lane.b32.xlu1 %v4188_v63, %s3900_s23 }
 0xa38   : > { %3754 = vrot.lane.b32.xlu1 %v4188_v63, %s3903_s21 }
 0xa3c   : > { %3759 = vrot.lane.b32.xlu1 %v4188_v63, %s3897_s15 }
 0xa40   : > { %2164 = vrot.lane.b32.xlu1 %v4177_v59, %s3898_s16 }
 0xa43   : > { %v1851_v12 = vpop.xlane.xlu1 %1850 }
 0xa44   : > { %3826 = vrcp.f32 %v1851_v12 }
 0xa45   : > { %3828 = vrcp.f32 %v1854_v62  ;;  %v3859_v62 = vld [vmem:[#allocation2] sm:$0xff] }
 0xa4e   : > { %v3827_v17 = vpop.eup %3826 }
 0xa4f   : > { %v3829_v21 = vpop.eup %3828  ;;  %v1857_v24 = vmul.f32 %v3827_v17, %v4274_v53  ;;  %v3858_v53 = vld [vmem:[#allocation2 + $0x8] sm:$0xff] }
 0xa50   : > { %v1858_v32 = vmul.f32 %v3829_v21, %v4256_v31 }
 0xaa4   : > { %v2060_v13 = vpop.xlane.xlu1 %2059 }
 0xaa8   : > { %v2057_v14 = vpop.xlane.xlu1 %2056 }
 0xaa9   : > { %3830 = vrcp.f32 %v2057_v14 }
 0xaaa   : > { %3832 = vrcp.f32 %v2060_v13 }
 0xaac   : > { %v1635_v15 = vpop.permute.xlu1 %1634 }
 0xaad   : > { %1641 = vst.msk [vmem:[#allocation3] sm:$0xff] %vm1640_vm10, %v1635_v15 }
 0xab0   : > { %v1637_v16 = vpop.permute.xlu1 %1636 }
 0xab1   : > { %1642 = vst.msk [vmem:[#allocation3 + $0x8] sm:$0xff] %vm1640_vm10, %v1637_v16 }
 0xab3   : > { %v3831_v25 = vpop.eup %3830 }
 0xab4   : > { %v3750_v52 = vpop.permute.xlu1 %3749  ;;  %v1643_v56 = vld [vmem:[#allocation3] sm:$0xff]  ;;  %v3833_v34 = vpop.eup %3832  ;;  %v2063_v36 = vmul.f32 %v3831_v25, %v3825_v57 }
 0xab5   : > { %v3752_v18 = vunpack.i.h.bf16 %v3750_v52  ;;  %v3751_v19 = vunpack.i.l.bf16 %v3750_v52  ;;  %3430 = vmatprep.mubr.msk.f32.mxu0 %vm611_vm2, %v1643_v56  ;;  %v2064_v40 = vmul.f32 %v3833_v34, %v4282_v51 }
 0xab7   : > { %v3598_v20 = vpack.c.bf16 %v3752_v18, %v3751_v19 }
 0xab8   : > { %v3755_v22 = vpop.permute.xlu1 %3754  ;;  %v1644_v23 = vld [vmem:[#allocation3 + $0x8] sm:$0xff] }
 0xab9   : > { %v3757_v27 = vunpack.i.h.bf16 %v3755_v22  ;;  %v3756_v29 = vunpack.i.l.bf16 %v3755_v22  ;;  %3431 = vmatmul.mubr.msk.f32.vlgmr.msra.gmra.mrb[6].mxu0 %vm611_vm2, %v1644_v23  ;;  %3599 = vmatprep.subr.bf16.mxu0 %v3598_v20 }
 0xaba   : > { %3601 = vmatpush3.bf16.msra.mxu0 %v3598_v20  ;;  %3444 = vmatprep.mubr.msk.f32.mxu0 %vm886_vm6, %v1857_v24 }
 0xabb   : > { %v3608_v33 = vpack.c.bf16 %v3757_v27, %v3756_v29 }
 0xabc   : > { %v3760_v35 = vpop.permute.xlu1 %3759 }
 0xabd   : > { %v3762_v37 = vunpack.i.h.bf16 %v3760_v35  ;;  %v3761_v39 = vunpack.i.l.bf16 %v3760_v35  ;;  %3445 = vmatmul.mubr.msk.f32.vlgmr.msra.gmra.mrb[8].mxu0 %vm886_vm6, %v1858_v32  ;;  %3609 = vmatprep.subr.bf16.mxu0 %v3608_v33 }
 0xabe   : > { %3611 = vmatpush3.bf16.msra.mxu0 %v3608_v33  ;;  %3458 = vmatprep.mubr.msk.f32.mxu0 %vm886_vm6, %v2063_v36 }
 0xabf   : > { %v3612_v41 = vpack.c.bf16 %v3762_v37, %v3761_v39 }
 0xac0   : > { %v2165_v31 = vpop.permute.xlu1 %2164 }
 0xac1   : > { %3459 = vmatmul.mubr.msk.f32.vlgmr.msra.gmra.mrb[10].mxu0 %vm886_vm6, %v2064_v40  ;;  %3614 = vmatprep.subr.msk.bf16.mxu0 %vm4111_vm4, %v3612_v41 }
 0xac2   : > { %3465 = vmatprep.mubr.msk.f32.mxu0 %vm798_vm3, %v2163_v42 }
 0xac7   : > { %3617 = vmatpush3.bf16.xpose.msk.msra.mxu0 %vm4111_vm4, %v3612_v41 }
 0xace   : > { %3466 = vmatmul.mubr.msk.f32.vlgmr.msra.gmra.mrb[12].mxu0 %vm798_vm3, %v2165_v31 }
 0xb8c   : > { %v3432_v48 = vpop.f32.mrb[6].mxu0 }
 0xb8d   : > { %v1731_v54 = vadd.f32 %v3858_v53, %v3432_v48  ;;  %v1721_v58 = vpop.f32.mrb[7].mxu0 }
 0xb8e   : > { %v1730_v0 = vadd.f32 %v3859_v62, %v1721_v58 }
 0xb8f   : > { %v1737_v49 = vadd.f32 %v4328_v47, %v1731_v54 }
 0xb90   : > { %v1736_v45 = vadd.f32 %v4328_v47, %v1730_v0  ;;  %v3446_v1 = vpop.f32.mrb[8].mxu0 }
 0xb91   : > { %1739 = vst.msk [vmem:[#allocation2 + $0x8] sm:$0xff] %vm611_vm2, %v1737_v49  ;;  %v1937_v44 = vpop.f32.mrb[9].mxu0 }
 0xb92   : > { %1947 = vst.msk [vmem:[#allocation3 + $0x8] sm:$0xff] %vm798_vm3, %v3446_v1  ;;  %1946 = vst.msk [vmem:[#allocation3] sm:$0xff] %vm798_vm3, %v1937_v44 }
 0xb93   : > { %1738 = vst.msk [vmem:[#allocation2] sm:$0xff] %vm611_vm2, %v1736_v45 }
 0xb94   : > { %v4336_v60 = vpop.f32.mrb[10].mxu0 }
 0xb95   : > { %v4338_v26 = vpop.f32.mrb[11].mxu0 }
 0xba1   : > { %v3467_v46 = vpop.f32.mrb[12].mxu0 }
 0xba2   : > { %v2254_v28 = vmul.f32 0.35355338, %v3467_v46  ;;  %v2244_v50 = vpop.f32.mrb[13].mxu0 }
 0xba3   : > { %v2253_v51 = vmul.f32 0.35355338, %v2244_v50 }
 0xba4   : > { %v2256_v2 = vadd.f32 %v2254_v28, %v4244_v8 }
 0xba5   : > { %v2255_v3 = vadd.f32 %v2253_v51, %v4244_v8 }
 0xba6   : > { %v2260_v57 = vsel %vm886_vm6, %v2256_v2, -inf }
 0xba7   : > { %2261 = vmax.xlane.f32.xlu1 %v2260_v57  ;;  %v2257_v4 = vsel %vm886_vm6, %v2255_v3, -inf }
 0xba8   : > { %2258 = vmax.xlane.f32.xlu0 %v2257_v4 }
 0xbb8   : > { %3764 = vrot.lane.b32.xlu1 %v4188_v63, %s3901_s20 }
 0xbbc   : > { %2376 = vrot.lane.b32.xlu1 %v4181_v61, %s3904_s26 }
 0xbc0   : > { %2378 = vrot.lane.b32.xlu1 %v4177_v59, %s3904_s26 }
 0xc34   : > { %v2262_v5 = vpop.xlane.xlu1 %2261 }
 0xc35   : > { %v2264_v6 = vsub.f32 %v2256_v2, %v2262_v5  ;;  %v2259_v7 = vpop.xlane.xlu0 %2258 }
 0xc36   : > { %v2263_v9 = vsub.f32 %v2255_v3, %v2259_v7  ;;  %v4388_v7 = vld [vmem:[#allocation2 + $0x8] sm:$0xff] }
 0xc37   : > { %v2267_v10 = vmul.f32 1.442695, %v2264_v6 }
 0xc38   : > { %v2265_v12 = vmul.f32 1.442695, %v2263_v9  ;;  %v3765_v13 = vpop.permute.xlu1 %3764  ;;  %v2690_v9 = vsel %vm611_vm2, %v4388_v7, 0.0 }
 0xc39   : > { %3834 = vpow2.f32 %v2267_v10  ;;  %v3767_v14 = vunpack.i.h.bf16 %v3765_v13  ;;  %v3766_v15 = vunpack.i.l.bf16 %v3765_v13  ;;  %v4392_v10 = vld [vmem:[#allocation2] sm:$0xff] }
 0xc3a   : > { %3836 = vpow2.f32 %v2265_v12 }
 0xc3b   : > { %v3618_v16 = vpack.c.bf16 %v3767_v14, %v3766_v15 }
 0xc3c   : > { %v2377_v29 = vpop.permute.xlu1 %2376 }
 0xc3d   : > { %3619 = vmatprep.subr.bf16.mxu1 %v3618_v16 }
 0xc3e   : > { %3621 = vmatpush3.bf16.msra.mxu1 %v3618_v16  ;;  %v3860_v16 = vld [vmem:[#allocation2 + $0x18] sm:$0xff] }
 0xc40   : > { %v2379_v32 = vpop.permute.xlu1 %2378 }
 0xc43   : > { %v3835_v52 = vpop.eup %3834 }
 0xc44   : > { %v2272_v61 = vsel %vm886_vm6, %v3835_v52, 0.0  ;;  %v3837_v56 = vpop.eup %3836 }
 0xc45   : > { %2273 = vadd.xlane.f32.xlu0 %v2272_v61  ;;  %v2269_v59 = vsel %vm886_vm6, %v3837_v56, 0.0 }
 0xc49   : > { %2270 = vadd.xlane.f32.xlu0 %v2269_v59  ;;  %v3861_v59 = vld [vmem:[#allocation2 + $0x10] sm:$0xff] }
 0xc5f   : > { %3769 = vrot.lane.b32.xlu0 %v4188_v63, %s3902_s25 }
 0xcd2   : > { %v2274_v17 = vpop.xlane.xlu0 %2273 }
 0xcd3   : > { %3838 = vrcp.f32 %v2274_v17 }
 0xcd6   : > { %v2271_v18 = vpop.xlane.xlu0 %2270 }
 0xcd7   : > { %3840 = vrcp.f32 %v2271_v18 }
 0xcda   : > { %v3770_v19 = vpop.permute.xlu0 %3769 }
 0xcdb   : > { %v3772_v20 = vunpack.i.h.bf16 %v3770_v19  ;;  %v3771_v21 = vunpack.i.l.bf16 %v3770_v19 }
 0xcdd   : > { %v3622_v22 = vpack.c.bf16 %v3772_v20, %v3771_v21  ;;  %v3839_v23 = vpop.eup %3838 }
 0xcde   : > { %v2278_v27 = vmul.f32 %v3839_v23, %v3835_v52 }
 0xcdf   : > { %3624 = vmatprep.subr.msk.bf16.mxu1 %vm4111_vm4, %v3622_v22 }
 0xce1   : > { %v3841_v24 = vpop.eup %3840 }
 0xce2   : > { %v2277_v25 = vmul.f32 %v3841_v24, %v3837_v56 }
 0xce4   : > { %3472 = vmatprep.mubr.msk.f32.mxu1 %vm886_vm6, %v2277_v25 }
 0xce5   : > { %3473 = vmatmul.mubr.msk.f32.vlgmr.msra.gmra.mrb[18].mxu1 %vm886_vm6, %v2278_v27 }
 0xce6   : > { %3627 = vmatpush3.bf16.xpose.msk.msra.mxu1 %vm4111_vm4, %v3622_v22  ;;  %3479 = vmatprep.mubr.msk.f32.mxu1 %vm798_vm3, %v2377_v29 }
 0xced   : > { %3480 = vmatmul.mubr.msk.f32.vlgmr.msra.gmra.mrb[20].mxu1 %vm798_vm3, %v2379_v32 }
 0xdb8   : > { %v3474_v33 = vpop.f32.mrb[18].mxu1 }
 0xdb9   : > { %v2357_v34 = vpop.f32.mrb[19].mxu1 }
 0xdc0   : > { %v3481_v35 = vpop.f32.mrb[20].mxu1 }
 0xdc1   : > { %v2468_v36 = vmul.f32 0.35355338, %v3481_v35  ;;  %v2458_v37 = vpop.f32.mrb[21].mxu1 }
 0xdc2   : > { %v2467_v39 = vmul.f32 0.35355338, %v2458_v37  ;;  %v2756_v37 = vld [vmem:[%s3992_s30 + $0x8] sm:$0xff] }
 0xdc3   : > { %v2470_v40 = vadd.f32 %v2468_v36, %v4244_v8  ;;  %v2755_v36 = vld [vmem:[%s3992_s30] sm:$0xff] }
 0xdc4   : > { %v2469_v41 = vadd.f32 %v2467_v39, %v4244_v8  ;;  %v3640_v39 = vpack.c.bf16 %v2756_v37, %v2755_v36 }
 0xdc5   : > { %v2474_v42 = vsel %vm886_vm6, %v2470_v40, -inf }
 0xdc6   : > { %2475 = vmax.xlane.f32.xlu1 %v2474_v42  ;;  %v2471_v38 = vsel %vm886_vm6, %v2469_v41, -inf  ;;  %3641 = vmatprep.subr.bf16.mxu1 %v3640_v39 }
 0xdc7   : > { %2472 = vmax.xlane.f32.xlu0 %v2471_v38  ;;  %3643 = vmatpush3.bf16.msra.mxu1 %v3640_v39  ;;  %v2769_v39 = vsub.s32 6, %v4065_v55 }
 0xdd7   : > { %3774 = vrot.lane.b32.xlu1 %v4188_v63, %s3905_s28 }
 0xddb   : > { %2156 = vrot.lane.b32.xlu1 %v4336_v60, %s3907_s11 }
 0xddf   : > { %2368 = vrot.lane.b32.xlu1 %v2357_v34, %s3906_s29 }
 0xe53   : > { %v2476_v31 = vpop.xlane.xlu1 %2475 }
 0xe54   : > { %v2478_v43 = vsub.f32 %v2470_v40, %v2476_v31  ;;  %v2473_v48 = vpop.xlane.xlu0 %2472  ;;  %v2757_v40 = vld [vmem:[%s3992_s30 + $0x10] sm:$0xff] }
 0xe55   : > { %v2477_v53 = vsub.f32 %v2469_v41, %v2473_v48  ;;  %v2758_v41 = vld [vmem:[%s3992_s30 + $0x18] sm:$0xff] }
 0xe56   : > { %v2481_v54 = vmul.f32 1.442695, %v2478_v43  ;;  %v3644_v42 = vpack.c.bf16 %v2758_v41, %v2757_v40 }
 0xe57   : > { %v2479_v8 = vmul.f32 1.442695, %v2477_v53  ;;  %v3775_v58 = vpop.permute.xlu1 %3774 }
 0xe58   : > { %v3777_v62 = vunpack.i.h.bf16 %v3775_v58  ;;  %v3776_v0 = vunpack.i.l.bf16 %v3775_v58  ;;  %3645 = vmatprep.subr.bf16.mxu1 %v3644_v42 }
 0xe59   : > { %3842 = vpow2.f32 %v2479_v8  ;;  %3647 = vmatpush3.bf16.msra.mxu1 %v3644_v42 }
 0xe5a   : > { %v3628_v49 = vpack.c.bf16 %v3777_v62, %v3776_v0  ;;  %3844 = vpow2.f32 %v2481_v54 }
 0xe5b   : > { %v2157_v45 = vpop.permute.xlu1 %2156 }
 0xe5c   : > { %2161 = vst.msk [vmem:[#allocation3 + $0x8] sm:$0xff] %vm1210_vm8, %v2157_v45  ;;  %3629 = vmatprep.subr.bf16.mxu0 %v3628_v49 }
 0xe5d   : > { %3631 = vmatpush3.bf16.msra.mxu0 %v3628_v49 }
 0xe5e   : > { %3633 = vmatprep.subr.bf16.mxu0 %v4290_v30 }
 0xe5f   : > { %v2369_v51 = vpop.permute.xlu1 %2368 }
 0xe63   : > { %v3843_v63 = vpop.eup %3842 }
 0xe64   : > { %v2483_v1 = vsel %vm886_vm6, %v3843_v63, 0.0  ;;  %v3845_v44 = vpop.eup %3844 }
 0xe65   : > { %2484 = vadd.xlane.f32.xlu0 %v2483_v1  ;;  %v2486_v60 = vsel %vm886_vm6, %v3845_v44, 0.0 }
 0xe69   : > { %2487 = vadd.xlane.f32.xlu0 %v2486_v60 }
 0xe7f   : > { %2154 = vrot.lane.b32.xlu0 %v4338_v26, %s3907_s11 }
 0xe83   : > { %2370 = vrot.lane.b32.xlu0 %v3474_v33, %s3906_s29 }
 0xef2   : > { %v2485_v46 = vpop.xlane.xlu0 %2484 }
 0xef3   : > { %3846 = vrcp.f32 %v2485_v46  ;;  %v2741_v46 = vsub.s32 2, %v4065_v55 }
 0xef6   : > { %v2488_v28 = vpop.xlane.xlu0 %2487 }
 0xef7   : > { %3848 = vrcp.f32 %v2488_v28  ;;  %v2749_v28 = vsub.s32 3, %v4065_v55 }
 0xefa   : > { %v2155_v50 = vpop.permute.xlu0 %2154 }
 0xefb   : > { %2160 = vst.msk [vmem:[#allocation3] sm:$0xff] %vm1210_vm8, %v2155_v50  ;;  %v4427_v50 = vld [vmem:[%s4002_s17] sm:$0xff] }
 0xefc   : > { %2374 = vst.msk [vmem:[#allocation3] sm:$0xff] %vm1425_vm9, %v2369_v51  ;;  %v2742_v51 = vrot.slane %v4427_v50, %v2741_v46  ;;  %v2770_v40 = vrot.slane %v4427_v50, %v2769_v39 }
 0xefd   : > { %v3847_v2 = vpop.eup %3846 }
 0xefe   : > { %v2371_v3 = vpop.permute.xlu0 %2370  ;;  %v2491_v57 = vmul.f32 %v3847_v2, %v3843_v63 }
 0xeff   : > { %2375 = vst.msk [vmem:[#allocation3 + $0x8] sm:$0xff] %vm1425_vm9, %v2371_v3 }
 0xf00   : > { %3486 = vmatprep.mubr.msk.f32.mxu0 %vm886_vm6, %v2491_v57 }
 0xf01   : > { %v3849_v26 = vpop.eup %3848 }
 0xf02   : > { %v2492_v4 = vmul.f32 %v3849_v26, %v3845_v44 }
 0xf04   : > { %3487 = vmatmul.mubr.msk.f32.vlgmr.msra.gmra.mrb[14].mxu0 %vm886_vm6, %v2492_v4  ;;  %v2750_v4 = vrot.slane %v4427_v50, %v2749_v28 }
 0xf05   : > { %3635 = vmatpush3.bf16.msra.mxu0 %v4290_v30  ;;  %v2687_v30 = vsel %vm611_vm2, %v4392_v10, 0.0 }
 0xf06   : > { %3637 = vmatprep.subr.bf16.mxu0 %v4297_v11 }
 0xf09   : > { %3639 = vmatpush3.bf16.msra.mxu0 %v4297_v11 }
 0xfd7   : > { %v3488_v5 = vpop.f32.mrb[14].mxu0 }
 0xfd8   : > { %2584 = vrot.lane.b32.xlu0 %v3488_v5, %s3908_s24  ;;  %v2571_v6 = vpop.f32.mrb[15].mxu0 }
 0xfd9   : > { %2582 = vrot.lane.b32.xlu1 %v2571_v6, %s3908_s24 }
 0xff7   : > { %2691 = vadd.xlane.f32.xlu0 %v2690_v9 }
 0xffd   : > { %2688 = vadd.xlane.f32.xlu1 %v2687_v30 }
0x104a   : > { %v2585_v12 = vpop.permute.xlu0 %2584 }
0x104b   : > { %2589 = vst.msk [vmem:[#allocation3 + $0x8] sm:$0xff] %vm1640_vm10, %v2585_v12  ;;  %v2583_v11 = vpop.permute.xlu1 %2582  ;;  %v2759_v12 = vld [vmem:[%s3997_s13] sm:$0xff] }
0x104c   : > { %2588 = vst.msk [vmem:[#allocation3] sm:$0xff] %vm1640_vm10, %v2583_v11  ;;  %v2760_v11 = vld [vmem:[%s3997_s13 + $0x8] sm:$0xff] }
0x1052   : > { %v2591_v14 = vld [vmem:[#allocation3 + $0x8] sm:$0xff] }
0x1053   : > { %v2590_v13 = vld [vmem:[#allocation3] sm:$0xff] }
0x1054   : > { %3497 = vmatprep.mubr.msk.f32.mxu0 %vm611_vm2, %v2590_v13  ;;  %v2761_v13 = vld [vmem:[%s3997_s13 + $0x10] sm:$0xff] }
0x1055   : > { %3498 = vmatmul.mubr.msk.f32.vlgmr.msra.gmra.mrb[16].mxu0 %vm611_vm2, %v2591_v14  ;;  %v3648_v14 = vpack.c.bf16 %v2760_v11, %v2759_v12 }
0x1057   : > { %3649 = vmatprep.subr.bf16.mxu0 %v3648_v14 }
0x1058   : > { %3651 = vmatpush3.bf16.msra.mxu0 %v3648_v14 }
0x1084   : > { %v2692_v56 = vpop.xlane.xlu0 %2691 }
0x1085   : > { %v2700_v21 = vmul.f32 0.03125, %v2692_v56 }
0x1087   : > { %v2704_v23 = vsub.f32 %v4388_v7, %v2700_v21 }
0x1089   : > { %v2708_v29 = vmul.f32 %v2704_v23, %v2704_v23 }
0x108a   : > { %v2689_v18 = vpop.xlane.xlu1 %2688 }
0x108b   : > { %v2699_v22 = vmul.f32 0.03125, %v2689_v18  ;;  %v2714_v34 = vsel %vm611_vm2, %v2708_v29, 0.0 }
0x108d   : > { %v2703_v24 = vsub.f32 %v4392_v10, %v2699_v22 }
0x108f   : > { %v2707_v33 = vmul.f32 %v2703_v24, %v2703_v24 }
0x1091   : > { %v2711_v35 = vsel %vm611_vm2, %v2707_v33, 0.0 }
0x1128   : > { %v3499_v15 = vpop.f32.mrb[16].mxu0 }
0x1129   : > { %v2678_v52 = vadd.f32 %v3860_v16, %v3499_v15  ;;  %v2668_v61 = vpop.f32.mrb[17].mxu0  ;;  %v2762_v15 = vld [vmem:[%s3997_s13 + $0x18] sm:$0xff] }
0x112a   : > { %v2677_v17 = vadd.f32 %v3861_v59, %v2668_v61  ;;  %v3652_v16 = vpack.c.bf16 %v2762_v15, %v2761_v13  ;;  %v2764_v61 = vld [vmem:[%s3997_s13 + $0x28] sm:$0xff]  ;;  %v2765_v59 = vld [vmem:[%s3997_s13 + $0x30] sm:$0xff] }
0x112b   : > { %v2680_v19 = vadd.f32 %v2678_v52, %v4328_v47  ;;  %v2763_v52 = vld [vmem:[%s3997_s13 + $0x20] sm:$0xff] }
0x112c   : > { %v2679_v20 = vadd.f32 %v2677_v17, %v4328_v47  ;;  %3653 = vmatprep.subr.bf16.mxu0 %v3652_v16  ;;  %v3656_v56 = vpack.c.bf16 %v2764_v61, %v2763_v52  ;;  %v2766_v17 = vld [vmem:[%s3997_s13 + $0x38] sm:$0xff] }
0x112d   : > { %2682 = vst.msk [vmem:[#allocation2 + $0x18] sm:$0xff] %vm611_vm2, %v2680_v19  ;;  %3655 = vmatpush3.bf16.msra.mxu0 %v3652_v16  ;;  %v3660_v18 = vpack.c.bf16 %v2766_v17, %v2765_v59 }
0x112e   : > { %2681 = vst.msk [vmem:[#allocation2 + $0x10] sm:$0xff] %vm611_vm2, %v2679_v20  ;;  %3657 = vmatprep.subr.bf16.mxu0 %v3656_v56 }
0x1131   : > { %3659 = vmatpush3.bf16.msra.mxu0 %v3656_v56 }
0x1132   : > { %3661 = vmatprep.subr.bf16.mxu0 %v3660_v18 }
0x1134   : > { %v4406_v25 = vld [vmem:[#allocation2 + $0x18] sm:$0xff] }
0x1135   : > { %v2696_v27 = vsel %vm611_vm2, %v4406_v25, 0.0  ;;  %v4410_v47 = vld [vmem:[#allocation2 + $0x10] sm:$0xff]  ;;  %3663 = vmatpush3.bf16.msra.mxu0 %v3660_v18 }
0x1136   : > { %2697 = vadd.xlane.f32.xlu1 %v2696_v27  ;;  %v2693_v32 = vsel %vm611_vm2, %v4410_v47, 0.0 }
0x1137   : > { %2694 = vadd.xlane.f32.xlu0 %v2693_v32 }
0x113a   : > { %2715 = vadd.xlane.f32.xlu1 %v2714_v34 }
0x113b   : > { %2712 = vadd.xlane.f32.xlu0 %v2711_v35 }
0x11c3   : > { %v2698_v38 = vpop.xlane.xlu1 %2697 }
0x11c4   : > { %v2702_v31 = vmul.f32 0.03125, %v2698_v38  ;;  %v2695_v43 = vpop.xlane.xlu0 %2694 }
0x11c5   : > { %v2701_v48 = vmul.f32 0.03125, %v2695_v43 }
0x11c6   : > { %v2706_v53 = vsub.f32 %v4406_v25, %v2702_v31 }
0x11c7   : > { %v2705_v54 = vsub.f32 %v4410_v47, %v2701_v48  ;;  %v2716_v8 = vpop.xlane.xlu1 %2715 }
0x11c8   : > { %v2724_v58 = vmul.f32 0.03125, %v2716_v8  ;;  %v2713_v62 = vpop.xlane.xlu0 %2712  ;;  %v2710_v0 = vmul.f32 %v2706_v53, %v2706_v53 }
0x11c9   : > { %v2723_v49 = vmul.f32 0.03125, %v2713_v62  ;;  %v2709_v45 = vmul.f32 %v2705_v54, %v2705_v54 }
0x11ca   : > { %v2728_v63 = vadd.f32 1e-12, %v2724_v58  ;;  %v2720_v1 = vsel %vm611_vm2, %v2710_v0, 0.0 }
0x11cb   : > { %v2727_v44 = vadd.f32 1e-12, %v2723_v49  ;;  %2721 = vadd.xlane.f32.xlu1 %v2720_v1  ;;  %v2717_v60 = vsel %vm611_vm2, %v2709_v45, 0.0  ;;  %v2874_v49 = vsub.s32 7, %v4065_v55 }
0x11cc   : > { %3850 = vrsqrt.f32 %v2728_v63  ;;  %2718 = vadd.xlane.f32.xlu0 %v2717_v60 }
0x11cd   : > { %3852 = vrsqrt.f32 %v2727_v44  ;;  %v2875_v45 = vrot.slane %v4427_v50, %v2874_v49 }
0x11d6   : > { %v3851_v2 = vpop.eup %3850 }
0x11d7   : > { %v3853_v3 = vpop.eup %3852  ;;  %v2736_v57 = vmul.f32 %v3851_v2, %v2704_v23 }
0x11d8   : > { %v2735_v26 = vmul.f32 %v3853_v3, %v2703_v24 }
0x11d9   : > { %v2744_v5 = vmul.f32 %v2742_v51, %v2736_v57 }
0x11da   : > { %v2743_v6 = vmul.f32 %v2742_v51, %v2735_v26 }
0x11db   : > { %v2752_v30 = vadd.f32 %v2750_v4, %v2744_v5 }
0x11dc   : > { %v2751_v9 = vadd.f32 %v2750_v4, %v2743_v6 }
0x11de   : > { %3508 = vmatprep.mubr.msk.f32.mxu1 %vm611_vm2, %v2751_v9 }
0x11df   : > { %3509 = vmatmul.mubr.msk.f32.vlgmr.msra.gmra.mrb[22].mxu1 %vm611_vm2, %v2752_v30 }
0x1258   : > { %v2722_v19 = vpop.xlane.xlu1 %2721 }
0x1259   : > { %v2726_v20 = vmul.f32 0.03125, %v2722_v19  ;;  %v2719_v21 = vpop.xlane.xlu0 %2718 }
0x125a   : > { %v2725_v22 = vmul.f32 0.03125, %v2719_v21 }
0x125b   : > { %v2730_v23 = vadd.f32 1e-12, %v2726_v20 }
0x125c   : > { %v2729_v24 = vadd.f32 1e-12, %v2725_v22 }
0x125d   : > { %3854 = vrsqrt.f32 %v2730_v23 }
0x125e   : > { %3856 = vrsqrt.f32 %v2729_v24 }
0x1267   : > { %v3855_v27 = vpop.eup %3854 }
0x1268   : > { %v3857_v29 = vpop.eup %3856  ;;  %v2738_v32 = vmul.f32 %v3855_v27, %v2706_v53 }
0x1269   : > { %v2737_v33 = vmul.f32 %v3857_v29, %v2705_v54 }
0x126a   : > { %v2746_v34 = vmul.f32 %v2742_v51, %v2738_v32 }
0x126b   : > { %v2745_v35 = vmul.f32 %v2742_v51, %v2737_v33 }
0x126c   : > { %v2754_v37 = vadd.f32 %v2750_v4, %v2746_v34 }
0x126d   : > { %v2753_v36 = vadd.f32 %v2750_v4, %v2745_v35 }
0x126f   : > { %3511 = vmatprep.mubr.msk.f32.mxu1 %vm611_vm2, %v2753_v36 }
0x1270   : > { %3512 = vmatmul.mubr.msk.f32.gmra.mrb[24].mxu1 %vm611_vm2, %v2754_v37 }
0x12b2   : > { %v3510_v41 = vpop.f32.mrb[22].mxu1 }
0x12b3   : > { %v2855_v42 = vadd.f32 %v3510_v41, %v2770_v40  ;;  %v2849_v38 = vpop.f32.mrb[23].mxu1 }
0x12b4   : > { %v2850_v31 = vadd.f32 %v2849_v38, %v2770_v40 }
0x12b5   : > { %v2869_v48 = vmax.f32 %v2855_v42, 0.0 }
0x12b6   : > { %v2868_v43 = vmax.f32 %v2850_v31, 0.0  ;;  %v3227_v31 = vld [vmem:[%s4493_s4 + $0x3] ss:$0 sm:$0xff] (!%p3226_p10) }
0x12b8   : > { %3530 = vmatprep.mubr.msk.f32.mxu0 %vm2876_vm11, %v2868_v43 }
0x12b9   : > { %3531 = vmatmul.mubr.msk.f32.vlgmr.msra.gmra.mrb[18].mxu0 %vm2876_vm11, %v2869_v48  ;;  %v3228_v48 = vld [vmem:[%s4493_s4 + $0x4] ss:$0 sm:$0xff] (!%p3226_p10) }
0x1343   : > { %v3513_v53 = vpop.f32.mrb[24].mxu1 }
0x1344   : > { %v2865_v54 = vadd.f32 %v3513_v53, %v2770_v40  ;;  %v2859_v8 = vpop.f32.mrb[25].mxu1 }
0x1345   : > { %v2860_v58 = vadd.f32 %v2859_v8, %v2770_v40 }
0x1346   : > { %v2871_v0 = vmax.f32 %v2865_v54, 0.0 }
0x1347   : > { %v2870_v62 = vmax.f32 %v2860_v58, 0.0 }
0x1349   : > { %3533 = vmatprep.mubr.msk.f32.mxu0 %vm2876_vm11, %v2870_v62 }
0x134a   : > { %3534 = vmatmul.mubr.msk.f32.gmra.mrb[20].mxu0 %vm2876_vm11, %v2871_v0 }
0x138c   : > { %v3532_v63 = vpop.f32.mrb[18].mxu0 }
0x138d   : > { %v2961_v1 = vadd.f32 %v3532_v63, %v2875_v45  ;;  %v2955_v44 = vpop.f32.mrb[19].mxu0 }
0x138e   : > { %v2956_v60 = vadd.f32 %v2955_v44, %v2875_v45 }
0x138f   : > { %v2975_v46 = vadd.f32 %v2961_v1, %v4388_v7 }
0x1390   : > { %v2974_v28 = vadd.f32 %v2956_v60, %v4392_v10 }
0x1391   : > { %2979 = vst.msk [vmem:[#allocation2 + $0x8] sm:$0xff] %vm611_vm2, %v2975_v46 }
0x1392   : > { %2978 = vst.msk [vmem:[#allocation2] sm:$0xff] %vm611_vm2, %v2974_v28 }
0x1398   : > { %v2987_v26 = vld [vmem:[#allocation2 + $0x8] sm:$0xff] (!%p3226_p10) }
0x1399   : > { %v2986_v7 = vld [vmem:[#allocation2] sm:$0xff] (!%p3226_p10) }
0x139a   : > { %v2992_v4 = vsel (!%p3226_p10), %vm611_vm2, %v2986_v7, 0.0 }
0x139b   : > { %2993 = vadd.xlane.f32.xlu0 (!%p3226_p10), %v2992_v4 }
0x141d   : > { %v3535_v51 = vpop.f32.mrb[20].mxu0  ;;  %2985 = sbr.rel (%p3226_p10) target bundleno = 5481 (0x1569), region = 64 }
0x141e   : > { %v2971_v2 = vadd.f32 %v3535_v51, %v2875_v45  ;;  %v2965_v3 = vpop.f32.mrb[21].mxu0 }
0x141f   : > { %v2966_v57 = vadd.f32 %v2965_v3, %v2875_v45 }
0x1420   : > { %v2977_v55 = vadd.f32 %v2971_v2, %v4406_v25  ;;  %v2995_v25 = vsel (!%p3226_p10), %vm611_vm2, %v2987_v26, 0.0 }
0x1421   : > { %v2976_v50 = vadd.f32 %v2966_v57, %v4410_v47  ;;  %2996 = vadd.xlane.f32.xlu0 (!%p3226_p10), %v2995_v25 }
0x1422   : > { %2981 = vst.msk [vmem:[#allocation2 + $0x18] sm:$0xff] %vm611_vm2, %v2977_v55 }
0x1423   : > { %2980 = vst.msk [vmem:[#allocation2 + $0x10] sm:$0xff] %vm611_vm2, %v2976_v50 }
0x1428   : > { %v2994_v9 = vpop.xlane.xlu0 %2993 }
0x1429   : > { %v2989_v6 = vld [vmem:[#allocation2 + $0x18] sm:$0xff]  ;;  %v3004_v12 = vmul.f32 0.03125, %v2994_v9 }
0x142a   : > { %v2988_v10 = vld [vmem:[#allocation2 + $0x10] sm:$0xff]  ;;  %v3001_v47 = vsel %vm611_vm2, %v2989_v6, 0.0 }
0x142b   : > { %v2998_v5 = vsel %vm611_vm2, %v2988_v10, 0.0  ;;  %v3008_v13 = vsub.f32 %v2986_v7, %v3004_v12 }
0x142c   : > { %2999 = vadd.xlane.f32.xlu1 %v2998_v5 }
0x142d   : > { %v3012_v56 = vmul.f32 %v3008_v13, %v3008_v13 }
0x142f   : > { %v3016_v19 = vsel %vm611_vm2, %v3012_v56, 0.0 }
0x1430   : > { %3002 = vadd.xlane.f32.xlu1 %v3001_v47  ;;  %3017 = vadd.xlane.f32.xlu0 %v3016_v19 }
0x14ae   : > { %v2997_v15 = vpop.xlane.xlu0 %2996 }
0x14af   : > { %v3005_v52 = vmul.f32 0.03125, %v2997_v15 }
0x14b1   : > { %v3009_v17 = vsub.f32 %v2987_v26, %v3005_v52 }
0x14b3   : > { %v3013_v21 = vmul.f32 %v3009_v17, %v3009_v17 }
0x14b5   : > { %v3019_v23 = vsel %vm611_vm2, %v3013_v21, 0.0 }
0x14b6   : > { %3020 = vadd.xlane.f32.xlu1 %v3019_v23 }
0x14b9   : > { %v3000_v30 = vpop.xlane.xlu1 %2999 }
0x14ba   : > { %v3006_v11 = vmul.f32 0.03125, %v3000_v30 }
0x14bc   : > { %v3010_v14 = vsub.f32 %v2988_v10, %v3006_v11 }
0x14bd   : > { %v3003_v16 = vpop.xlane.xlu1 %3002  ;;  %v3018_v27 = vpop.xlane.xlu0 %3017 }
0x14be   : > { %v3007_v61 = vmul.f32 0.03125, %v3003_v16  ;;  %v3014_v59 = vmul.f32 %v3010_v14, %v3010_v14  ;;  %v3028_v29 = vmul.f32 0.03125, %v3018_v27 }
0x14c0   : > { %v3011_v18 = vsub.f32 %v2989_v6, %v3007_v61  ;;  %v3022_v20 = vsel %vm611_vm2, %v3014_v59, 0.0  ;;  %v3032_v32 = vadd.f32 1e-12, %v3028_v29 }
0x14c1   : > { %3023 = vadd.xlane.f32.xlu0 %v3022_v20 }
0x14c2   : > { %v3015_v22 = vmul.f32 %v3011_v18, %v3011_v18  ;;  %3863 = vrsqrt.f32 %v3032_v32 }
0x14c4   : > { %v3025_v24 = vsel %vm611_vm2, %v3015_v22, 0.0 }
0x14c5   : > { %3026 = vadd.xlane.f32.xlu1 %v3025_v24 }
0x14cc   : > { %v3864_v38 = vpop.eup %3863 }
0x14cd   : > { %v3040_v43 = vmul.f32 %v3864_v38, %v3008_v13 }
0x14cf   : > { %v3048_v53 = vmul.f32 %v3227_v31, %v3040_v43 }
0x14d1   : > { %v3056_v58 = vadd.f32 %v3228_v48, %v3048_v53 }
0x14d3   : > { %3060 = vst.msk [vmem:[%s4499_s10] sm:$0xff] %vm611_vm2, %v3056_v58 }
0x1543   : > { %v3021_v33 = vpop.xlane.xlu1 %3020 }
0x1544   : > { %v3029_v35 = vmul.f32 0.03125, %v3021_v33 }
0x1546   : > { %v3033_v37 = vadd.f32 1e-12, %v3029_v35 }
0x1548   : > { %3865 = vrsqrt.f32 %v3033_v37 }
0x154e   : > { %v3024_v34 = vpop.xlane.xlu0 %3023 }
0x154f   : > { %v3030_v36 = vmul.f32 0.03125, %v3024_v34 }
0x1551   : > { %v3034_v39 = vadd.f32 1e-12, %v3030_v36 }
0x1552   : > { %v3027_v40 = vpop.xlane.xlu1 %3026  ;;  %v3866_v54 = vpop.eup %3865 }
0x1553   : > { %v3031_v41 = vmul.f32 0.03125, %v3027_v40  ;;  %3867 = vrsqrt.f32 %v3034_v39  ;;  %v3041_v62 = vmul.f32 %v3866_v54, %v3009_v17 }
0x1555   : > { %v3035_v42 = vadd.f32 1e-12, %v3031_v41  ;;  %v3049_v49 = vmul.f32 %v3227_v31, %v3041_v62 }
0x1557   : > { %3869 = vrsqrt.f32 %v3035_v42  ;;  %v3057_v1 = vadd.f32 %v3228_v48, %v3049_v49 }
0x1559   : > { %3061 = vst.msk [vmem:[%s4499_s10 + $0x8] sm:$0xff] %vm611_vm2, %v3057_v1 }
0x155d   : > { %v3868_v8 = vpop.eup %3867 }
0x155e   : > { %v3042_v0 = vmul.f32 %v3868_v8, %v3010_v14 }
0x1560   : > { %v3050_v63 = vmul.f32 %v3227_v31, %v3042_v0 }
0x1561   : > { %v3870_v45 = vpop.eup %3869 }
0x1562   : > { %v3043_v44 = vmul.f32 %v3870_v45, %v3011_v18  ;;  %v3058_v60 = vadd.f32 %v3228_v48, %v3050_v63 }
0x1564   : > { %v3051_v46 = vmul.f32 %v3227_v31, %v3043_v44  ;;  %3062 = vst.msk [vmem:[%s4499_s10 + $0x10] sm:$0xff] %vm611_vm2, %v3058_v60 }
0x1566   : > { %v3059_v28 = vadd.f32 %v3228_v48, %v3051_v46 }
0x1568   : > { %3063 = vst.msk [vmem:[%s4499_s10 + $0x18] sm:$0xff] %vm611_vm2, %v3059_v28 }
0x1569 PF: > { %s26_s18 = sadd.s32 1, %s3891_s18  }
0x156a   : > { %p23_p11 = scmp.ge.s32.totalorder %s26_s18, 4  }
0x156c   :  { %25 = sbr.rel (!%p23_p11) target bundleno = 16 (0x10), region = 102 }

// kernel: asr_forward.3
= control target key start
LH: loop header
LB: loop body
LE: loop exit
PB: predicated region body
PF: predicated region fallthrough
CT: control target
= control target key end

     0   :  { %s6451_s0 = inlined_call_operand.vmem [shape: s32[2], index: 0, kind: input, shape index: {}]   ;;  %s6452_s2 = inlined_call_operand.vmem [shape: f32[16,32], index: 2, kind: input, shape index: {}]   ;;  %s6453_s3 = inlined_call_operand.vmem [shape: f32[32,32], index: 3, kind: input, shape index: {}]   ;;  %s6454_s4 = inlined_call_operand.vmem [shape: s32[16,1], index: 4, kind: input, shape index: {}]   ;;  %s6455_s5 = inlined_call_operand.vmem [shape: f32[3,32], index: 5, kind: input, shape index: {}]   ;;  %s6456_s6 = inlined_call_operand.vmem [shape: f32[32,16], index: 6, kind: input, shape index: {}]   ;;  %s6457_s7 = inlined_call_operand.vmem [shape: f32[2,32,96], index: 7, kind: input, shape index: {}]   ;;  %s6458_s8 = inlined_call_operand.vmem [shape: f32[2,32,32], index: 8, kind: input, shape index: {}]   ;;  %s6459_s9 = inlined_call_operand.vmem [shape: f32[2,32,32], index: 9, kind: input, shape index: {}]   ;;  %s6460_s10 = inlined_call_operand.vmem [shape: f32[2,32,64], index: 10, kind: input, shape index: {}]   ;;  %s6461_s11 = inlined_call_operand.vmem [shape: f32[2,32,32], index: 11, kind: input, shape index: {}]   ;;  %s6462_s12 = inlined_call_operand.vmem [shape: f32[2,32,64], index: 12, kind: input, shape index: {}]   ;;  %s6463_s13 = inlined_call_operand.vmem [shape: f32[2,64,32], index: 13, kind: input, shape index: {}]   ;;  %s6464_s14 = inlined_call_operand.vmem [shape: f32[2,13,96], index: 14, kind: input, shape index: {}]   ;;  %s6465_s15 = inlined_call_operand.hbm [shape: f32[1,1], index: 15, kind: output, shape index: {}]   ;;  %s6466_s1 = inlined_call_operand.vmem [shape: s32[2], index: 1, kind: input, shape index: {}]  }
   0x1   :  { %6471 = sst [smem:[#allocation12_spill]] %s6457_s7  ;;  %s20_s20 = sshll.u32 %s6451_s0, 4  ;;  %s21_s20 = int_to_ptr.vmem [resolvable:$true] %s20_s20 }
   0x2   :  { %6472 = sst [smem:[#allocation13_spill]] %s6458_s8  ;;  %s24_s23 = sshll.u32 %s6466_s1, 4  ;;  %s25_s23 = int_to_ptr.vmem [resolvable:$true] %s24_s23 }
   0x3   :  { %6473 = sst [smem:[#allocation14_spill]] %s6459_s9  ;;  %s5618_s24 = scalar_lea.vmem %s21_s20, 16 }
   0x4   :  { %6474 = sst [smem:[#allocation15_spill]] %s6465_s15  ;;  %p5619_p0 = scmp.ne.s32.totalorder %s21_s20, %s5618_s24 }
   0x5   :  { %p5623_p1 = scmp.lt.s32.totalorder %s21_s20, %s21_s20  ;;  %p5624_p2 = scmp.lt.s32.totalorder %s5618_s24, %s5618_s24 }
   0x7   :  { %p5625_p3 = por %p5624_p2, %p5623_p1 }
   0x9   :  { %p5626_p4 = pnand %p5625_p3, %p5619_p0 }
   0xb   :  { %5629 = shalt.err (!%p5626_p4)  }
   0xc   :  { %s5668_s25 = smov [#allocation5]   ;;  %s5630_s26 = scalar_lea.vmem %s25_s23, 16 }
   0xd   :  { %23 = dma.vmem_to_smem %s21_s20, 16, %s5668_s25, [#allocation4] }
   0xe   :  { %p5631_p5 = scmp.ne.s32.totalorder %s25_s23, %s5630_s26  ;;  %p5635_p6 = scmp.lt.s32.totalorder %s25_s23, %s25_s23 }
   0xf   :  { %p5636_p7 = scmp.lt.s32.totalorder %s5630_s26, %s5630_s26 }
  0x11   :  { %p5637_p8 = por %p5636_p7, %p5635_p6 }
  0x13   :  { %p5638_p9 = pnand %p5637_p8, %p5631_p5 }
  0x15   :  { %5641 = shalt.err (!%p5638_p9)  }
  0x16   :  { %s5669_s0 = smov [#allocation6]  }
  0x17   :  { %27 = dma.vmem_to_smem %s25_s23, 16, %s5669_s0, [#allocation4] }
  0x18   :  { %5658 = dma.done.wait [#allocation4], 32 }
  0x19   :  { %5659 = vsyncadd [#allocation4], 4294967264 }
  0x1a   :  { %29 = sfence }
  0x1b   :  { %30 = vsyncpa [#allocation8], 0  ;;  %s5778_s1 = smov 0  }
  0x1c LB: > { %6475 = sst [smem:[#allocation11_spill]] %s5666_s1  ;;  %s5784_s27 = sadd.s32 4294967295, %s5666_s1   ;;  %s5666_s1 = sphi %s5778_s1, %s36_s1  }
  0x1d   : > { %p4702_p10 = scmp.ge.s32.totalorder %s5666_s1, 1  ;;  %p465_p11 = scmp.lt.s32.totalorder %s5666_s1, 3 }
  0x1f   : > { %p466_p12 = pnand %p4702_p10, %p465_p11 }
  0x20   : > { %p539_p13 = scmp.lt.s32.totalorder (!%p466_p12), %s5784_s27, 1  ;;  %s6476_s7 = sld [smem:[#allocation12_spill]] (!%p466_p12) }
  0x21   : > { %469 = sbr.rel (%p466_p12) target bundleno = 8495 (0x212f), region = 72  ;;  %s6477_s8 = sld [smem:[#allocation13_spill]] (!%p466_p12) }
  0x22   : > { %s6478_s9 = sld [smem:[#allocation14_spill]] (!%p466_p12)  ;;  %p4719_p0 = scmp.ne.s32.totalorder (!%p466_p12), %s5784_s27, 0 }
  0x28   : > { %s540_s28 = scalar_select %p539_p13, %s5784_s27, 1 }
  0x29   : > { %582 = sbr.rel (%p4719_p0) target bundleno = 48 (0x30), region = 76  ;;  %v583_v0 = vld [vmem:[%s6452_s2] sm:$0xff] (!%p4719_p0)  ;;  %vm585_vm0 = vcmask (!%p4719_p0), 261120   ;;  %v584_v1 = vld [vmem:[%s6452_s2 + $0x8] sm:$0xff] (!%p4719_p0) }
  0x2a   : > { %s4808_s29 = sshll.u32 %s540_s28, 5  ;;  %s4814_s30 = sshll.u32 %s540_s28, 6  ;;  %586 = vst.msk [vmem:[#allocation2] sm:$0xff] (!%p4719_p0), %vm585_vm0, %v583_v0  ;;  %587 = vst.msk [vmem:[#allocation2 + $0x8] sm:$0xff] (!%p4719_p0), %vm585_vm0, %v584_v1 }
  0x2b   : > { %s5793_s18 = scalar_lea.vmem %s6476_s7, %s4808_s29  ;;  %s5798_s21 = scalar_lea.vmem %s6477_s8, %s4808_s29 }
  0x2c   : > { %s5803_s24 = scalar_lea.vmem %s6478_s9, %s4808_s29  ;;  %s5808_s0 = scalar_lea.vmem %s6460_s10, %s4808_s29 }
  0x2d   : > { %s5813_s16 = scalar_lea.vmem %s6461_s11, %s4808_s29  ;;  %s5818_s19 = scalar_lea.vmem %s6462_s12, %s4808_s29 }
  0x2e   : > { %s5823_s22 = scalar_lea.vmem %s6463_s13, %s4814_s30  ;;  %s4815_s23 = sshll.u32 %s540_s28, 4 }
  0x2f   : > { %s5828_s26 = scalar_lea.vmem %s6464_s14, %s4815_s23 }
  0x30 PF: > { %vm592_vm1 = vcmask 261120   ;;  %v632_v16 = vld [vmem:[%s5793_s18] sm:$0xff]  ;;  %v633_v17 = vld [vmem:[%s5793_s18 + $0x8] sm:$0xff]  ;;  %v634_v18 = vld [vmem:[%s5793_s18 + $0x10] sm:$0xff]  ;;  %v620_v24 = vlaneseq  ;;  %v5670_v43 = vmov 0.0   ;;  %vm5671_vm2 = vmmov 0  }
  0x31   : > { %v5837_v2 = vld [vmem:[#allocation2] sm:$0xff]  ;;  %v5839_v3 = vld [vmem:[#allocation2 + $0x8] sm:$0xff]  ;;  %v5271_v19 = vpack.c.bf16 %v633_v17, %v632_v16  ;;  %v635_v20 = vld [vmem:[%s5793_s18 + $0x18] sm:$0xff]  ;;  %4979 = vmatprep.subr.mxu0 %v5670_v43  ;;  %4981 = vmatprep.mubr.msk.f32.mxu0 %vm5671_vm2, %v5670_v43  ;;  %s5672_s8 = smov 88   ;;  %s5673_s9 = smov 96   ;;  %vm734_vm3 = vcmask 64512  }
  0x32   : > { %v593_v4 = vsel %vm592_vm1, %v5837_v2, 0.0  ;;  %v596_v5 = vsel %vm592_vm1, %v5839_v3, 0.0  ;;  %v5275_v21 = vpack.c.bf16 %v635_v20, %v634_v18  ;;  %v5854_v28 = vshrl.u32 %v620_v24, 7  ;;  %v5858_v31 = vld [vmem:[%s5828_s26] sm:$0xff]  ;;  %s5674_s28 = smov 120   ;;  %s5675_s30 = smov 112   ;;  %vm6116_vm12 = vmpackc.low %vm734_vm3, %vm734_vm3 }
  0x33   : > { %594 = vadd.xlane.f32.xlu0 %v593_v4  ;;  %5272 = vmatprep.subr.bf16.mxu1 %v5271_v19  ;;  %s5676_s18 = smov 80   ;;  %s5677_s17 = smov 104   ;;  %v5916_v57 = vand.u32 127, %v620_v24  ;;  %v5679_v60 = vmov -1e+09   ;;  %vm1070_vm7 = vcmask 130112  }
  0x34   : > { %5274 = vmatpush3.bf16.msra.mxu1 %v5271_v19  ;;  %v622_v30 = vsub.s32 0, %v5854_v28  ;;  %v628_v32 = vsub.s32 1, %v5854_v28  ;;  %v638_v44 = vsub.s32 6, %v5854_v28  ;;  %s6469_s20 = smov 72   ;;  %s721_s23 = sld [smem:[#allocation5]]  ;;  %vm1243_vm8 = vcmask 195712  }
  0x35   : > { %5276 = vmatprep.subr.bf16.mxu1 %v5275_v21  ;;  %vm726_vm4 = vcmp.le.s32.totalorder %v5916_v57, %v5854_v28  ;;  %s5680_s25 = smov 64   ;;  %s5681_s15 = smov 48   ;;  %vm1416_vm9 = vcmask 261312   ;;  %vm2595_vm14 = vcmask 130048   ;;  %vm4246_vm0 = vcmask 523264  }
  0x36   : > { %v623_v33 = vrot.slane %v5858_v31, %v622_v30  ;;  %v629_v36 = vrot.slane %v5858_v31, %v628_v32  ;;  %v639_v45 = vrot.slane %v5858_v31, %v638_v44  ;;  %s5682_s1 = smov 40   ;;  %s5683_s7 = smov 56  }
  0x37   : > { %597 = vadd.xlane.f32.xlu0 %v596_v5  ;;  %s5685_s29 = smov 8   ;;  %p4794_p1 = scmp.ne.s32.totalorder %s5784_s27, 1 }
  0x38   : > { %5278 = vmatpush3.bf16.msra.mxu1 %v5275_v21 }
  0x39   : > { %4969 = vmatprep.subr.mxu1 %v5670_v43 }
  0x3a   : > { %v727_v58 = vstv %s721_s23  ;;  %s5686_s23 = smov 16  }
  0x3b   : > { %vm728_vm5 = vcmp.lt.s32.totalorder %v5916_v57, %v727_v58 }
  0x3c   : > { %vm729_vm6 = vmand %vm726_vm4, %vm728_vm5  ;;  %vm4538_vm5 = vcmask (!%p4794_p1), 7168  }
  0x3d   : > { %v730_v61 = vsel %vm729_vm6, 0.0, %v5679_v60 }
  0xc0   : > { %v595_v6 = vpop.xlane.xlu0 %594 }
  0xc1   : > { %v600_v7 = vmul.f32 0.03125, %v595_v6 }
  0xc3   : > { %v602_v8 = vsub.f32 %v5837_v2, %v600_v7 }
  0xc4   : > { %v598_v9 = vpop.xlane.xlu0 %597 }
  0xc5   : > { %v601_v10 = vmul.f32 0.03125, %v598_v9  ;;  %v604_v11 = vmul.f32 %v602_v8, %v602_v8 }
  0xc7   : > { %v603_v12 = vsub.f32 %v5839_v3, %v601_v10  ;;  %v606_v13 = vsel %vm592_vm1, %v604_v11, 0.0 }
  0xc8   : > { %607 = vadd.xlane.f32.xlu1 %v606_v13 }
  0xc9   : > { %v605_v14 = vmul.f32 %v603_v12, %v603_v12 }
  0xcb   : > { %v609_v15 = vsel %vm592_vm1, %v605_v14, 0.0 }
  0xcc   : > { %610 = vadd.xlane.f32.xlu1 %v609_v15 }
 0x155   : > { %v608_v22 = vpop.xlane.xlu1 %607 }
 0x156   : > { %v612_v23 = vmul.f32 0.03125, %v608_v22 }
 0x158   : > { %v614_v25 = vadd.f32 1e-12, %v612_v23 }
 0x159   : > { %v611_v26 = vpop.xlane.xlu1 %610 }
 0x15a   : > { %5521 = vrsqrt.f32 %v614_v25  ;;  %v613_v27 = vmul.f32 0.03125, %v611_v26 }
 0x15c   : > { %v615_v29 = vadd.f32 1e-12, %v613_v27 }
 0x15e   : > { %5523 = vrsqrt.f32 %v615_v29 }
 0x164   : > { %v5522_v34 = vpop.eup %5521 }
 0x165   : > { %v618_v35 = vmul.f32 %v5522_v34, %v602_v8 }
 0x167   : > { %v624_v37 = vmul.f32 %v623_v33, %v618_v35 }
 0x168   : > { %v5524_v38 = vpop.eup %5523 }
 0x169   : > { %v619_v39 = vmul.f32 %v5524_v38, %v603_v12  ;;  %v630_v40 = vadd.f32 %v629_v36, %v624_v37 }
 0x16b   : > { %v625_v41 = vmul.f32 %v623_v33, %v619_v39  ;;  %4966 = vmatprep.mubr.msk.f32.mxu1 %vm592_vm1, %v630_v40 }
 0x16d   : > { %v631_v42 = vadd.f32 %v629_v36, %v625_v41 }
 0x16f   : > { %4967 = vmatmul.mubr.msk.f32.vlgmr.msra.gmra.mrb[0].mxu1 %vm592_vm1, %v631_v42 }
 0x170   : > { %4971 = vmatprep.mubr.msk.f32.mxu1 %vm5671_vm2, %v5670_v43 }
 0x242   : > { %v4968_v46 = vpop.f32.mrb[0].mxu1 }
 0x243   : > { %v5877_v47 = vadd.f32 %v4968_v46, %v639_v45  ;;  %v712_v48 = vpop.f32.mrb[1].mxu1 }
 0x244   : > { %v5879_v49 = vadd.f32 %v712_v48, %v639_v45 }
 0x246   : > { %901 = vrot.lane.b32.xlu1 %v5879_v49, %s5672_s8  ;;  %732 = vrot.lane.b32.xlu0 %v5879_v49, %s5673_s9 }
 0x24a   : > { %899 = vrot.lane.b32.xlu1 %v5879_v49, %s5674_s28  ;;  %1072 = vrot.lane.b32.xlu0 %v5879_v49, %s5675_s30 }
 0x24e   : > { %1074 = vrot.lane.b32.xlu1 %v5879_v49, %s5676_s18  ;;  %1245 = vrot.lane.b32.xlu0 %v5879_v49, %s5677_s17 }
 0x252   : > { %1247 = vrot.lane.b32.xlu1 %v5879_v49, %s6469_s20 }
 0x2b8   : > { %v902_v50 = vpop.permute.xlu1 %901  ;;  %v733_v51 = vpop.permute.xlu0 %732 }
 0x2b9   : > { %4970 = vmatpush3.xpose.msk.msra.mxu1 %vm734_vm3, %v733_v51  ;;  %4980 = vmatpush3.xpose.msk.msra.mxu0 %vm734_vm3, %v902_v50 }
 0x2ba   : > { %4989 = vmatprep.subr.mxu0 %v5670_v43  ;;  %4974 = vmatprep.subr.mxu1 %v5670_v43 }
 0x2bc   : > { %v900_v52 = vpop.permute.xlu1 %899  ;;  %4972 = vmatmul.mubr.msk.f32.vlgmr.msra.gmra.mrb[2].mxu1 %vm734_vm3, %v5879_v49  ;;  %v1073_v54 = vpop.permute.xlu0 %1072 }
 0x2bd   : > { %4982 = vmatmul.mubr.msk.f32.vlgmr.msra.gmra.mrb[0].mxu0 %vm734_vm3, %v900_v52  ;;  %4976 = vmatprep.mubr.msk.f32.mxu1 %vm5671_vm2, %v5670_v43 }
 0x2be   : > { %4991 = vmatprep.mubr.msk.f32.mxu0 %vm5671_vm2, %v5670_v43 }
 0x2c0   : > { %v1075_v53 = vpop.permute.xlu1 %1074  ;;  %v1246_v56 = vpop.permute.xlu0 %1245 }
 0x2c1   : > { %4990 = vmatpush3.xpose.msk.msra.mxu0 %vm734_vm3, %v1075_v53 }
 0x2c2   : > { %4999 = vmatprep.subr.mxu0 %v5670_v43 }
 0x2c4   : > { %v1248_v55 = vpop.permute.xlu1 %1247  ;;  %4992 = vmatmul.mubr.msk.f32.vlgmr.msra.gmra.mrb[2].mxu0 %vm734_vm3, %v1073_v54 }
 0x2c5   : > { %5000 = vmatpush3.xpose.msk.msra.mxu0 %vm734_vm3, %v1248_v55  ;;  %5001 = vmatprep.mubr.msk.f32.mxu0 %vm5671_vm2, %v5670_v43 }
 0x2c8   : > { %5002 = vmatmul.mubr.msk.f32.vlgmr.msra.gmra.mrb[4].mxu0 %vm734_vm3, %v1246_v56 }
 0x2c9   : > { %5017 = vmatprep.mubr.msk.f32.mxu0 %vm5671_vm2, %v5670_v43 }
 0x38f   : > { %v805_v59 = vpop.f32.mrb[2].mxu1 }
 0x390   : > { %v809_v62 = vmul.f32 0.35355338, %v805_v59  ;;  %v4973_v63 = vpop.f32.mrb[3].mxu1  ;;  %v973_v0 = vpop.f32.mrb[0].mxu0 }
 0x391   : > { %v977_v1 = vmul.f32 0.35355338, %v973_v0  ;;  %v4983_v4 = vpop.f32.mrb[1].mxu0  ;;  %v1419_v63 = vld [vmem:[%s5798_s21] sm:$0xff]  ;;  %v1420_v0 = vld [vmem:[%s5798_s21 + $0x8] sm:$0xff] }
 0x392   : > { %v810_v5 = vadd.f32 %v809_v62, %v730_v61  ;;  %v5960_v4 = vpack.c.bf16 %v1420_v0, %v1419_v63 }
 0x393   : > { %v978_v6 = vadd.f32 %v977_v1, %v730_v61  ;;  %v5684_v1 = vmov 0.0|0.0  }
 0x394   : > { %v811_v7 = vsel %vm734_vm3, %v810_v5, -inf  ;;  %5279 = vmatprep.subr.bf16.mxu0 %v5684_v1 }
 0x395   : > { %812 = vmax.xlane.f32.xlu1 %v811_v7  ;;  %v979_v8 = vsel %vm734_vm3, %v978_v6, -inf  ;;  %5281 = vmatpush3.bf16.msra.mxu0 %v5960_v4 }
 0x396   : > { %980 = vmax.xlane.f32.xlu0 %v979_v8  ;;  %5282 = vmatprep.subr.bf16.mxu0 %v5684_v1 }
 0x397   : > { %v1146_v9 = vpop.f32.mrb[2].mxu0 }
 0x398   : > { %v1150_v10 = vmul.f32 0.35355338, %v1146_v9  ;;  %v4993_v11 = vpop.f32.mrb[3].mxu0 }
 0x39a   : > { %v1151_v12 = vadd.f32 %v1150_v10, %v730_v61 }
 0x39b   : > { %v1319_v13 = vpop.f32.mrb[4].mxu0 }
 0x39c   : > { %v1323_v14 = vmul.f32 0.35355338, %v1319_v13  ;;  %v5003_v15 = vpop.f32.mrb[5].mxu0  ;;  %v1152_v16 = vsel %vm734_vm3, %v1151_v12, -inf }
 0x39d   : > { %1153 = vmax.xlane.f32.xlu0 %v1152_v16 }
 0x39e   : > { %v1324_v17 = vadd.f32 %v1323_v14, %v730_v61 }
 0x3a0   : > { %v1325_v18 = vsel %vm734_vm3, %v1324_v17, -inf }
 0x3a1   : > { %1326 = vmax.xlane.f32.xlu0 %v1325_v18 }
 0x3a6   : > { %822 = vrot.lane.b32.xlu1 %v5879_v49, %s5680_s25 }
 0x422   : > { %v813_v19 = vpop.xlane.xlu1 %812 }
 0x423   : > { %v814_v20 = vsub.f32 %v810_v5, %v813_v19  ;;  %v981_v21 = vpop.xlane.xlu0 %980  ;;  %v1421_v5 = vld [vmem:[%s5798_s21 + $0x10] sm:$0xff] }
 0x424   : > { %v982_v22 = vsub.f32 %v978_v6, %v981_v21  ;;  %v1422_v6 = vld [vmem:[%s5798_s21 + $0x18] sm:$0xff]  ;;  %s5687_s21 = smov 24  }
 0x425   : > { %v815_v23 = vmul.f32 1.442695, %v814_v20  ;;  %v5283_v7 = vpack.c.bf16 %v1422_v6, %v1421_v5 }
 0x426   : > { %v983_v24 = vmul.f32 1.442695, %v982_v22  ;;  %v823_v25 = vpop.permute.xlu1 %822 }
 0x427   : > { %5525 = vpow2.f32 %v815_v23  ;;  %4975 = vmatpush3.msra.mxu1 %v823_v25  ;;  %5284 = vmatpush3.bf16.msra.mxu0 %v5283_v7 }
 0x428   : > { %5527 = vpow2.f32 %v983_v24  ;;  %4984 = vmatprep.subr.mxu1 %v5670_v43  ;;  %5030 = vmatprep.subr.mxu0 %v5670_v43 }
 0x42a   : > { %v1154_v26 = vpop.xlane.xlu0 %1153 }
 0x42b   : > { %v1155_v27 = vsub.f32 %v1151_v12, %v1154_v26 }
 0x42d   : > { %v1156_v29 = vmul.f32 1.442695, %v1155_v27 }
 0x42e   : > { %v1327_v33 = vpop.xlane.xlu0 %1326 }
 0x42f   : > { %5529 = vpow2.f32 %v1156_v29  ;;  %v1328_v34 = vsub.f32 %v1324_v17, %v1327_v33  ;;  %v1499_v33 = vsub.s32 7, %v5854_v28 }
 0x431   : > { %v5526_v35 = vpop.eup %5525  ;;  %v1329_v36 = vmul.f32 1.442695, %v1328_v34 }
 0x432   : > { %v5528_v37 = vpop.eup %5527  ;;  %v817_v38 = vsel %vm734_vm3, %v5526_v35, 0.0 }
 0x433   : > { %5531 = vpow2.f32 %v1329_v36  ;;  %818 = vadd.xlane.f32.xlu1 %v817_v38  ;;  %v985_v39 = vsel %vm734_vm3, %v5528_v37, 0.0  ;;  %v6021_v38 = vrot.slane %v5858_v31, %v1499_v33 }
 0x434   : > { %986 = vadd.xlane.f32.xlu0 %v985_v39 }
 0x439   : > { %v5530_v40 = vpop.eup %5529 }
 0x43a   : > { %v1158_v41 = vsel %vm734_vm3, %v5530_v40, 0.0 }
 0x43b   : > { %1159 = vadd.xlane.f32.xlu1 %v1158_v41 }
 0x43d   : > { %v5532_v42 = vpop.eup %5531 }
 0x43e   : > { %v1331_v44 = vsel %vm734_vm3, %v5532_v42, 0.0 }
 0x43f   : > { %1332 = vadd.xlane.f32.xlu0 %v1331_v44 }
 0x44c   : > { %1163 = vrot.lane.b32.xlu1 %v5879_v49, %s5681_s15 }
 0x450   : > { %1336 = vrot.lane.b32.xlu1 %v5879_v49, %s5682_s1 }
 0x455   : > { %990 = vrot.lane.b32.xlu0 %v5879_v49, %s5683_s7 }
 0x4c0   : > { %v819_v45 = vpop.xlane.xlu1 %818 }
 0x4c1   : > { %5533 = vrcp.f32 %v819_v45  ;;  %v987_v46 = vpop.xlane.xlu0 %986 }
 0x4c2   : > { %5535 = vrcp.f32 %v987_v46 }
 0x4c8   : > { %v1160_v48 = vpop.xlane.xlu1 %1159 }
 0x4c9   : > { %5537 = vrcp.f32 %v1160_v48 }
 0x4cb   : > { %v5534_v50 = vpop.eup %5533 }
 0x4cc   : > { %v821_v51 = vmul.f32 %v5534_v50, %v5526_v35  ;;  %v1333_v52 = vpop.xlane.xlu0 %1332  ;;  %v5536_v53 = vpop.eup %5535 }
 0x4cd   : > { %5539 = vrcp.f32 %v1333_v52  ;;  %v989_v54 = vmul.f32 %v5536_v53, %v5528_v37  ;;  %v1164_v55 = vpop.permute.xlu1 %1163 }
 0x4ce   : > { %4977 = vmatmul.mubr.msk.f32.vlgmr.msra.gmra.mrb[4].mxu1 %vm734_vm3, %v821_v51 }
 0x4cf   : > { %4986 = vmatprep.mubr.msk.f32.mxu1 %vm5671_vm2, %v5670_v43 }
 0x4d0   : > { %v991_v56 = vpop.permute.xlu0 %990 }
 0x4d1   : > { %4985 = vmatpush3.msra.mxu1 %v991_v56  ;;  %v1337_v59 = vpop.permute.xlu1 %1336 }
 0x4d2   : > { %4987 = vmatmul.mubr.msk.f32.vlgmr.msra.gmra.mrb[6].mxu1 %vm734_vm3, %v989_v54  ;;  %4994 = vmatprep.subr.mxu1 %v5670_v43 }
 0x4d3   : > { %v5538_v49 = vpop.eup %5537  ;;  %4995 = vmatpush3.msra.mxu1 %v1164_v55  ;;  %4996 = vmatprep.mubr.msk.f32.mxu1 %vm5671_vm2, %v5670_v43 }
 0x4d4   : > { %v1162_v58 = vmul.f32 %v5538_v49, %v5530_v40  ;;  %5004 = vmatprep.subr.mxu1 %v5670_v43 }
 0x4d6   : > { %4997 = vmatmul.mubr.msk.f32.vlgmr.msra.gmra.mrb[8].mxu1 %vm734_vm3, %v1162_v58 }
 0x4d7   : > { %v5540_v61 = vpop.eup %5539  ;;  %5005 = vmatpush3.msra.mxu1 %v1337_v59  ;;  %5006 = vmatprep.mubr.msk.f32.mxu1 %vm5671_vm2, %v5670_v43 }
 0x4d8   : > { %v1335_v62 = vmul.f32 %v5540_v61, %v5532_v42  ;;  %5020 = vmatprep.subr.mxu1 %v5670_v43 }
 0x4da   : > { %5007 = vmatmul.mubr.msk.f32.vlgmr.msra.gmra.mrb[10].mxu1 %vm734_vm3, %v1335_v62 }
 0x4db   : > { %5022 = vmatprep.mubr.msk.f32.mxu1 %vm5671_vm2, %v5670_v43 }
 0x5a1   : > { %v894_v8 = vpop.f32.mrb[4].mxu1 }
 0x5a2   : > { %898 = vst.msk [vmem:[#allocation3] sm:$0xff] %vm734_vm3, %v894_v8  ;;  %v4978_v9 = vpop.f32.mrb[5].mxu1 }
 0x5a5   : > { %v1062_v10 = vpop.f32.mrb[6].mxu1 }
 0x5a6   : > { %1067 = vrot.lane.b32.xlu1 %v1062_v10, %s5685_s29  ;;  %v4988_v11 = vpop.f32.mrb[7].mxu1 }
 0x5a9   : > { %v1235_v12 = vpop.f32.mrb[8].mxu1 }
 0x5aa   : > { %1240 = vrot.lane.b32.xlu0 %v1235_v12, %s5686_s23  ;;  %v4998_v13 = vpop.f32.mrb[9].mxu1 }
 0x5ad   : > { %v1408_v14 = vpop.f32.mrb[10].mxu1 }
 0x5ae   : > { %1509 = vrot.lane.b32.xlu0 %v5877_v47, %s5673_s9  ;;  %1413 = vrot.lane.b32.xlu1 %v1408_v14, %s5687_s21  ;;  %v5008_v15 = vpop.f32.mrb[11].mxu1 }
 0x5b2   : > { %1675 = vrot.lane.b32.xlu0 %v5877_v47, %s5674_s28  ;;  %1677 = vrot.lane.b32.xlu1 %v5877_v47, %s5672_s8 }
 0x5b6   : > { %1847 = vrot.lane.b32.xlu0 %v5877_v47, %s5675_s30  ;;  %1849 = vrot.lane.b32.xlu1 %v5877_v47, %s5676_s18 }
 0x5ba   : > { %2019 = vrot.lane.b32.xlu0 %v5877_v47, %s5677_s17  ;;  %2021 = vrot.lane.b32.xlu1 %v5877_v47, %s6469_s20  ;;  %s4735_s20 = sld [smem:[#allocation5 + $0x1]] }
 0x5c0   : > { %v1504_v27 = vstv %s4735_s20 }
 0x5c1   : > { %vm1505_vm10 = vcmp.lt.s32.totalorder %v5916_v57, %v1504_v27 }
 0x5c2   : > { %vm1506_vm11 = vmand %vm726_vm4, %vm1505_vm10 }
 0x5c3   : > { %v1507_v34 = vsel %vm1506_vm11, 0.0, %v5679_v60 }
 0x618   : > { %v1068_v16 = vpop.permute.xlu1 %1067 }
 0x619   : > { %1071 = vst.msk [vmem:[#allocation3] sm:$0xff] %vm1070_vm7, %v1068_v16 }
 0x61c   : > { %v1241_v17 = vpop.permute.xlu0 %1240 }
 0x61d   : > { %1244 = vst.msk [vmem:[#allocation3] sm:$0xff] %vm1243_vm8, %v1241_v17 }
 0x620   : > { %v1510_v18 = vpop.permute.xlu0 %1509  ;;  %v1414_v19 = vpop.permute.xlu1 %1413 }
 0x621   : > { %1417 = vst.msk [vmem:[#allocation3] sm:$0xff] %vm1416_vm9, %v1414_v19  ;;  %5021 = vmatpush3.xpose.msk.msra.mxu1 %vm734_vm3, %v1510_v18 }
 0x622   : > { %5025 = vmatprep.subr.mxu1 %v5670_v43 }
 0x624   : > { %5023 = vmatmul.mubr.msk.f32.vlgmr.msra.gmra.mrb[12].mxu1 %vm734_vm3, %v5877_v47  ;;  %v1678_v20 = vpop.permute.xlu1 %1677  ;;  %v1676_v21 = vpop.permute.xlu0 %1675 }
 0x625   : > { %5027 = vmatprep.mubr.msk.f32.mxu1 %vm5671_vm2, %v5670_v43 }
 0x628   : > { %v1418_v22 = vld [vmem:[#allocation3] sm:$0xff]  ;;  %v1850_v23 = vpop.permute.xlu1 %1849  ;;  %v1848_v24 = vpop.permute.xlu0 %1847 }
 0x629   : > { %5018 = vmatmul.mubr.msk.f32.vlgmr.msra.gmra.mrb[6].mxu0 %vm592_vm1, %v1418_v22 }
 0x62a   : > { %5031 = vmatpush3.xpose.msk.msra.mxu0 %vm734_vm3, %v1678_v20  ;;  %5032 = vmatprep.mubr.msk.f32.mxu0 %vm5671_vm2, %v5670_v43 }
 0x62b   : > { %5040 = vmatprep.subr.mxu0 %v5670_v43 }
 0x62c   : > { %v2022_v25 = vpop.permute.xlu1 %2021  ;;  %v2020_v26 = vpop.permute.xlu0 %2019 }
 0x62d   : > { %5033 = vmatmul.mubr.msk.f32.vlgmr.msra.gmra.mrb[8].mxu0 %vm734_vm3, %v1676_v21 }
 0x62e   : > { %5041 = vmatpush3.xpose.msk.msra.mxu0 %vm734_vm3, %v1850_v23  ;;  %5042 = vmatprep.mubr.msk.f32.mxu0 %vm5671_vm2, %v5670_v43 }
 0x62f   : > { %5050 = vmatprep.subr.mxu0 %v5670_v43 }
 0x631   : > { %5043 = vmatmul.mubr.msk.f32.vlgmr.msra.gmra.mrb[10].mxu0 %vm734_vm3, %v1848_v24 }
 0x632   : > { %5051 = vmatpush3.xpose.msk.msra.mxu0 %vm734_vm3, %v2022_v25  ;;  %5052 = vmatprep.mubr.msk.f32.mxu0 %vm5671_vm2, %v5670_v43 }
 0x633   : > { %5285 = vmatprep.subr.bf16.mxu0 %v5684_v1 }
 0x635   : > { %5053 = vmatmul.mubr.msk.f32.vlgmr.msra.gmra.mrb[12].mxu0 %vm734_vm3, %v2020_v26 }
 0x636   : > { %5287 = vmatpush3.bf16.msra.mxu0 %v5960_v4  ;;  %5068 = vmatprep.mubr.msk.f32.mxu0 %vm5671_vm2, %v5670_v43 }
 0x637   : > { %5288 = vmatprep.subr.bf16.mxu0 %v5684_v1 }
 0x63a   : > { %5290 = vmatpush3.bf16.msra.mxu0 %v5283_v7 }
 0x6f7   : > { %v1581_v29 = vpop.f32.mrb[12].mxu1 }
 0x6f8   : > { %v1585_v35 = vmul.f32 0.35355338, %v1581_v29  ;;  %v5024_v36 = vpop.f32.mrb[13].mxu1 }
 0x6fa   : > { %v1586_v37 = vadd.f32 %v1585_v35, %v1507_v34 }
 0x6fc   : > { %v1492_v39 = vpop.f32.mrb[6].mxu0  ;;  %v1587_v40 = vsel %vm734_vm3, %v1586_v37, -inf }
 0x6fd   : > { %v1496_v41 = vadd.f32 %v1492_v39, %v5837_v2  ;;  %v5019_v42 = vpop.f32.mrb[7].mxu0  ;;  %1588 = vmax.xlane.f32.xlu1 %v1587_v40 }
 0x6ff   : > { %v1501_v44 = vadd.f32 %v6021_v38, %v1496_v41 }
 0x700   : > { %v1749_v45 = vpop.f32.mrb[8].mxu0 }
 0x701   : > { %1502 = vst.msk [vmem:[#allocation2] sm:$0xff] %vm592_vm1, %v1501_v44  ;;  %v1753_v46 = vmul.f32 0.35355338, %v1749_v45  ;;  %v5034_v48 = vpop.f32.mrb[9].mxu0 }
 0x703   : > { %v1754_v50 = vadd.f32 %v1753_v46, %v1507_v34 }
 0x704   : > { %v1921_v51 = vpop.f32.mrb[10].mxu0 }
 0x705   : > { %v1925_v52 = vmul.f32 0.35355338, %v1921_v51  ;;  %v5044_v53 = vpop.f32.mrb[11].mxu0  ;;  %v1755_v54 = vsel %vm734_vm3, %v1754_v50, -inf }
 0x706   : > { %1756 = vmax.xlane.f32.xlu0 %v1755_v54 }
 0x707   : > { %v1926_v55 = vadd.f32 %v1925_v52, %v1507_v34 }
 0x708   : > { %v2093_v56 = vpop.f32.mrb[12].mxu0  ;;  %v6059_v52 = vld [vmem:[#allocation2] sm:$0xff] }
 0x709   : > { %v2097_v49 = vmul.f32 0.35355338, %v2093_v56  ;;  %v5054_v2 = vpop.f32.mrb[13].mxu0  ;;  %v1927_v58 = vsel %vm734_vm3, %v1926_v55, -inf  ;;  %v2274_v53 = vsel %vm592_vm1, %v6059_v52, 0.0 }
 0x70a   : > { %1928 = vmax.xlane.f32.xlu0 %v1927_v58 }
 0x70b   : > { %v2098_v59 = vadd.f32 %v2097_v49, %v1507_v34 }
 0x70d   : > { %v2099_v61 = vsel %vm734_vm3, %v2098_v59, -inf }
 0x70e   : > { %2100 = vmax.xlane.f32.xlu0 %v2099_v61 }
 0x78a   : > { %v1589_v62 = vpop.xlane.xlu1 %1588 }
 0x78b   : > { %v1590_v63 = vsub.f32 %v1586_v37, %v1589_v62 }
 0x78d   : > { %v1591_v0 = vmul.f32 1.442695, %v1590_v63 }
 0x78f   : > { %5541 = vpow2.f32 %v1591_v0 }
 0x793   : > { %v1757_v4 = vpop.xlane.xlu0 %1756 }
 0x794   : > { %v1758_v5 = vsub.f32 %v1754_v50, %v1757_v4 }
 0x796   : > { %v1759_v6 = vmul.f32 1.442695, %v1758_v5  ;;  %v2302_v5 = vsub.s32 2, %v5854_v28 }
 0x797   : > { %v1929_v7 = vpop.xlane.xlu0 %1928 }
 0x798   : > { %5543 = vpow2.f32 %v1759_v6  ;;  %v1930_v17 = vsub.f32 %v1926_v55, %v1929_v7  ;;  %v2308_v6 = vsub.s32 3, %v5854_v28  ;;  %v2303_v7 = vrot.slane %v5858_v31, %v2302_v5 }
 0x799   : > { %v5542_v8 = vpop.eup %5541 }
 0x79a   : > { %v1593_v9 = vsel %vm734_vm3, %v5542_v8, 0.0  ;;  %v1931_v18 = vmul.f32 1.442695, %v1930_v17 }
 0x79b   : > { %v2101_v10 = vpop.xlane.xlu0 %2100  ;;  %1594 = vadd.xlane.f32.xlu1 %v1593_v9 }
 0x79c   : > { %v2102_v11 = vsub.f32 %v2098_v59, %v2101_v10  ;;  %v2309_v10 = vrot.slane %v5858_v31, %v2308_v6 }
 0x79e   : > { %v2103_v12 = vmul.f32 1.442695, %v2102_v11 }
 0x7a0   : > { %5545 = vpow2.f32 %v2103_v12 }
 0x7a1   : > { %5547 = vpow2.f32 %v1931_v18 }
 0x7a2   : > { %v5544_v13 = vpop.eup %5543 }
 0x7a3   : > { %v1761_v14 = vsel %vm734_vm3, %v5544_v13, 0.0 }
 0x7a4   : > { %1762 = vadd.xlane.f32.xlu0 %v1761_v14 }
 0x7aa   : > { %v5546_v15 = vpop.eup %5545 }
 0x7ab   : > { %v2105_v16 = vsel %vm734_vm3, %v5546_v15, 0.0  ;;  %v5548_v19 = vpop.eup %5547 }
 0x7ac   : > { %2106 = vadd.xlane.f32.xlu0 %v2105_v16  ;;  %1598 = vrot.lane.b32.xlu1 %v5877_v47, %s5680_s25  ;;  %v1933_v20 = vsel %vm734_vm3, %v5548_v19, 0.0  ;;  %s2510_s25 = sld [smem:[#allocation6]] }
 0x7c2   : > { %1766 = vrot.lane.b32.xlu0 %v5877_v47, %s5683_s7 }
 0x7d0   : > { %1934 = vadd.xlane.f32.xlu1 %v1933_v20 }
 0x7e1   : > { %1938 = vrot.lane.b32.xlu1 %v5877_v47, %s5681_s15  ;;  %s4772_s15 = sld [smem:[#allocation6 + $0x1]] }
 0x7e5   : > { %2110 = vrot.lane.b32.xlu1 %v5877_v47, %s5682_s1 }
 0x828   : > { %v1595_v21 = vpop.xlane.xlu1 %1594 }
 0x829   : > { %5549 = vrcp.f32 %v1595_v21  ;;  %v2405_v21 = vld [vmem:[%s5808_s0] sm:$0xff] }
 0x82c   : > { %v1599_v22 = vpop.permute.xlu1 %1598 }
 0x82d   : > { %5026 = vmatpush3.msra.mxu1 %v1599_v22  ;;  %v2406_v22 = vld [vmem:[%s5808_s0 + $0x8] sm:$0xff] }
 0x82e   : > { %5035 = vmatprep.subr.mxu1 %v5670_v43 }
 0x831   : > { %v1763_v23 = vpop.xlane.xlu0 %1762 }
 0x832   : > { %5551 = vrcp.f32 %v1763_v23  ;;  %v5299_v23 = vpack.c.bf16 %v2406_v22, %v2405_v21 }
 0x833   : > { %v5550_v24 = vpop.eup %5549 }
 0x834   : > { %v1597_v25 = vmul.f32 %v5550_v24, %v5542_v8  ;;  %5300 = vmatprep.subr.bf16.mxu0 %v5299_v23  ;;  %v2407_v24 = vld [vmem:[%s5808_s0 + $0x10] sm:$0xff] }
 0x836   : > { %5028 = vmatmul.mubr.msk.f32.vlgmr.msra.gmra.mrb[14].mxu1 %vm734_vm3, %v1597_v25  ;;  %v2408_v25 = vld [vmem:[%s5808_s0 + $0x18] sm:$0xff] }
 0x837   : > { %5037 = vmatprep.mubr.msk.f32.mxu1 %vm5671_vm2, %v5670_v43 }
 0x839   : > { %v2107_v26 = vpop.xlane.xlu0 %2106 }
 0x83c   : > { %v5552_v27 = vpop.eup %5551 }
 0x83d   : > { %v1765_v29 = vmul.f32 %v5552_v27, %v5544_v13  ;;  %v1767_v33 = vpop.permute.xlu0 %1766  ;;  %v2401_v27 = vld [vmem:[%s6453_s3] sm:$0xff] }
 0x83e   : > { %5036 = vmatpush3.msra.mxu1 %v1767_v33  ;;  %v2312_v33 = vld [vmem:[%s5803_s24] sm:$0xff] }
 0x83f   : > { %5038 = vmatmul.mubr.msk.f32.vlgmr.msra.gmra.mrb[16].mxu1 %vm734_vm3, %v1765_v29  ;;  %5045 = vmatprep.subr.mxu1 %v5670_v43  ;;  %v2402_v29 = vld [vmem:[%s6453_s3 + $0x8] sm:$0xff] }
 0x840   : > { %5047 = vmatprep.mubr.msk.f32.mxu1 %vm5671_vm2, %v5670_v43 }
 0x85d   : > { %v1935_v47 = vpop.xlane.xlu1 %1934 }
 0x85e   : > { %5553 = vrcp.f32 %v1935_v47  ;;  %v2313_v47 = vld [vmem:[%s5803_s24 + $0x8] sm:$0xff] }
 0x85f   : > { %5555 = vrcp.f32 %v2107_v26  ;;  %v5303_v26 = vpack.c.bf16 %v2408_v25, %v2407_v24 }
 0x861   : > { %v1939_v34 = vpop.permute.xlu1 %1938 }
 0x862   : > { %5046 = vmatpush3.msra.mxu1 %v1939_v34  ;;  %v5291_v34 = vpack.c.bf16 %v2313_v47, %v2312_v33 }
 0x863   : > { %5055 = vmatprep.subr.mxu1 %v5670_v43 }
 0x865   : > { %v2111_v39 = vpop.permute.xlu1 %2110 }
 0x868   : > { %v5554_v35 = vpop.eup %5553 }
 0x869   : > { %v1937_v36 = vmul.f32 %v5554_v35, %v5548_v19  ;;  %v5556_v37 = vpop.eup %5555  ;;  %v2314_v35 = vld [vmem:[%s5803_s24 + $0x10] sm:$0xff] }
 0x86a   : > { %v2109_v40 = vmul.f32 %v5556_v37, %v5546_v15 }
 0x86b   : > { %5048 = vmatmul.mubr.msk.f32.vlgmr.msra.gmra.mrb[18].mxu1 %vm734_vm3, %v1937_v36  ;;  %v2315_v36 = vld [vmem:[%s5803_s24 + $0x18] sm:$0xff] }
 0x86c   : > { %5056 = vmatpush3.msra.mxu1 %v2111_v39  ;;  %5057 = vmatprep.mubr.msk.f32.mxu1 %vm5671_vm2, %v5670_v43  ;;  %v5295_v37 = vpack.c.bf16 %v2315_v36, %v2314_v35 }
 0x86d   : > { %5292 = vmatprep.subr.bf16.mxu1 %v5291_v34 }
 0x86f   : > { %5058 = vmatmul.mubr.msk.f32.vlgmr.msra.gmra.mrb[20].mxu1 %vm734_vm3, %v2109_v40 }
 0x870   : > { %5294 = vmatpush3.bf16.msra.mxu1 %v5291_v34 }
 0x871   : > { %5296 = vmatprep.subr.bf16.mxu1 %v5295_v37 }
 0x874   : > { %5298 = vmatpush3.bf16.msra.mxu1 %v5295_v37 }
 0x875   : > { %5307 = vmatprep.subr.bf16.mxu1 %v5684_v1 }
 0x909   : > { %v1670_v41 = vpop.f32.mrb[14].mxu1 }
 0x90a   : > { %1674 = vst.msk [vmem:[#allocation3] sm:$0xff] %vm734_vm3, %v1670_v41  ;;  %v5029_v42 = vpop.f32.mrb[15].mxu1 }
 0x912   : > { %v1838_v44 = vpop.f32.mrb[16].mxu1 }
 0x913   : > { %1843 = vrot.lane.b32.xlu1 %v1838_v44, %s5685_s29  ;;  %v5039_v45 = vpop.f32.mrb[17].mxu1 }
 0x93e   : > { %v2010_v46 = vpop.f32.mrb[18].mxu1 }
 0x93f   : > { %2015 = vrot.lane.b32.xlu0 %v2010_v46, %s5686_s23  ;;  %v5049_v48 = vpop.f32.mrb[19].mxu1 }
 0x940   : > { %v6109_v48 = vld [vmem:[%s5828_s26 + $0x8] sm:$0x1f] }
 0x942   : > { %v2182_v50 = vpop.f32.mrb[20].mxu1 }
 0x943   : > { %2187 = vrot.lane.b32.xlu1 %v2182_v50, %s5687_s21  ;;  %v5059_v51 = vpop.f32.mrb[21].mxu1  ;;  %v2412_v50 = vrot.slane %v6109_v48, %v628_v32  ;;  %v2403_v32 = vld [vmem:[%s6453_s3 + $0x10] sm:$0xff] }
 0x95e   : > { %2275 = vadd.xlane.f32.xlu0 %v2274_v53 }
 0x985   : > { %v1844_v54 = vpop.permute.xlu1 %1843 }
 0x986   : > { %1846 = vst.msk [vmem:[#allocation3] sm:$0xff] %vm1070_vm7, %v1844_v54 }
 0x9b1   : > { %v2016_v55 = vpop.permute.xlu0 %2015 }
 0x9b2   : > { %2018 = vst.msk [vmem:[#allocation3] sm:$0xff] %vm1243_vm8, %v2016_v55 }
 0x9b5   : > { %v2188_v56 = vpop.permute.xlu1 %2187 }
 0x9b6   : > { %2190 = vst.msk [vmem:[#allocation3] sm:$0xff] %vm1416_vm9, %v2188_v56 }
 0x9bd   : > { %v2191_v49 = vld [vmem:[#allocation3] sm:$0xff] }
 0x9be   : > { %5069 = vmatmul.mubr.msk.f32.vlgmr.msra.gmra.mrb[14].mxu0 %vm592_vm1, %v2191_v49 }
 0x9bf   : > { %5302 = vmatpush3.bf16.msra.mxu0 %v5299_v23  ;;  %5090 = vmatprep.mubr.msk.f32.mxu0 %vm592_vm1, %v2401_v27 }
 0x9c0   : > { %5304 = vmatprep.subr.bf16.mxu0 %v5303_v26 }
 0x9c3   : > { %5306 = vmatpush3.bf16.msra.mxu0 %v5303_v26 }
 0x9c4   : > { %5314 = vmatprep.subr.bf16.mxu0 %v5684_v1 }
 0x9c6   : > { %5091 = vmatmul.mubr.msk.f32.vlgmr.msra.gmra.mrb[16].mxu0 %vm592_vm1, %v2402_v29 }
 0x9c7   : > { %5093 = vmatprep.mubr.msk.f32.mxu0 %vm592_vm1, %v2403_v32 }
 0x9eb   : > { %v2276_v2 = vpop.xlane.xlu0 %2275 }
 0x9ec   : > { %v2280_v58 = vmul.f32 0.03125, %v2276_v2 }
 0x9ee   : > { %v2282_v59 = vsub.f32 %v6059_v52, %v2280_v58  ;;  %v2404_v58 = vld [vmem:[%s6453_s3 + $0x18] sm:$0xff] }
 0x9ef   : > { %5094 = vmatmul.mubr.msk.f32.gmra.mrb[18].mxu0 %vm592_vm1, %v2404_v58 }
 0x9f0   : > { %v2284_v61 = vmul.f32 %v2282_v59, %v2282_v59  ;;  %5114 = vmatprep.mubr.msk.f32.mxu0 %vm5671_vm2, %v5670_v43 }
 0x9f2   : > { %v2286_v62 = vsel %vm592_vm1, %v2284_v61, 0.0 }
 0x9f3   : > { %2287 = vadd.xlane.f32.xlu0 %v2286_v62 }
 0xa80   : > { %v2288_v63 = vpop.xlane.xlu0 %2287 }
 0xa81   : > { %v2292_v0 = vmul.f32 0.03125, %v2288_v63 }
 0xa83   : > { %v2294_v4 = vadd.f32 1e-12, %v2292_v0  ;;  %v2319_v0 = vrot.slane %v6109_v48, %v622_v30 }
 0xa85   : > { %5557 = vrsqrt.f32 %v2294_v4 }
 0xa8f   : > { %v5558_v8 = vpop.eup %5557 }
 0xa90   : > { %v2298_v9 = vmul.f32 %v5558_v8, %v2282_v59 }
 0xa91   : > { %v2265_v11 = vpop.f32.mrb[14].mxu0 }
 0xa92   : > { %v2269_v12 = vadd.f32 %v2265_v11, %v5839_v3  ;;  %v5070_v13 = vpop.f32.mrb[15].mxu0  ;;  %v2304_v14 = vmul.f32 %v2303_v7, %v2298_v9 }
 0xa94   : > { %v2270_v15 = vadd.f32 %v2269_v12, %v6021_v38  ;;  %v2310_v16 = vadd.f32 %v2309_v10, %v2304_v14 }
 0xa96   : > { %2271 = vst.msk [vmem:[#allocation2 + $0x8] sm:$0xff] %vm592_vm1, %v2270_v15  ;;  %5079 = vmatprep.mubr.msk.f32.mxu1 %vm592_vm1, %v2310_v16 }
 0xa99   : > { %v5092_v51 = vpop.f32.mrb[16].mxu0 }
 0xa9a   : > { %v2497_v53 = vadd.f32 %v5092_v51, %v2412_v50  ;;  %v2491_v54 = vpop.f32.mrb[17].mxu0 }
 0xa9b   : > { %v2492_v55 = vadd.f32 %v2491_v54, %v2412_v50 }
 0xa9d   : > { %v6081_v17 = vld [vmem:[#allocation2 + $0x8] sm:$0xff]  ;;  %v6120_v49 = vpack.i.bf16 %v2497_v53, %v2492_v55  ;;  %v5308_v2 = vpack.c.bf16 %v2497_v53, %v2492_v55 }
 0xa9e   : > { %v2277_v31 = vsel %vm592_vm1, %v6081_v17, 0.0 }
 0xa9f   : > { %2278 = vadd.xlane.f32.xlu1 %v2277_v31 }
 0xac2   : > { %v5095_v30 = vpop.f32.mrb[18].mxu0 }
 0xac3   : > { %v6166_v31 = vadd.f32 %v5095_v30, %v2412_v50 }
 0xb2c   : > { %v2279_v3 = vpop.xlane.xlu1 %2278 }
 0xb2d   : > { %v2281_v18 = vmul.f32 0.03125, %v2279_v3 }
 0xb2f   : > { %v2283_v19 = vsub.f32 %v6081_v17, %v2281_v18 }
 0xb31   : > { %v2285_v20 = vmul.f32 %v2283_v19, %v2283_v19 }
 0xb33   : > { %v2289_v38 = vsel %vm592_vm1, %v2285_v20, 0.0  ;;  %v2511_v20 = vstv %s2510_s25 }
 0xb34   : > { %2290 = vadd.xlane.f32.xlu0 %v2289_v38  ;;  %vm2512_vm13 = vcmp.lt.s32.totalorder %v5916_v57, %v2511_v20 }
 0xb35   : > { %v6178_v21 = vsel %vm2512_vm13, 0.0, %v5679_v60 }
 0xb4a   : > { %5452 = vrot.lane.b32.xlu0 %v6120_v49, %s5674_s28 }
 0xbc1   : > { %v2291_v39 = vpop.xlane.xlu0 %2290 }
 0xbc2   : > { %v2293_v40 = vmul.f32 0.03125, %v2291_v39 }
 0xbc4   : > { %v2295_v41 = vadd.f32 1e-12, %v2293_v40 }
 0xbc5   : > { %v5453_v59 = vpop.permute.xlu0 %5452 }
 0xbc6   : > { %5559 = vrsqrt.f32 %v2295_v41  ;;  %v5455_v61 = vunpack.i.h.bf16 %v5453_v59  ;;  %v5454_v62 = vunpack.i.l.bf16 %v5453_v59 }
 0xbc8   : > { %v5315_v63 = vpack.c.bf16 %v5455_v61, %v5454_v62 }
 0xbca   : > { %5317 = vmatpush3.bf16.xpose.msk.msra.mxu0 %vm6116_vm12, %v5315_v63 }
 0xbcb   : > { %5321 = vmatprep.subr.bf16.mxu0 %v5684_v1 }
 0xbd0   : > { %v5560_v42 = vpop.eup %5559 }
 0xbd1   : > { %v2299_v44 = vmul.f32 %v5560_v42, %v2283_v19 }
 0xbd3   : > { %v2305_v45 = vmul.f32 %v2303_v7, %v2299_v44 }
 0xbd5   : > { %v2311_v46 = vadd.f32 %v2309_v10, %v2305_v45  ;;  %v2501_v10 = vpop.f32.mrb[19].mxu0 }
 0xbd6   : > { %v6168_v3 = vadd.f32 %v2501_v10, %v2412_v50 }
 0xbd7   : > { %5080 = vmatmul.mubr.msk.f32.vlgmr.msra.gmra.mrb[22].mxu1 %vm592_vm1, %v2311_v46 }
 0xbd8   : > { %5100 = vmatprep.mubr.msk.f32.mxu1 %vm5671_vm2, %v5670_v43  ;;  %5310 = vmatpush3.bf16.xpose.msk.msra.mxu1 %vm6116_vm12, %v5308_v2  ;;  %v6172_v18 = vpack.i.bf16 %v6166_v31, %v6168_v3  ;;  %v5342_v19 = vpack.c.bf16 %v6166_v31, %v6168_v3 }
 0xbd9   : > { %5311 = vmatprep.subr.bf16.mxu1 %v5684_v1 }
 0xcaa   : > { %v5081_v4 = vpop.f32.mrb[22].mxu1 }
 0xcab   : > { %v6143_v7 = vadd.f32 %v5081_v4, %v2319_v0  ;;  %v2392_v8 = vpop.f32.mrb[23].mxu1 }
 0xcac   : > { %v6145_v9 = vadd.f32 %v2392_v8, %v2319_v0 }
 0xcae   : > { %2687 = vrot.lane.b32.xlu1 %v6145_v9, %s5674_s28  ;;  %5101 = vmatmul.mubr.msk.f32.vlgmr.msra.gmra.mrb[24].mxu1 %vm734_vm3, %v6145_v9 }
 0xcaf   : > { %5107 = vmatprep.mubr.msk.f32.mxu1 %vm5671_vm2, %v5670_v43 }
 0xcb2   : > { %5457 = vrot.lane.b32.xlu1 %v6120_v49, %s5675_s30 }
 0xcb6   : > { %2866 = vrot.lane.b32.xlu1 %v6145_v9, %s5675_s30 }
 0xd20   : > { %v2688_v11 = vpop.permute.xlu1 %2687 }
 0xd21   : > { %5115 = vmatmul.mubr.msk.f32.vlgmr.msra.gmra.mrb[20].mxu0 %vm734_vm3, %v2688_v11 }
 0xd22   : > { %5128 = vmatprep.mubr.msk.f32.mxu0 %vm5671_vm2, %v5670_v43 }
 0xd24   : > { %v5458_v12 = vpop.permute.xlu1 %5457 }
 0xd25   : > { %v5460_v13 = vunpack.i.h.bf16 %v5458_v12  ;;  %v5459_v14 = vunpack.i.l.bf16 %v5458_v12 }
 0xd27   : > { %v5322_v15 = vpack.c.bf16 %v5460_v13, %v5459_v14 }
 0xd28   : > { %v2867_v16 = vpop.permute.xlu1 %2866 }
 0xd29   : > { %5324 = vmatpush3.bf16.xpose.msk.msra.mxu0 %vm6116_vm12, %v5322_v15 }
 0xd2a   : > { %5332 = vmatprep.subr.bf16.mxu0 %v5684_v1 }
 0xd30   : > { %5129 = vmatmul.mubr.msk.f32.vlgmr.msra.gmra.mrb[22].mxu0 %vm734_vm3, %v2867_v16 }
 0xd31   : > { %5149 = vmatprep.mubr.msk.f32.mxu0 %vm5671_vm2, %v5670_v43 }
 0xd81   : > { %v2589_v38 = vpop.f32.mrb[24].mxu1 }
 0xd82   : > { %v2593_v22 = vmul.f32 0.35355338, %v2589_v38  ;;  %v5102_v23 = vpop.f32.mrb[25].mxu1 }
 0xd84   : > { %v2594_v24 = vadd.f32 %v2593_v22, %v6178_v21 }
 0xd86   : > { %v2596_v25 = vsel %vm2595_vm14, %v2594_v24, -inf }
 0xd87   : > { %2597 = vmax.xlane.f32.xlu0 %v2596_v25 }
 0xdf4   : > { %v2765_v26 = vpop.f32.mrb[20].mxu0 }
 0xdf5   : > { %v2769_v27 = vmul.f32 0.35355338, %v2765_v26  ;;  %v5116_v29 = vpop.f32.mrb[21].mxu0 }
 0xdf7   : > { %v2770_v33 = vadd.f32 %v2769_v27, %v6178_v21 }
 0xdf9   : > { %v2771_v47 = vsel %vm2595_vm14, %v2770_v33, -inf }
 0xdfa   : > { %2772 = vmax.xlane.f32.xlu1 %v2771_v47 }
 0xe03   : > { %v2944_v34 = vpop.f32.mrb[22].mxu0 }
 0xe04   : > { %v2948_v35 = vmul.f32 0.35355338, %v2944_v34  ;;  %v5130_v36 = vpop.f32.mrb[23].mxu0 }
 0xe06   : > { %v2949_v37 = vadd.f32 %v2948_v35, %v6178_v21 }
 0xe08   : > { %v2950_v39 = vsel %vm2595_vm14, %v2949_v37, -inf }
 0xe09   : > { %2951 = vmax.xlane.f32.xlu0 %v2950_v39 }
 0xe0b   : > { %5467 = vrot.lane.b32.xlu1 %v6120_v49, %s5672_s8 }
 0xe0f   : > { %5472 = vrot.lane.b32.xlu1 %v6120_v49, %s5676_s18 }
 0xe14   : > { %v2598_v40 = vpop.xlane.xlu0 %2597 }
 0xe15   : > { %v2599_v41 = vsub.f32 %v2594_v24, %v2598_v40 }
 0xe17   : > { %v2600_v42 = vmul.f32 1.442695, %v2599_v41 }
 0xe19   : > { %5561 = vpow2.f32 %v2600_v42 }
 0xe23   : > { %v5562_v44 = vpop.eup %5561 }
 0xe24   : > { %v2602_v45 = vsel %vm2595_vm14, %v5562_v44, 0.0 }
 0xe25   : > { %2603 = vadd.xlane.f32.xlu0 %v2602_v45 }
 0xe87   : > { %v2773_v46 = vpop.xlane.xlu1 %2772 }
 0xe88   : > { %v2774_v50 = vsub.f32 %v2770_v33, %v2773_v46 }
 0xe8a   : > { %v2775_v51 = vmul.f32 1.442695, %v2774_v50 }
 0xe8b   : > { %v5468_v63 = vpop.permute.xlu1 %5467 }
 0xe8c   : > { %5563 = vpow2.f32 %v2775_v51  ;;  %v5470_v10 = vunpack.i.h.bf16 %v5468_v63 }
 0xe8f   : > { %v5473_v12 = vpop.permute.xlu1 %5472 }
 0xe90   : > { %v5475_v16 = vunpack.i.h.bf16 %v5473_v12  ;;  %v5474_v20 = vunpack.i.l.bf16 %v5473_v12 }
 0xe92   : > { %v5326_v22 = vpack.c.bf16 %v5475_v16, %v5474_v20 }
 0xe96   : > { %v5564_v53 = vpop.eup %5563  ;;  %v2952_v54 = vpop.xlane.xlu0 %2951 }
 0xe97   : > { %v2953_v55 = vsub.f32 %v2949_v37, %v2952_v54  ;;  %v2777_v2 = vsel %vm2595_vm14, %v5564_v53, 0.0 }
 0xe98   : > { %2778 = vadd.xlane.f32.xlu0 %v2777_v2 }
 0xe99   : > { %v2954_v32 = vmul.f32 1.442695, %v2953_v55 }
 0xe9b   : > { %5565 = vpow2.f32 %v2954_v32 }
 0xea5   : > { %v5566_v58 = vpop.eup %5565 }
 0xea6   : > { %v2956_v59 = vsel %vm2595_vm14, %v5566_v58, 0.0 }
 0xea7   : > { %2957 = vadd.xlane.f32.xlu1 %v2956_v59 }
 0xeae   : > { %5462 = vrot.lane.b32.xlu0 %v6120_v49, %s5673_s9 }
 0xeb2   : > { %3045 = vrot.lane.b32.xlu0 %v6145_v9, %s5677_s17  ;;  %v2604_v61 = vpop.xlane.xlu0 %2603  ;;  %v5469_v9 = vunpack.i.l.bf16 %v5468_v63 }
 0xeb3   : > { %5567 = vrcp.f32 %v2604_v61 }
 0xeb4   : > { %v5319_v15 = vpack.c.bf16 %v5470_v10, %v5469_v9 }
 0xeb6   : > { %5482 = vrot.lane.b32.xlu0 %v6172_v18, %s5674_s28 }
 0xeb8   : > { %5477 = vrot.lane.b32.xlu1 %v6120_v49, %s5677_s17 }
 0xeba   : > { %3485 = vrot.lane.b32.xlu0 %v6143_v7, %s5674_s28  ;;  %s6481_s28 = smov 72  }
 0xebd   : > { %v5568_v30 = vpop.eup %5567 }
 0xebe   : > { %v2606_v13 = vmul.f32 %v5568_v30, %v5562_v44 }
 0xf25   : > { %v2779_v62 = vpop.xlane.xlu0 %2778 }
 0xf26   : > { %5569 = vrcp.f32 %v2779_v62 }
 0xf29   : > { %v5463_v0 = vpop.permute.xlu0 %5462 }
 0xf2a   : > { %v5465_v4 = vunpack.i.h.bf16 %v5463_v0  ;;  %v5464_v8 = vunpack.i.l.bf16 %v5463_v0  ;;  %v3310_v0 = vstv %s4772_s15 }
 0xf2b   : > { %vm3311_vm15 = vcmp.lt.s32.totalorder %v5916_v57, %v3310_v0 }
 0xf2c   : > { %v5312_v11 = vpack.c.bf16 %v5465_v4, %v5464_v8  ;;  %v6247_v8 = vsel %vm3311_vm15, 0.0, %v5679_v60 }
 0xf2d   : > { %v3046_v47 = vpop.permute.xlu0 %3045 }
 0xf2e   : > { %5313 = vmatpush3.bf16.msra.mxu1 %v5312_v11 }
 0xf2f   : > { %5318 = vmatprep.subr.bf16.mxu1 %v5684_v1 }
 0xf30   : > { %v5570_v14 = vpop.eup %5569 }
 0xf31   : > { %5108 = vmatmul.mubr.msk.f32.vlgmr.msra.gmra.mrb[26].mxu1 %vm2595_vm14, %v2606_v13  ;;  %v2781_v38 = vmul.f32 %v5570_v14, %v5564_v53  ;;  %v5483_v34 = vpop.permute.xlu0 %5482 }
 0xf32   : > { %5320 = vmatpush3.bf16.msra.mxu1 %v5319_v15  ;;  %5121 = vmatprep.mubr.msk.f32.mxu1 %vm5671_vm2, %v5670_v43  ;;  %v5485_v35 = vunpack.i.h.bf16 %v5483_v34  ;;  %v5484_v36 = vunpack.i.l.bf16 %v5483_v34 }
 0xf33   : > { %5325 = vmatprep.subr.bf16.mxu1 %v5684_v1 }
 0xf34   : > { %v2958_v23 = vpop.xlane.xlu1 %2957  ;;  %v5349_v37 = vpack.c.bf16 %v5485_v35, %v5484_v36  ;;  %v3225_v36 = vld [vmem:[%s5813_s16] sm:$0xff] }
 0xf35   : > { %5571 = vrcp.f32 %v2958_v23  ;;  %5122 = vmatmul.mubr.msk.f32.vlgmr.msra.gmra.mrb[28].mxu1 %vm2595_vm14, %v2781_v38  ;;  %v3486_v31 = vpop.permute.xlu0 %3485 }
 0xf36   : > { %5327 = vmatpush3.bf16.msra.mxu1 %v5326_v22  ;;  %5135 = vmatprep.mubr.msk.f32.mxu1 %vm5671_vm2, %v5670_v43 }
 0xf37   : > { %5328 = vmatprep.subr.bf16.mxu1 %v5684_v1 }
 0xf38   : > { %v5478_v24 = vpop.permute.xlu1 %5477 }
 0xf39   : > { %v5480_v25 = vunpack.i.h.bf16 %v5478_v24  ;;  %v5479_v26 = vunpack.i.l.bf16 %v5478_v24 }
 0xf3b   : > { %v5329_v33 = vpack.c.bf16 %v5480_v25, %v5479_v26 }
 0xf3f   : > { %v5572_v27 = vpop.eup %5571 }
 0xf40   : > { %v2960_v29 = vmul.f32 %v5572_v27, %v5566_v58 }
 0xf42   : > { %5136 = vmatmul.mubr.msk.f32.vlgmr.msra.gmra.mrb[30].mxu1 %vm2595_vm14, %v2960_v29 }
 0xf43   : > { %5331 = vmatpush3.bf16.xpose.msk.msra.mxu1 %vm6116_vm12, %v5329_v33  ;;  %5142 = vmatprep.mubr.msk.f32.mxu1 %vm5671_vm2, %v5670_v43 }
 0xf44   : > { %5341 = vmatprep.subr.bf16.mxu1 %v5684_v1 }
 0xf4a   : > { %5143 = vmatmul.mubr.msk.f32.vlgmr.msra.gmra.mrb[32].mxu1 %vm734_vm3, %v3046_v47 }
 0xf4b   : > { %5344 = vmatpush3.bf16.xpose.msk.msra.mxu1 %vm6116_vm12, %v5342_v19  ;;  %5167 = vmatprep.mubr.msk.f32.mxu1 %vm5671_vm2, %v5670_v43 }
 0xf4c   : > { %5348 = vmatprep.subr.bf16.mxu1 %v5684_v1 }
 0xf52   : > { %5168 = vmatmul.mubr.msk.f32.vlgmr.msra.gmra.mrb[34].mxu1 %vm734_vm3, %v6143_v7 }
 0xf53   : > { %5351 = vmatpush3.bf16.xpose.msk.msra.mxu1 %vm6116_vm12, %v5349_v37  ;;  %5181 = vmatprep.mubr.msk.f32.mxu1 %vm5671_vm2, %v5670_v43  ;;  %v3226_v37 = vld [vmem:[%s5813_s16 + $0x8] sm:$0xff] }
 0xf54   : > { %5359 = vmatprep.subr.bf16.mxu1 %v5684_v1 }
 0xf5a   : > { %5182 = vmatmul.mubr.msk.f32.vlgmr.msra.gmra.mrb[36].mxu1 %vm734_vm3, %v3486_v31  ;;  %v6263_v31 = vpack.c.bf16 %v3226_v37, %v3225_v36 }
 0xf5b   : > { %5202 = vmatprep.mubr.msk.f32.mxu1 %vm5671_vm2, %v5670_v43 }
0x1004   : > { %v2682_v3 = vpop.f32.mrb[26].mxu1 }
0x1005   : > { %2686 = vst.msk [vmem:[#allocation3] sm:$0xff] %vm734_vm3, %v2682_v3  ;;  %v5109_v19 = vpop.f32.mrb[27].mxu1  ;;  %v3227_v3 = vld [vmem:[%s5813_s16 + $0x10] sm:$0xff] }
0x1006   : > { %v3228_v19 = vld [vmem:[%s5813_s16 + $0x18] sm:$0xff]  ;;  %s5690_s16 = smov (!%p4794_p1), 1.0  }
0x1008   : > { %v2857_v39 = vpop.f32.mrb[28].mxu1 }
0x1009   : > { %v5123_v40 = vpop.f32.mrb[29].mxu1 }
0x1015   : > { %v3036_v41 = vpop.f32.mrb[30].mxu1 }
0x1016   : > { %v5137_v42 = vpop.f32.mrb[31].mxu1 }
0x101d   : > { %v3123_v44 = vpop.f32.mrb[32].mxu1 }
0x101e   : > { %v3127_v45 = vmul.f32 0.35355338, %v3123_v44  ;;  %v5144_v46 = vpop.f32.mrb[33].mxu1 }
0x1020   : > { %v3128_v50 = vadd.f32 %v3127_v45, %v6178_v21 }
0x1022   : > { %v3129_v51 = vsel %vm2595_vm14, %v3128_v50, -inf }
0x1023   : > { %3130 = vmax.xlane.f32.xlu1 %v3129_v51 }
0x1025   : > { %v3388_v53 = vpop.f32.mrb[34].mxu1 }
0x1026   : > { %v5169_v54 = vpop.f32.mrb[35].mxu1 }
0x102d   : > { %v3563_v55 = vpop.f32.mrb[36].mxu1 }
0x102e   : > { %v5183_v2 = vpop.f32.mrb[37].mxu1  ;;  %v3567_v10 = vmul.f32 0.35355338, %v3563_v55 }
0x1030   : > { %v3568_v13 = vadd.f32 %v3567_v10, %v6247_v8 }
0x1032   : > { %v3569_v14 = vsel %vm2595_vm14, %v3568_v13, -inf }
0x1034   : > { %5487 = vrot.lane.b32.xlu1 %v6120_v49, %s6481_s28  ;;  %v3392_v49 = vmul.f32 0.35355338, %v3388_v53 }
0x1036   : > { %v3393_v11 = vadd.f32 %v3392_v49, %v6247_v8  ;;  %v6303_v49 = vrot.slane %v6109_v48, %v2302_v5 }
0x1038   : > { %2862 = vrot.lane.b32.xlu1 %v2857_v39, %s5685_s29  ;;  %v3394_v12 = vsel %vm2595_vm14, %v3393_v11, -inf  ;;  %v6269_v39 = vpack.c.bf16 %v3228_v19, %v3227_v3 }
0x10b0   : > { %v3131_v32 = vpop.xlane.xlu1 %3130 }
0x10b1   : > { %v3132_v58 = vsub.f32 %v3128_v50, %v3131_v32 }
0x10b3   : > { %v3133_v59 = vmul.f32 1.442695, %v3132_v58 }
0x10b4   : > { %v5488_v61 = vpop.permute.xlu1 %5487 }
0x10b5   : > { %5573 = vpow2.f32 %v3133_v59  ;;  %v5490_v62 = vunpack.i.h.bf16 %v5488_v61  ;;  %v5489_v21 = vunpack.i.l.bf16 %v5488_v61 }
0x10b7   : > { %v5333_v63 = vpack.c.bf16 %v5490_v62, %v5489_v21 }
0x10b8   : > { %v2863_v4 = vpop.permute.xlu1 %2862 }
0x10b9   : > { %2865 = vst.msk [vmem:[#allocation3] sm:$0xff] %vm1070_vm7, %v2863_v4  ;;  %5334 = vmatpush3.bf16.msra.mxu0 %v5333_v63 }
0x10ba   : > { %5335 = vmatprep.subr.bf16.mxu0 %v5684_v1 }
0x10bf   : > { %v5574_v30 = vpop.eup %5573 }
0x10c0   : > { %v3135_v9 = vsel %vm2595_vm14, %v5574_v30, 0.0 }
0x10c1   : > { %3136 = vadd.xlane.f32.xlu0 %v3135_v9 }
0x10c5   : > { %3395 = vmax.xlane.f32.xlu0 %v3394_v12 }
0x10c9   : > { %3570 = vmax.xlane.f32.xlu0 %v3569_v14 }
0x114e   : > { %v3137_v15 = vpop.xlane.xlu0 %3136 }
0x114f   : > { %5575 = vrcp.f32 %v3137_v15 }
0x1152   : > { %v3396_v16 = vpop.xlane.xlu0 %3395 }
0x1153   : > { %v3397_v60 = vsub.f32 %v3393_v11, %v3396_v16 }
0x1155   : > { %v3398_v20 = vmul.f32 1.442695, %v3397_v60 }
0x1156   : > { %v3571_v38 = vpop.xlane.xlu0 %3570 }
0x1157   : > { %5577 = vpow2.f32 %v3398_v20  ;;  %v3572_v22 = vsub.f32 %v3568_v13, %v3571_v38 }
0x1159   : > { %v5576_v23 = vpop.eup %5575  ;;  %v3573_v24 = vmul.f32 1.442695, %v3572_v22 }
0x115a   : > { %v3139_v25 = vmul.f32 %v5576_v23, %v5574_v30 }
0x115b   : > { %5579 = vpow2.f32 %v3573_v24 }
0x115c   : > { %5150 = vmatmul.mubr.msk.f32.vlgmr.msra.gmra.mrb[24].mxu0 %vm2595_vm14, %v3139_v25 }
0x115d   : > { %5160 = vmatprep.mubr.msk.f32.mxu0 %vm5671_vm2, %v5670_v43  ;;  %5337 = vmatpush3.bf16.msra.mxu0 %v6263_v31 }
0x115e   : > { %5338 = vmatprep.subr.bf16.mxu0 %v5684_v1 }
0x1161   : > { %v5578_v26 = vpop.eup %5577  ;;  %5340 = vmatpush3.bf16.msra.mxu0 %v6269_v39 }
0x1162   : > { %v3400_v27 = vsel %vm2595_vm14, %v5578_v26, 0.0  ;;  %5345 = vmatprep.subr.bf16.mxu0 %v5684_v1 }
0x1163   : > { %3401 = vadd.xlane.f32.xlu0 %v3400_v27 }
0x1165   : > { %v5580_v29 = vpop.eup %5579 }
0x1166   : > { %v3575_v33 = vsel %vm2595_vm14, %v5580_v29, 0.0 }
0x1167   : > { %3576 = vadd.xlane.f32.xlu0 %v3575_v33 }
0x117d   : > { %3041 = vrot.lane.b32.xlu0 %v3036_v41, %s5686_s23 }
0x11f0   : > { %v3402_v47 = vpop.xlane.xlu0 %3401 }
0x11f1   : > { %5581 = vrcp.f32 %v3402_v47 }
0x11f4   : > { %v3577_v34 = vpop.xlane.xlu0 %3576 }
0x11f5   : > { %5583 = vrcp.f32 %v3577_v34 }
0x11f8   : > { %v3042_v35 = vpop.permute.xlu0 %3041 }
0x11f9   : > { %3044 = vst.msk [vmem:[#allocation3] sm:$0xff] %vm1243_vm8, %v3042_v35 }
0x11fb   : > { %v5582_v51 = vpop.eup %5581 }
0x11fc   : > { %v3404_v32 = vmul.f32 %v5582_v51, %v5578_v26 }
0x11ff   : > { %v5584_v59 = vpop.eup %5583 }
0x1200   : > { %v3579_v62 = vmul.f32 %v5584_v59, %v5580_v29 }
0x122f   : > { %v3215_v40 = vpop.f32.mrb[24].mxu0 }
0x1230   : > { %3220 = vrot.lane.b32.xlu1 %v3215_v40, %s5687_s21  ;;  %v5151_v41 = vpop.f32.mrb[25].mxu0 }
0x1234   : > { %5492 = vrot.lane.b32.xlu1 %v6172_v18, %s5673_s9 }
0x1238   : > { %5497 = vrot.lane.b32.xlu1 %v6172_v18, %s5672_s8 }
0x123c   : > { %5502 = vrot.lane.b32.xlu1 %v6172_v18, %s5675_s30 }
0x1240   : > { %3664 = vrot.lane.b32.xlu1 %v6143_v7, %s5675_s30 }
0x12a2   : > { %v3221_v42 = vpop.permute.xlu1 %3220 }
0x12a3   : > { %3223 = vst.msk [vmem:[#allocation3] sm:$0xff] %vm1416_vm9, %v3221_v42 }
0x12a6   : > { %v5493_v44 = vpop.permute.xlu1 %5492 }
0x12a7   : > { %v5495_v45 = vunpack.i.h.bf16 %v5493_v44  ;;  %v5494_v46 = vunpack.i.l.bf16 %v5493_v44 }
0x12a9   : > { %v5346_v50 = vpack.c.bf16 %v5495_v45, %v5494_v46 }
0x12aa   : > { %v5498_v53 = vpop.permute.xlu1 %5497  ;;  %v3224_v54 = vld [vmem:[#allocation3] sm:$0xff] }
0x12ab   : > { %v5500_v55 = vunpack.i.h.bf16 %v5498_v53  ;;  %v5499_v2 = vunpack.i.l.bf16 %v5498_v53  ;;  %5161 = vmatmul.mubr.msk.f32.vlgmr.msra.gmra.mrb[26].mxu0 %vm592_vm1, %v3224_v54 }
0x12ac   : > { %5347 = vmatpush3.bf16.msra.mxu0 %v5346_v50  ;;  %5174 = vmatprep.mubr.msk.f32.mxu0 %vm5671_vm2, %v5670_v43 }
0x12ad   : > { %v5353_v58 = vpack.c.bf16 %v5500_v55, %v5499_v2  ;;  %5352 = vmatprep.subr.bf16.mxu0 %v5684_v1 }
0x12ae   : > { %v5503_v61 = vpop.permute.xlu1 %5502 }
0x12af   : > { %5175 = vmatmul.mubr.msk.f32.vlgmr.msra.gmra.mrb[28].mxu0 %vm2595_vm14, %v3404_v32  ;;  %v5505_v21 = vunpack.i.h.bf16 %v5503_v61  ;;  %v5504_v63 = vunpack.i.l.bf16 %v5503_v61 }
0x12b0   : > { %5354 = vmatpush3.bf16.msra.mxu0 %v5353_v58  ;;  %5188 = vmatprep.mubr.msk.f32.mxu0 %vm5671_vm2, %v5670_v43 }
0x12b1   : > { %5355 = vmatprep.subr.bf16.mxu0 %v5684_v1  ;;  %v5356_v0 = vpack.c.bf16 %v5505_v21, %v5504_v63 }
0x12b2   : > { %v3665_v4 = vpop.permute.xlu1 %3664 }
0x12b3   : > { %5189 = vmatmul.mubr.msk.f32.vlgmr.msra.gmra.mrb[30].mxu0 %vm2595_vm14, %v3579_v62 }
0x12b4   : > { %5195 = vmatprep.mubr.msk.f32.mxu0 %vm5671_vm2, %v5670_v43 }
0x12b9   : > { %5358 = vmatpush3.bf16.xpose.msk.msra.mxu0 %vm6116_vm12, %v5356_v0 }
0x12ba   : > { %5366 = vmatprep.subr.bf16.mxu0 %v5684_v1 }
0x12c0   : > { %5196 = vmatmul.mubr.msk.f32.vlgmr.msra.gmra.mrb[32].mxu0 %vm734_vm3, %v3665_v4 }
0x12c1   : > { %5216 = vmatprep.mubr.msk.f32.mxu0 %vm5671_vm2, %v5670_v43 }
0x137e   : > { %v3298_v30 = vpop.f32.mrb[26].mxu0 }
0x137f   : > { %v3302_v10 = vadd.f32 %v3298_v30, %v6059_v52  ;;  %v5162_v9 = vpop.f32.mrb[27].mxu0 }
0x1381   : > { %v3307_v11 = vadd.f32 %v6303_v49, %v3302_v10 }
0x1382   : > { %v3480_v12 = vpop.f32.mrb[28].mxu0 }
0x1383   : > { %3308 = vst.msk [vmem:[#allocation2] sm:$0xff] %vm592_vm1, %v3307_v11  ;;  %v5176_v13 = vpop.f32.mrb[29].mxu0 }
0x1384   : > { %3484 = vst.msk [vmem:[#allocation3] sm:$0xff] %vm734_vm3, %v3480_v12 }
0x1386   : > { %v3655_v14 = vpop.f32.mrb[30].mxu0 }
0x1387   : > { %v5190_v15 = vpop.f32.mrb[31].mxu0 }
0x1388   : > { %v4133_v15 = vsub.s32 4, %v5854_v28 }
0x138a   : > { %v6330_v56 = vld [vmem:[#allocation2] sm:$0xff] }
0x138b   : > { %v4105_v51 = vsel %vm592_vm1, %v6330_v56, 0.0 }
0x1393   : > { %v3742_v16 = vpop.f32.mrb[32].mxu0 }
0x1394   : > { %v3746_v60 = vmul.f32 0.35355338, %v3742_v16  ;;  %v5197_v20 = vpop.f32.mrb[33].mxu0  ;;  %v4139_v16 = vsub.s32 5, %v5854_v28 }
0x1396   : > { %v3747_v5 = vadd.f32 %v3746_v60, %v6247_v8  ;;  %v5597_v60 = vld [vmem:[%s5828_s26] sm:$0xff] }
0x1397   : > { %v4134_v20 = vrot.slane %v5597_v60, %v4133_v15 }
0x1398   : > { %v3748_v38 = vsel %vm2595_vm14, %v3747_v5, -inf }
0x1399   : > { %3749 = vmax.xlane.f32.xlu1 %v3748_v38  ;;  %v4140_v38 = vrot.slane %v5597_v60, %v4139_v16 }
0x13aa   : > { %5512 = vrot.lane.b32.xlu1 %v6172_v18, %s5677_s17 }
0x13ae   : > { %3843 = vrot.lane.b32.xlu1 %v6143_v7, %s5677_s17 }
0x1426   : > { %v3750_v52 = vpop.xlane.xlu1 %3749 }
0x1427   : > { %v3751_v22 = vsub.f32 %v3747_v5, %v3750_v52 }
0x1429   : > { %v3752_v23 = vmul.f32 1.442695, %v3751_v22 }
0x142a   : > { %v5513_v34 = vpop.permute.xlu1 %5512 }
0x142b   : > { %5585 = vpow2.f32 %v3752_v23  ;;  %v5515_v35 = vunpack.i.h.bf16 %v5513_v34  ;;  %v5514_v36 = vunpack.i.l.bf16 %v5513_v34 }
0x142d   : > { %v5363_v3 = vpack.c.bf16 %v5515_v35, %v5514_v36  ;;  %v4143_v35 = vld [vmem:[%s5818_s19] sm:$0xff]  ;;  %v4144_v36 = vld [vmem:[%s5818_s19 + $0x8] sm:$0xff] }
0x142e   : > { %v3844_v19 = vpop.permute.xlu1 %3843 }
0x1435   : > { %v5586_v24 = vpop.eup %5585 }
0x1436   : > { %v3754_v25 = vsel %vm2595_vm14, %v5586_v24, 0.0 }
0x1437   : > { %3755 = vadd.xlane.f32.xlu0 %v3754_v25 }
0x144d   : > { %5507 = vrot.lane.b32.xlu0 %v6172_v18, %s5676_s18 }
0x14c4   : > { %v3756_v26 = vpop.xlane.xlu0 %3755 }
0x14c5   : > { %5587 = vrcp.f32 %v3756_v26 }
0x14c8   : > { %v5508_v27 = vpop.permute.xlu0 %5507 }
0x14c9   : > { %v5510_v29 = vunpack.i.h.bf16 %v5508_v27  ;;  %v5509_v33 = vunpack.i.l.bf16 %v5508_v27 }
0x14cb   : > { %v5360_v47 = vpack.c.bf16 %v5510_v29, %v5509_v33 }
0x14cd   : > { %5361 = vmatpush3.bf16.msra.mxu1 %v5360_v47 }
0x14ce   : > { %5362 = vmatprep.subr.bf16.mxu1 %v5684_v1 }
0x14cf   : > { %v5588_v7 = vpop.eup %5587 }
0x14d0   : > { %v3758_v37 = vmul.f32 %v5588_v7, %v5586_v24 }
0x14d2   : > { %5203 = vmatmul.mubr.msk.f32.vlgmr.msra.gmra.mrb[38].mxu1 %vm2595_vm14, %v3758_v37  ;;  %v5375_v37 = vpack.c.bf16 %v4144_v36, %v4143_v35 }
0x14d3   : > { %5209 = vmatprep.mubr.msk.f32.mxu1 %vm5671_vm2, %v5670_v43 }
0x14d6   : > { %5365 = vmatpush3.bf16.xpose.msk.msra.mxu1 %vm6116_vm12, %v5363_v3  ;;  %v4145_v3 = vld [vmem:[%s5818_s19 + $0x10] sm:$0xff] }
0x14d7   : > { %5376 = vmatprep.subr.bf16.mxu1 %v5375_v37 }
0x14dd   : > { %5210 = vmatmul.mubr.msk.f32.vlgmr.msra.gmra.mrb[40].mxu1 %vm734_vm3, %v3844_v19  ;;  %v4146_v19 = vld [vmem:[%s5818_s19 + $0x18] sm:$0xff] }
0x14de   : > { %5378 = vmatpush3.bf16.msra.mxu1 %v5375_v37 }
0x15a5   : > { %v3834_v40 = vpop.f32.mrb[38].mxu1 }
0x15a6   : > { %v5204_v41 = vpop.f32.mrb[39].mxu1 }
0x15a7   : > { %v4147_v41 = vld [vmem:[%s5823_s22] sm:$0xff] }
0x15b0   : > { %v3921_v42 = vpop.f32.mrb[40].mxu1 }
0x15b1   : > { %v3925_v44 = vmul.f32 0.35355338, %v3921_v42  ;;  %v5211_v45 = vpop.f32.mrb[41].mxu1  ;;  %v4148_v42 = vld [vmem:[%s5823_s22 + $0x8] sm:$0xff] }
0x15b2   : > { %v5383_v45 = vpack.c.bf16 %v4148_v42, %v4147_v41 }
0x15b3   : > { %v3926_v46 = vadd.f32 %v3925_v44, %v6247_v8  ;;  %v4149_v44 = vld [vmem:[%s5823_s22 + $0x10] sm:$0xff] }
0x15b5   : > { %v3927_v50 = vsel %vm2595_vm14, %v3926_v46, -inf }
0x15b6   : > { %3928 = vmax.xlane.f32.xlu0 %v3927_v50 }
0x15cc   : > { %5517 = vrot.lane.b32.xlu0 %v6172_v18, %s6481_s28 }
0x15d0   : > { %3839 = vrot.lane.b32.xlu0 %v3834_v40, %s5686_s23  ;;  %v5379_v40 = vpack.c.bf16 %v4146_v19, %v4145_v3  ;;  %v4795_v3 = vld [vmem:[%s6455_s5] ss:$0 sm:$0xff] (!%p4794_p1) }
0x15d2   : > { %5380 = vmatprep.subr.bf16.mxu1 %v5379_v40 }
0x15d3   : > { %5382 = vmatpush3.bf16.msra.mxu1 %v5379_v40  ;;  %v4796_v40 = vld [vmem:[%s6455_s5 + $0x1] ss:$0 sm:$0xff] (!%p4794_p1) }
0x15ef   : > { %4106 = vadd.xlane.f32.xlu0 %v4105_v51  ;;  %v4151_v51 = vld [vmem:[%s5823_s22 + $0x20] sm:$0xff] }
0x1643   : > { %v3929_v53 = vpop.xlane.xlu0 %3928 }
0x1644   : > { %v3930_v54 = vsub.f32 %v3926_v46, %v3929_v53  ;;  %v4150_v46 = vld [vmem:[%s5823_s22 + $0x18] sm:$0xff]  ;;  %v4152_v53 = vld [vmem:[%s5823_s22 + $0x28] sm:$0xff] }
0x1645   : > { %v5387_v50 = vpack.c.bf16 %v4150_v46, %v4149_v44 }
0x1646   : > { %v3931_v55 = vmul.f32 1.442695, %v3930_v54  ;;  %v5391_v54 = vpack.c.bf16 %v4152_v53, %v4151_v51  ;;  %v4797_v51 = vld [vmem:[%s6455_s5 + $0x2] ss:$0 sm:$0xff] (!%p4794_p1) }
0x1647   : > { %v5518_v2 = vpop.permute.xlu0 %5517 }
0x1648   : > { %5589 = vpow2.f32 %v3931_v55  ;;  %v5520_v8 = vunpack.i.h.bf16 %v5518_v2  ;;  %v5519_v32 = vunpack.i.l.bf16 %v5518_v2 }
0x164a   : > { %v5367_v58 = vpack.c.bf16 %v5520_v8, %v5519_v32 }
0x164b   : > { %v3840_v61 = vpop.permute.xlu0 %3839 }
0x164c   : > { %5368 = vmatpush3.bf16.msra.mxu0 %v5367_v58 }
0x164d   : > { %5369 = vmatprep.subr.bf16.mxu0 %v5684_v1 }
0x1652   : > { %v5590_v18 = vpop.eup %5589 }
0x1653   : > { %v3933_v59 = vsel %vm2595_vm14, %v5590_v18, 0.0 }
0x1654   : > { %3934 = vadd.xlane.f32.xlu1 %v3933_v59 }
0x1665   : > { %3660 = vrot.lane.b32.xlu1 %v3655_v14, %s5685_s29 }
0x167c   : > { %v4107_v62 = vpop.xlane.xlu0 %4106 }
0x167d   : > { %v4111_v21 = vmul.f32 0.03125, %v4107_v62  ;;  %v4154_v62 = vld [vmem:[%s5823_s22 + $0x38] sm:$0xff] }
0x167f   : > { %v4113_v63 = vsub.f32 %v6330_v56, %v4111_v21 }
0x1681   : > { %v4115_v0 = vmul.f32 %v4113_v63, %v4113_v63 }
0x1683   : > { %v4117_v4 = vsel %vm592_vm1, %v4115_v0, 0.0 }
0x1684   : > { %4118 = vadd.xlane.f32.xlu0 %v4117_v4 }
0x16e1   : > { %v3935_v30 = vpop.xlane.xlu1 %3934 }
0x16e2   : > { %5591 = vrcp.f32 %v3935_v30 }
0x16e5   : > { %v3661_v10 = vpop.permute.xlu1 %3660 }
0x16e6   : > { %3663 = vst.msk [vmem:[#allocation3] sm:$0xff] %vm1070_vm7, %v3661_v10 }
0x16e7   : > { %3842 = vst.msk [vmem:[#allocation3] sm:$0xff] %vm1243_vm8, %v3840_v61  ;;  %v4153_v61 = vld [vmem:[%s5823_s22 + $0x30] sm:$0xff] }
0x16e8   : > { %v5395_v21 = vpack.c.bf16 %v4154_v62, %v4153_v61 }
0x16ec   : > { %v5592_v9 = vpop.eup %5591 }
0x16ed   : > { %v3937_v11 = vmul.f32 %v5592_v9, %v5590_v18 }
0x16ef   : > { %5217 = vmatmul.mubr.msk.f32.vlgmr.msra.gmra.mrb[34].mxu0 %vm2595_vm14, %v3937_v11 }
0x16f0   : > { %5371 = vmatpush3.bf16.msra.mxu0 %v6263_v31  ;;  %5227 = vmatprep.mubr.msk.f32.mxu0 %vm5671_vm2, %v5670_v43 }
0x16f1   : > { %5372 = vmatprep.subr.bf16.mxu0 %v5684_v1 }
0x16f4   : > { %5374 = vmatpush3.bf16.msra.mxu0 %v6269_v39 }
0x16f5   : > { %5384 = vmatprep.subr.bf16.mxu0 %v5383_v45 }
0x1711   : > { %v4119_v12 = vpop.xlane.xlu0 %4118 }
0x1712   : > { %v4123_v13 = vmul.f32 0.03125, %v4119_v12  ;;  %v4245_v12 = vrot.slane %v6109_v48, %v4133_v15 }
0x1714   : > { %v4125_v14 = vadd.f32 1e-12, %v4123_v13 }
0x1716   : > { %5593 = vrsqrt.f32 %v4125_v14 }
0x1720   : > { %v5594_v31 = vpop.eup %5593 }
0x1721   : > { %v4129_v5 = vmul.f32 %v5594_v31, %v4113_v63  ;;  %v4158_v63 = vrot.slane %v6109_v48, %v2308_v6 }
0x1723   : > { %v4135_v43 = vmul.f32 %v4134_v20, %v4129_v5 }
0x1725   : > { %v4141_v52 = vadd.f32 %v4140_v38, %v4135_v43 }
0x1727   : > { %5238 = vmatprep.mubr.msk.f32.mxu1 %vm592_vm1, %v4141_v52 }
0x17c2   : > { %v4013_v1 = vpop.f32.mrb[34].mxu0 }
0x17c3   : > { %4018 = vrot.lane.b32.xlu1 %v4013_v1, %s5687_s21  ;;  %v5218_v39 = vpop.f32.mrb[35].mxu0 }
0x1835   : > { %v4019_v22 = vpop.permute.xlu1 %4018 }
0x1836   : > { %4021 = vst.msk [vmem:[#allocation3] sm:$0xff] %vm1416_vm9, %v4019_v22 }
0x183d   : > { %v4022_v23 = vld [vmem:[#allocation3] sm:$0xff] }
0x183e   : > { %5228 = vmatmul.mubr.msk.f32.vlgmr.msra.gmra.mrb[36].mxu0 %vm592_vm1, %v4022_v23 }
0x183f   : > { %5386 = vmatpush3.bf16.msra.mxu0 %v5383_v45 }
0x1840   : > { %5388 = vmatprep.subr.bf16.mxu0 %v5387_v50 }
0x1843   : > { %5390 = vmatpush3.bf16.msra.mxu0 %v5387_v50 }
0x1844   : > { %5392 = vmatprep.subr.bf16.mxu0 %v5391_v54 }
0x1847   : > { %5394 = vmatpush3.bf16.msra.mxu0 %v5391_v54 }
0x1848   : > { %5396 = vmatprep.subr.bf16.mxu0 %v5395_v21 }
0x184b   : > { %5398 = vmatpush3.bf16.msra.mxu0 %v5395_v21 }
0x1911   : > { %v4096_v24 = vpop.f32.mrb[36].mxu0 }
0x1912   : > { %v4100_v25 = vadd.f32 %v4096_v24, %v6081_v17  ;;  %v5229_v26 = vpop.f32.mrb[37].mxu0 }
0x1913   : > { %v4379_v26 = vld [vmem:[%s6456_s6 + $0x8] sm:$0xff] (!%p4794_p1) }
0x1914   : > { %v4101_v27 = vadd.f32 %v4100_v25, %v6303_v49  ;;  %v4378_v25 = vld [vmem:[%s6456_s6] sm:$0xff] (!%p4794_p1) }
0x1916   : > { %4102 = vst.msk [vmem:[#allocation2 + $0x8] sm:$0xff] %vm592_vm1, %v4101_v27  ;;  %v4380_v27 = vld [vmem:[%s6456_s6 + $0x10] sm:$0xff] (!%p4794_p1) }
0x191d   : > { %v6359_v29 = vld [vmem:[#allocation2 + $0x8] sm:$0xff] }
0x191e   : > { %v4108_v33 = vsel %vm592_vm1, %v6359_v29, 0.0 }
0x191f   : > { %4109 = vadd.xlane.f32.xlu1 %v4108_v33  ;;  %v4381_v33 = vld [vmem:[%s6456_s6 + $0x18] sm:$0xff] (!%p4794_p1) }
0x19ac   : > { %v4110_v47 = vpop.xlane.xlu1 %4109 }
0x19ad   : > { %v4112_v34 = vmul.f32 0.03125, %v4110_v47  ;;  %v5403_v47 = vpack.c.bf16 (!%p4794_p1), %v4381_v33, %v4380_v27 }
0x19af   : > { %v4114_v7 = vsub.f32 %v6359_v29, %v4112_v34 }
0x19b1   : > { %v4116_v17 = vmul.f32 %v4114_v7, %v4114_v7 }
0x19b3   : > { %v4120_v49 = vsel %vm592_vm1, %v4116_v17, 0.0 }
0x19b4   : > { %4121 = vadd.xlane.f32.xlu0 %v4120_v49 }
0x1a41   : > { %v4122_v55 = vpop.xlane.xlu0 %4121 }
0x1a42   : > { %v4124_v2 = vmul.f32 0.03125, %v4122_v55 }
0x1a44   : > { %v4126_v8 = vadd.f32 1e-12, %v4124_v2 }
0x1a46   : > { %5595 = vrsqrt.f32 %v4126_v8 }
0x1a50   : > { %v5596_v32 = vpop.eup %5595 }
0x1a51   : > { %v4130_v58 = vmul.f32 %v5596_v32, %v4114_v7 }
0x1a53   : > { %v4136_v18 = vmul.f32 %v4134_v20, %v4130_v58  ;;  %v5688_v58 = vmov (!%p4794_p1), 0  }
0x1a54   : > { %5599 = vset.pattern.permute.xlu1 (!%p4794_p1), %v5688_v58  ;;  %5598 = vset.pattern.permute.xlu0 (!%p4794_p1), %v5688_v58 }
0x1a55   : > { %v4142_v59 = vadd.f32 %v4140_v38, %v4136_v18 }
0x1a57   : > { %5239 = vmatmul.mubr.msk.f32.vlgmr.msra.gmra.mrb[42].mxu1 %vm592_vm1, %v4142_v59 }
0x1b2a   : > { %v5240_v0 = vpop.f32.mrb[42].mxu1 }
0x1b2b   : > { %v4237_v4 = vadd.f32 %v5240_v0, %v4158_v63  ;;  %v4231_v30 = vpop.f32.mrb[43].mxu1 }
0x1b2c   : > { %v4232_v10 = vadd.f32 %v4231_v30, %v4158_v63 }
0x1b2d   : > { %v4241_v11 = vmax.f32 %v4237_v4, 0.0 }
0x1b2e   : > { %v4240_v9 = vmax.f32 %v4232_v10, 0.0 }
0x1b30   : > { %5257 = vmatprep.mubr.msk.f32.mxu0 %vm4246_vm0, %v4240_v9  ;;  %v4495_v9 = vld [vmem:[%s6454_s4 + $0x8] sm:$0xff] (!%p4794_p1) }
0x1b31   : > { %5258 = vmatmul.mubr.msk.f32.vlgmr.msra.gmra.mrb[38].mxu0 %vm4246_vm0, %v4241_v11  ;;  %v4494_v11 = vld [vmem:[%s6454_s4] sm:$0xff] (!%p4794_p1)  ;;  %vm4525_vm3 = vcmp.ne.s32.totalorder (!%p4794_p1), %v4495_v9, 4294967295 }
0x1b32   : > { %vm4524_vm4 = vcmp.ne.s32.totalorder (!%p4794_p1), %v4494_v11, 4294967295 }
0x1c04   : > { %v5259_v13 = vpop.f32.mrb[38].mxu0  ;;  %4335 = sbr.rel (%p4794_p1) target bundleno = 8474 (0x211a), region = 80 }
0x1c05   : > { %v4325_v14 = vadd.f32 %v5259_v13, %v4245_v12  ;;  %v4319_v16 = vpop.f32.mrb[39].mxu0 }
0x1c06   : > { %v4320_v60 = vadd.f32 %v4319_v16, %v4245_v12  ;;  %v5689_v16 = vmov (!%p4794_p1), 0.0  }
0x1c07   : > { %v4329_v20 = vadd.f32 %v4325_v14, %v6359_v29  ;;  %v5399_v29 = vpack.c.bf16 (!%p4794_p1), %v4379_v26, %v4378_v25 }
0x1c08   : > { %v4328_v6 = vadd.f32 %v4320_v60, %v6330_v56 }
0x1c09   : > { %4331 = vst.msk [vmem:[#allocation2 + $0x8] sm:$0xff] %vm592_vm1, %v4329_v20  ;;  %5400 = vmatprep.subr.bf16.mxu0 (!%p4794_p1), %v5399_v29 }
0x1c0a   : > { %4330 = vst.msk [vmem:[#allocation2] sm:$0xff] %vm592_vm1, %v4328_v6  ;;  %5402 = vmatpush3.bf16.msra.mxu0 (!%p4794_p1), %v5399_v29 }
0x1c0b   : > { %5404 = vmatprep.subr.bf16.mxu0 %v5403_v47 }
0x1c0e   : > { %5406 = vmatpush3.bf16.msra.mxu0 %v5403_v47 }
0x1c10   : > { %v4337_v5 = vld [vmem:[#allocation2 + $0x8] sm:$0xff] }
0x1c11   : > { %v4336_v31 = vld [vmem:[#allocation2] sm:$0xff]  ;;  %v4343_v48 = vsel %vm592_vm1, %v4337_v5, 0.0 }
0x1c12   : > { %v4340_v28 = vsel %vm592_vm1, %v4336_v31, 0.0 }
0x1c13   : > { %4341 = vadd.xlane.f32.xlu0 %v4340_v28 }
0x1c17   : > { %4344 = vadd.xlane.f32.xlu0 %v4343_v48 }
0x1ca0   : > { %v4342_v15 = vpop.xlane.xlu0 %4341 }
0x1ca1   : > { %v4346_v38 = vmul.f32 0.03125, %v4342_v15 }
0x1ca3   : > { %v4348_v43 = vsub.f32 %v4336_v31, %v4346_v38 }
0x1ca4   : > { %v4345_v52 = vpop.xlane.xlu0 %4344 }
0x1ca5   : > { %v4347_v56 = vmul.f32 0.03125, %v4345_v52  ;;  %v4350_v1 = vmul.f32 %v4348_v43, %v4348_v43 }
0x1ca7   : > { %v4349_v39 = vsub.f32 %v4337_v5, %v4347_v56  ;;  %v4352_v22 = vsel %vm592_vm1, %v4350_v1, 0.0 }
0x1ca8   : > { %4353 = vadd.xlane.f32.xlu1 %v4352_v22 }
0x1ca9   : > { %v4351_v23 = vmul.f32 %v4349_v39, %v4349_v39 }
0x1cab   : > { %v4355_v24 = vsel %vm592_vm1, %v4351_v23, 0.0 }
0x1cac   : > { %4356 = vadd.xlane.f32.xlu1 %v4355_v24 }
0x1d35   : > { %v4354_v34 = vpop.xlane.xlu1 %4353 }
0x1d36   : > { %v4358_v7 = vmul.f32 0.03125, %v4354_v34 }
0x1d38   : > { %v4360_v17 = vadd.f32 1e-12, %v4358_v7 }
0x1d39   : > { %v4357_v49 = vpop.xlane.xlu1 %4356 }
0x1d3a   : > { %5600 = vrsqrt.f32 %v4360_v17  ;;  %v4359_v35 = vmul.f32 0.03125, %v4357_v49 }
0x1d3c   : > { %v4361_v36 = vadd.f32 1e-12, %v4359_v35 }
0x1d3e   : > { %5602 = vrsqrt.f32 %v4361_v36  ;;  %v4803_v36 = vsel %vm4525_vm3, 1.0, %v5689_v16 }
0x1d44   : > { %v5601_v37 = vpop.eup %5600 }
0x1d45   : > { %v4364_v19 = vmul.f32 %v5601_v37, %v4348_v43 }
0x1d47   : > { %v4370_v41 = vmul.f32 %v4795_v3, %v4364_v19 }
0x1d48   : > { %v5603_v42 = vpop.eup %5602 }
0x1d49   : > { %v4365_v44 = vmul.f32 %v5603_v42, %v4349_v39  ;;  %v4376_v45 = vadd.f32 %v4796_v40, %v4370_v41 }
0x1d4b   : > { %v4371_v46 = vmul.f32 %v4795_v3, %v4365_v44  ;;  %5268 = vmatprep.mubr.msk.f32.mxu0 %vm592_vm1, %v4376_v45  ;;  %v4802_v3 = vsel %vm4524_vm4, 1.0, %v5689_v16 }
0x1d4c   : > { %v4551_v45 = vsel %vm4538_vm5, %v4802_v3, 0.0 }
0x1d4d   : > { %v4377_v50 = vadd.f32 %v4796_v40, %v4371_v46  ;;  %v4552_v46 = vsel %vm4538_vm5, %v4803_v36, 0.0 }
0x1d4f   : > { %5269 = vmatmul.mubr.msk.f32.vlgmr.msra.gmra.mrb[0].mxu0 %vm592_vm1, %v4377_v50 }
0x1e22   : > { %v5270_v53 = vpop.f32.mrb[0].mxu0 }
0x1e23   : > { %v4465_v54 = vadd.f32 %v5270_v53, %v4797_v51  ;;  %v4459_v55 = vpop.f32.mrb[1].mxu0 }
0x1e24   : > { %v6416_v2 = vadd.f32 %v4797_v51, %v4459_v55  ;;  %v4553_v51 = vadd.f32 %v4552_v46, %v4551_v45 }
0x1e25   : > { %v4471_v8 = vsel %vm2595_vm14, %v4465_v54, -inf }
0x1e26   : > { %4472 = vmax.xlane.f32.xlu1 %v4471_v8  ;;  %v4468_v32 = vsel %vm2595_vm14, %v6416_v2, -inf }
0x1e27   : > { %4469 = vmax.xlane.f32.xlu0 %v4468_v32 }
0x1eb3   : > { %v4473_v18 = vpop.xlane.xlu1 %4472 }
0x1eb4   : > { %v4475_v59 = vsub.f32 %v4465_v54, %v4473_v18  ;;  %v4470_v61 = vpop.xlane.xlu0 %4469 }
0x1eb5   : > { %v4474_v62 = vsub.f32 %v6416_v2, %v4470_v61 }
0x1eb6   : > { %v4478_v21 = vmul.f32 1.442695, %v4475_v59 }
0x1eb7   : > { %v4476_v63 = vmul.f32 1.442695, %v4474_v62 }
0x1eb8   : > { %5604 = vpow2.f32 %v4478_v21 }
0x1eb9   : > { %5606 = vpow2.f32 %v4476_v63 }
0x1ec2   : > { %v5605_v0 = vpop.eup %5604 }
0x1ec3   : > { %v5607_v4 = vpop.eup %5606  ;;  %v4483_v30 = vsel %vm2595_vm14, %v5605_v0, 0.0 }
0x1ec4   : > { %4484 = vadd.xlane.f32.xlu1 %v4483_v30  ;;  %v4480_v10 = vsel %vm2595_vm14, %v5607_v4, 0.0 }
0x1ec5   : > { %4481 = vadd.xlane.f32.xlu0 %v4480_v10 }
0x1ed5   : > { %4500 = vperm.xlu1 %5599, %v4495_v9  }
0x1edb   : > { %4497 = vperm.xlu0 %5598, %v4494_v11  }
0x1f51   : > { %v4485_v12 = vpop.xlane.xlu1 %4484 }
0x1f52   : > { %5608 = vlog2.f32 %v4485_v12  ;;  %v4482_v14 = vpop.xlane.xlu0 %4481 }
0x1f53   : > { %5610 = vlog2.f32 %v4482_v14 }
0x1f55   : > { %v4501_v13 = vpop.permute.xlu1 %4500 }
0x1f56   : > { %vm4503_vm1 = vcmp.eq.s32.totalorder %v5916_v57, %v4501_v13 }
0x1f57   : > { %v4801_v60 = vsel %vm4503_vm1, 1.0, %v5689_v16 }
0x1f58   : > { %v4509_v20 = vmul.f32 0.9, %v4801_v60  ;;  %v4511_v6 = vsub.f32 1.0, %v4801_v60 }
0x1f5a   : > { %v4513_v31 = vmul.f32 0.006666667, %v4511_v6  ;;  %v4498_v5 = vpop.permute.xlu0 %4497 }
0x1f5b   : > { %vm4502_vm2 = vcmp.eq.s32.totalorder %v5916_v57, %v4498_v5 }
0x1f5c   : > { %v4800_v28 = vsel %vm4502_vm2, 1.0, %v5689_v16  ;;  %v4515_v48 = vadd.f32 %v4513_v31, %v4509_v20  ;;  %v5609_v38 = vpop.eup %5608 }
0x1f5d   : > { %v4510_v15 = vsub.f32 1.0, %v4800_v28  ;;  %v4508_v43 = vmul.f32 0.9, %v4800_v28  ;;  %v4489_v56 = vmul.f32 0.6931472, %v5609_v38  ;;  %v5611_v39 = vpop.eup %5610 }
0x1f5e   : > { %5612 = vlog2.f32 %v4515_v48  ;;  %v4487_v23 = vmul.f32 0.6931472, %v5611_v39 }
0x1f5f   : > { %v4512_v52 = vmul.f32 0.006666667, %v4510_v15  ;;  %v4491_v22 = vadd.f32 %v4489_v56, %v4473_v18 }
0x1f60   : > { %v4490_v27 = vadd.f32 %v4487_v23, %v4470_v61 }
0x1f61   : > { %v4514_v1 = vadd.f32 %v4512_v52, %v4508_v43  ;;  %v4493_v25 = vsub.f32 %v4465_v54, %v4491_v22 }
0x1f62   : > { %v4492_v47 = vsub.f32 %v6416_v2, %v4490_v27 }
0x1f63   : > { %5614 = vlog2.f32 %v4514_v1 }
0x1f68   : > { %v5613_v24 = vpop.eup %5612 }
0x1f69   : > { %v4519_v26 = vmul.f32 0.6931472, %v5613_v24 }
0x1f6b   : > { %v4521_v29 = vsub.f32 %v4519_v26, %v4493_v25 }
0x1f6d   : > { %v5615_v33 = vpop.eup %5614  ;;  %v4523_v57 = vmul.f32 %v4521_v29, %v4515_v48 }
0x1f6e   : > { %v4517_v34 = vmul.f32 0.6931472, %v5615_v33 }
0x1f6f   : > { %v4533_v7 = vsel %vm2595_vm14, %v4523_v57, 0.0 }
0x1f70   : > { %4534 = vadd.xlane.f32.xlu0 %v4533_v7  ;;  %v4520_v17 = vsub.f32 %v4517_v34, %v4492_v47 }
0x1f72   : > { %v4522_v49 = vmul.f32 %v4520_v17, %v4514_v1 }
0x1f74   : > { %v4530_v35 = vsel %vm2595_vm14, %v4522_v49, 0.0 }
0x1f75   : > { %4531 = vadd.xlane.f32.xlu1 %v4530_v35 }
0x1ffd   : > { %v4535_v37 = vpop.xlane.xlu0 %4534 }
0x1ffe   : > { %v4537_v19 = vmul.f32 %v4803_v36, %v4535_v37 }
0x2000   : > { %v4540_v44 = vsel %vm4538_vm5, %v4537_v19, 0.0 }
0x2002   : > { %v4532_v40 = vpop.xlane.xlu1 %4531 }
0x2003   : > { %v4536_v41 = vmul.f32 %v4802_v3, %v4532_v40 }
0x2005   : > { %v4539_v42 = vsel %vm4538_vm5, %v4536_v41, 0.0 }
0x2006   : > { %v4541_v50 = vadd.f32 %v4540_v44, %v4539_v42 }
0x2008   : > { %4542 = vadd.xlane.f32.xlu1 %v4541_v50 }
0x200c   : > { %4554 = vadd.xlane.f32.xlu1 %v4553_v51 }
0x2095   : > { %v4543_v53 = vpop.xlane.xlu1 %4542 }
0x2096   : > { %v4544_v54 = vrot.slane %v4543_v53, 4 }
0x2098   : > { %v4545_v55 = vadd.f32 %v4544_v54, %v4543_v53 }
0x2099   : > { %v4555_v2 = vpop.xlane.xlu1 %4554 }
0x209a   : > { %v4546_v8 = vrot.slane %v4545_v55, 2  ;;  %v4556_v32 = vrot.slane %v4555_v2, 4 }
0x209c   : > { %v4557_v58 = vadd.f32 %v4556_v32, %v4555_v2  ;;  %v4547_v18 = vadd.f32 %v4546_v8, %v4545_v55 }
0x209e   : > { %v4558_v59 = vrot.slane %v4557_v58, 2  ;;  %v4548_v61 = vrot.slane %v4547_v18, 1 }
0x20a0   : > { %v4559_v62 = vadd.f32 %v4558_v59, %v4557_v58  ;;  %v4549_v21 = vadd.f32 %v4548_v61, %v4547_v18 }
0x20a2   : > { %5407 = vpush %v4549_v21  ;;  %v4560_v63 = vrot.slane %v4559_v62, 1 }
0x20a4   : > { %v4561_v0 = vadd.f32 %v4560_v63, %v4559_v62 }
0x20a6   : > { %5409 = vpush %v4561_v0 }
0x20d3   : > { %s5408_s28 = spop %5407 }
0x20d7   : > { %s5410_s15 = spop %5409 }
0x20d8   : > { %s4563_s19 = smax.f32 %s5690_s16, %s5410_s15 }
0x20d9   : > { %v4564_v4 = vstv %s4563_s19 }
0x20da   : > { %5616 = vrcp.f32 %v4564_v4 }
0x20e4   : > { %v5617_v30 = vpop.eup %5616 }
0x20e5   : > { %5411 = vpush %v5617_v30 }
0x2116   : > { %s5412_s22 = spop %5411 }
0x2117   : > { %s4567_s26 = smul.f32 %s5412_s22, %s5408_s28 }
0x2119   : > { %4569 = sst [smem:[#allocation7]] %s4567_s26 }
0x211a PF: > { %p5417_p2 = scmp.eq.s32.totalorder %s5784_s27, 1  ;;  %s6482_s30 = sld [smem:[#allocation15_spill]] }
0x2120   : > { %s5642_s18 = scalar_lea.hbm %s6482_s30, 16 }
0x2121   : > { %p5643_p3 = scmp.ne.s32.totalorder %s6482_s30, %s5642_s18  ;;  %p5648_p6 = scmp.lt.u32.totalorder %s5642_s18, %s6482_s30 }
0x2123   : > { %p5644_p4 = pnand %p5643_p3, %p5417_p2 }
0x2125   : > { %p5645_p5 = pneg %p5644_p4 }
0x2127   : > { %p5650_p7 = pnand %p5648_p6, %p5645_p5 }
0x2129   : > { %5653 = shalt.err (!%p5650_p7)
}
0x212a   : > { %s5691_s1 = smov [#allocation7]  }
0x212b   : > { %5414 = dma.smem_to_hbm (%p5417_p2), %s5691_s1, 16, %s6482_s30, [#allocation8]  }
0x212c   : > { %5661 = dma.done.wait (%p5417_p2), [#allocation8], 16  }
0x212d   : > { %5663 = vsyncadd (%p5417_p2), [#allocation8], 4294967280 }
0x212e   : > { %4583 = sfence }
0x212f PF: > { %s6483_s27 = sld [smem:[#allocation11_spill]] }
0x2135   : > { %s36_s1 = sadd.s32 1, %s6483_s27  }
0x2136   : > { %p33_p8 = scmp.ge.s32.totalorder %s36_s1, 4  }
0x2138   :  { %35 = sbr.rel (!%p33_p8) target bundleno = 28 (0x1c), region = 129 }
0x213f   :  { %4589 = vsyncpa [#allocation8], 1 }
0x2140   :  { %4591 = vsyncpa [#allocation8 + $0x1], 1 }

</bundles_post_ra>
